<compile_context>
chip_gen: v6e
topology: v6e:2x2x1
jax: 0.10.0
libtpu: 0.0.40
codegen_flags: <defaults>
</compile_context>

<pallas_src>
import functools

import jax
import jax.numpy as jnp
from jax import lax
from jax.experimental import pallas as pl
from jax.experimental.pallas import tpu as pltpu


def _decode_block_kernel(*refs, flag, H, W):
    """Fused dropout + 3x3 conv + activation stack for one batch element.

    Flattened layout: a padded image (C, H+2, W+2) is stored as
    (C, (H+2)*(W+2) + 2) with one zero guard element on each end, so that the
    shifted slab for filter tap (kh, kw) is the static lane slice
    [kh*(W+2)+kw : kh*(W+2)+kw + H*(W+2)].  Outputs live on the (H, W+2) grid;
    the two wrap-around columns per row are zeroed by the gate inputs and
    sliced away in the wrapper.
    """
    Wp = W + 2
    L = H * Wp                      # flattened (H, W+2) output grid

    if flag:
        (x_ref, w1_ref, b1_ref, g2_ref, w2_ref, b2_ref,
         g3_ref, w3_ref, b3_ref, out_ref) = refs
    else:
        (x_ref, w1_ref, b1_ref, g2_ref, w2_ref, b2_ref, out_ref) = refs

    def conv3x3(a_store, w_ref, b_ref):
        # a_store: (Cin, (H+2)*(W+2)+2); w_ref: (9, Cout, Cin); b_ref: (Cout, 1)
        n_out = w_ref.shape[1]
        acc = jnp.zeros((n_out, L), jnp.float32)
        for kh in range(3):
            for kw in range(3):
                off = kh * Wp + kw
                acc = acc + jnp.dot(
                    w_ref[kh * 3 + kw],
                    a_store[:, off:off + L],
                    preferred_element_type=jnp.float32,
                    precision=lax.Precision.HIGHEST)
        return acc + b_ref[...]          # (Cout, 1) broadcast over lanes

    def leaky(v):
        return jnp.where(v >= 0.0, v, 0.1 * v)

    def repad(a):
        # (C, H*(W+2)) -> (C, (H+2)*(W+2)+2): prepend/append one padded row
        # plus the guard element (a's wrap columns are already zeroed by the
        # gates, giving the left/right zero padding of the interior rows).
        z = jnp.zeros((a.shape[0], Wp + 1), jnp.float32)
        return jnp.concatenate([z, a, z], axis=1)

    x = x_ref[0]                                        # (Cin, L2)

    # Layer 1: conv1 + LeakyReLU (input dropout already applied on the host).
    a1 = leaky(conv3x3(x, w1_ref, b1_ref))
    a1 = a1 * g2_ref[0]            # dropout gate for conv2 + wrap-col zeroing

    # Layer 2: conv2 + LeakyReLU.
    a2 = leaky(conv3x3(repad(a1), w2_ref, b2_ref))

    if flag:
        a2g = a2 * g3_ref[0]       # dropout gate for conv3 + wrap-col zeroing
        a3 = conv3x3(repad(a2g), w3_ref, b3_ref)
        out_ref[0] = jax.nn.sigmoid(a3)
    else:
        out_ref[0] = a2


def _weight_for_kernel(w):
    """(3, 3, Cin, Cout) HWIO -> (9, Cout, Cin), tap index t = kh*3 + kw."""
    cout, cin = w.shape[3], w.shape[2]
    return jnp.transpose(w, (0, 1, 3, 2)).reshape(9, cout, cin)


def decode_block_forward(params, x_nchw, *, p=0.7, flag=False,
                         training=True, seed=0):
    """Pallas implementation of DecodeBlock.forward (NCHW in, NCHW out)."""
    N, cin, H, W = x_nchw.shape
    mid_c = params["w1"].shape[-1]
    out_c = params["w2"].shape[-1]
    fin_c = params["w3"].shape[-1]

    Wp = W + 2
    L = H * Wp                       # flattened (H, W+2) grid
    L2 = (H + 2) * Wp + 2            # flattened padded grid + 2 guard elements

    x = x_nchw.astype(jnp.float32)

    # Column gate: zero the two wrap-around columns of each flattened row.
    col = jnp.arange(L) % Wp
    col_mask = ((col != 0) & (col != Wp - 1)).astype(jnp.float32)     # (L,)
    gate2 = jnp.broadcast_to(col_mask, (N, mid_c, L)).astype(jnp.float32)
    gate3 = (jnp.broadcast_to(col_mask, (N, out_c, L)).astype(jnp.float32)
             if flag else None)

    # Dropout (training mode): fold Bernoulli(1-p)/(1-p) masks into the gates.
    p_eff = float(p) if training else 0.0
    if p_eff > 0.0:
        keep = 1.0 - p_eff
        k1, k2, k3 = jax.random.split(jax.random.PRNGKey(seed), 3)
        x = x * (jax.random.bernoulli(k1, keep, x.shape)
                 .astype(jnp.float32) / keep)
        gate2 = gate2 * (jax.random.bernoulli(k2, keep, gate2.shape)
                         .astype(jnp.float32) / keep)
        if flag:
            gate3 = gate3 * (jax.random.bernoulli(k3, keep, gate3.shape)
                             .astype(jnp.float32) / keep)

    # Flattened, zero-padded, channel-major input: (N, Cin, L2).
    x_pad = jnp.pad(x, ((0, 0), (0, 0), (1, 1), (1, 1)))
    x_store = jnp.pad(x_pad.reshape(N, cin, (H + 2) * Wp),
                      ((0, 0), (0, 0), (1, 1)))

    w1 = _weight_for_kernel(params["w1"]); b1 = params["b1"].reshape(mid_c, 1)
    w2 = _weight_for_kernel(params["w2"]); b2 = params["b2"].reshape(out_c, 1)

    in_specs = [
        pl.BlockSpec((1, cin, L2), lambda b: (b, 0, 0)),
        pl.BlockSpec((9, mid_c, cin), lambda b: (0, 0, 0)),
        pl.BlockSpec((mid_c, 1), lambda b: (0, 0)),
        pl.BlockSpec((1, mid_c, L), lambda b: (b, 0, 0)),
        pl.BlockSpec((9, out_c, mid_c), lambda b: (0, 0, 0)),
        pl.BlockSpec((out_c, 1), lambda b: (0, 0)),
    ]
    args = [x_store, w1, b1, gate2, w2, b2]

    if flag:
        w3 = _weight_for_kernel(params["w3"])
        b3 = params["b3"].reshape(fin_c, 1)
        in_specs += [
            pl.BlockSpec((1, out_c, L), lambda b: (b, 0, 0)),
            pl.BlockSpec((9, fin_c, out_c), lambda b: (0, 0, 0)),
            pl.BlockSpec((fin_c, 1), lambda b: (0, 0)),
        ]
        args += [gate3, w3, b3]

    last_c = fin_c if flag else out_c
    kernel = functools.partial(_decode_block_kernel, flag=flag, H=H, W=W)

    out = pl.pallas_call(
        kernel,
        out_shape=jax.ShapeDtypeStruct((N, last_c, L), jnp.float32),
        grid=(N,),
        in_specs=in_specs,
        out_specs=pl.BlockSpec((1, last_c, L), lambda b: (b, 0, 0)),
        compiler_params=pltpu.CompilerParams(
            dimension_semantics=("parallel",)),
    )(*args)

    # (N, C, H*(W+2)) -> (N, C, H, W): drop the wrap-around columns.
    return out.reshape(N, last_c, H, Wp)[:, :, :, 1:W + 1]


def init_decode_block_params(key, in_channel, mid_channel, out_channel,
                             final_channel=3):
    """Deterministic PyTorch-style (kaiming-uniform-ish) init, HWIO weights."""
    ks = jax.random.split(key, 6)

    def conv_init(kw, kb, cin, cout):
        fan_in = cin * 9
        bound = 1.0 / (fan_in ** 0.5)
        w = jax.random.uniform(kw, (3, 3, cin, cout), jnp.float32, -bound, bound)
        b = jax.random.uniform(kb, (cout,), jnp.float32, -bound, bound)
        return w, b

    w1, b1 = conv_init(ks[0], ks[1], in_channel, mid_channel)
    w2, b2 = conv_init(ks[2], ks[3], mid_channel, out_channel)
    w3, b3 = conv_init(ks[4], ks[5], out_channel, final_channel)
    return dict(w1=w1, b1=b1, w2=w2, b2=b2, w3=w3, b3=b3)


def _ref_forward(params, x_nchw, flag):
    """Pure-JAX reference (eval mode: dropout == identity)."""
    def conv(h, w, b):
        y = lax.conv_general_dilated(
            h, w, (1, 1), "SAME",
            dimension_numbers=("NCHW", "HWIO", "NCHW"))
        return y + b.reshape(1, -1, 1, 1)

    o = conv(x_nchw, params["w1"], params["b1"])
    o = jnp.where(o >= 0, o, 0.1 * o)
    o = conv(o, params["w2"], params["b2"])
    o = jnp.where(o >= 0, o, 0.1 * o)
    if flag:
        o = conv(o, params["w3"], params["b3"])
        o = jax.nn.sigmoid(o)
    return o


if __name__ == "__main__":
    key = jax.random.PRNGKey(0)
    kp, kx = jax.random.split(key)

    # DecodeBlock(in_channel=4, mid_channel=8, out_channel=8, final_channel=3)
    params = init_decode_block_params(kp, 4, 8, 8, 3)
    x = jax.random.normal(kx, (2, 4, 16, 16), jnp.float32)   # NCHW, like PyTorch

    # Eval mode (dropout = identity), flag=True: check vs XLA conv reference.
    out_eval_t = decode_block_forward(params, x, p=0.7, flag=True,
                                      training=False)
    out_eval_t = jax.block_until_ready(out_eval_t)
    ref_t = _ref_forward(params, x, flag=True)
    assert out_eval_t.shape == (2, 3, 16, 16)
    assert jnp.allclose(out_eval_t, ref_t, atol=1e-4, rtol=1e-4), \
        "flag=True mismatch vs reference"

    # Eval mode, flag=False.
    out_eval_f = decode_block_forward(params, x, p=0.7, flag=False,
                                      training=False)
    out_eval_f = jax.block_until_ready(out_eval_f)
    ref_f = _ref_forward(params, x, flag=False)
    assert out_eval_f.shape == (2, 8, 16, 16)
    assert jnp.allclose(out_eval_f, ref_f, atol=1e-4, rtol=1e-4), \
        "flag=False mismatch vs reference"

    # Training mode (stochastic dropout), flag=True.
    out_train = decode_block_forward(params, x, p=0.7, flag=True,
                                     training=True, seed=1234)
    out_train = jax.block_until_ready(out_train)
    assert out_train.shape == (2, 3, 16, 16)
    assert bool(jnp.all(jnp.isfinite(out_train)))
    assert bool(jnp.all((out_train >= 0.0) & (out_train <= 1.0)))

    print("KERNEL_OK")
</pallas_src>

<mosaic_0001>
module attributes {stable_mosaic.version = 11 : i64} {
  func.func @_decode_block_kernel(%arg0: i32, %arg1: memref<1x4x326xf32, #tpu.memory_space<vmem>>, %arg2: memref<9x8x4xf32, #tpu.memory_space<vmem>>, %arg3: memref<8x1xf32, #tpu.memory_space<vmem>>, %arg4: memref<1x8x288xf32, #tpu.memory_space<vmem>>, %arg5: memref<9x8x8xf32, #tpu.memory_space<vmem>>, %arg6: memref<8x1xf32, #tpu.memory_space<vmem>>, %arg7: memref<1x8x288xf32, #tpu.memory_space<vmem>>, %arg8: memref<9x3x8xf32, #tpu.memory_space<vmem>>, %arg9: memref<3x1xf32, #tpu.memory_space<vmem>>, %arg10: memref<1x3x288xf32, #tpu.memory_space<vmem>>) attributes {dimension_semantics = [#tpu.dimension_semantics<parallel>], iteration_bounds = array<i64: 2>, scalar_prefetch = 0 : i64, scratch_operands = 0 : i64, tpu.core_type = #tpu.core_type<tc>, window_params = [{transform_indices = @transform_0, window_bounds = array<i64: 1, 4, 326>}, {pipeline_mode = #tpu.pipeline_mode<synchronous>, transform_indices = @transform_1, window_bounds = array<i64: 9, 8, 4>}, {pipeline_mode = #tpu.pipeline_mode<synchronous>, transform_indices = @transform_2, window_bounds = array<i64: 8, 1>}, {transform_indices = @transform_3, window_bounds = array<i64: 1, 8, 288>}, {pipeline_mode = #tpu.pipeline_mode<synchronous>, transform_indices = @transform_4, window_bounds = array<i64: 9, 8, 8>}, {pipeline_mode = #tpu.pipeline_mode<synchronous>, transform_indices = @transform_5, window_bounds = array<i64: 8, 1>}, {transform_indices = @transform_6, window_bounds = array<i64: 1, 8, 288>}, {pipeline_mode = #tpu.pipeline_mode<synchronous>, transform_indices = @transform_7, window_bounds = array<i64: 9, 3, 8>}, {pipeline_mode = #tpu.pipeline_mode<synchronous>, transform_indices = @transform_8, window_bounds = array<i64: 3, 1>}, {transform_indices = @transform_9, window_bounds = array<i64: 1, 3, 288>}]} {
    %c0 = arith.constant 0 : index
    %c0_0 = arith.constant 0 : index
    %c0_1 = arith.constant 0 : index
    %0 = vector.load %arg1[%c0, %c0_0, %c0_1] : memref<1x4x326xf32, #tpu.memory_space<vmem>>, vector<1x4x326xf32>
    %1 = vector.shape_cast %0 : vector<1x4x326xf32> to vector<4x326xf32>
    %cst = arith.constant 0.000000e+00 : f32
    %2 = vector.broadcast %cst : f32 to vector<8x288xf32>
    %c0_2 = arith.constant 0 : index
    %c0_3 = arith.constant 0 : index
    %c0_4 = arith.constant 0 : index
    %3 = vector.load %arg2[%c0_2, %c0_3, %c0_4] : memref<9x8x4xf32, #tpu.memory_space<vmem>>, vector<1x8x4xf32>
    %4 = vector.shape_cast %3 : vector<1x8x4xf32> to vector<8x4xf32>
    %5 = vector.extract_strided_slice %1 {offsets = [0, 0], sizes = [4, 288], strides = [1, 1]} : vector<4x326xf32> to vector<4x288xf32>
    %cst_5 = arith.constant dense<0.000000e+00> : vector<8x288xf32>
    %6 = tpu.matmul %4, %5, %cst_5 {dimension_numbers = #tpu.dot_dimension_numbers<[1], [0], [0], [1], [0, 0, 1, 1], [], []>, precision = #tpu.contract_precision<fp32>} : vector<8x4xf32>, vector<4x288xf32>, vector<8x288xf32> -> vector<8x288xf32>
    %7 = arith.addf %2, %6 : vector<8x288xf32>
    %c1 = arith.constant 1 : index
    %c0_6 = arith.constant 0 : index
    %c0_7 = arith.constant 0 : index
    %8 = vector.load %arg2[%c1, %c0_6, %c0_7] : memref<9x8x4xf32, #tpu.memory_space<vmem>>, vector<1x8x4xf32>
    %9 = vector.shape_cast %8 : vector<1x8x4xf32> to vector<8x4xf32>
    %10 = vector.extract_strided_slice %1 {offsets = [0, 1], sizes = [4, 288], strides = [1, 1]} : vector<4x326xf32> to vector<4x288xf32>
    %cst_8 = arith.constant dense<0.000000e+00> : vector<8x288xf32>
    %11 = tpu.matmul %9, %10, %cst_8 {dimension_numbers = #tpu.dot_dimension_numbers<[1], [0], [0], [1], [0, 0, 1, 1], [], []>, precision = #tpu.contract_precision<fp32>} : vector<8x4xf32>, vector<4x288xf32>, vector<8x288xf32> -> vector<8x288xf32>
    %12 = arith.addf %7, %11 : vector<8x288xf32>
    %c2 = arith.constant 2 : index
    %c0_9 = arith.constant 0 : index
    %c0_10 = arith.constant 0 : index
    %13 = vector.load %arg2[%c2, %c0_9, %c0_10] : memref<9x8x4xf32, #tpu.memory_space<vmem>>, vector<1x8x4xf32>
    %14 = vector.shape_cast %13 : vector<1x8x4xf32> to vector<8x4xf32>
    %15 = vector.extract_strided_slice %1 {offsets = [0, 2], sizes = [4, 288], strides = [1, 1]} : vector<4x326xf32> to vector<4x288xf32>
    %cst_11 = arith.constant dense<0.000000e+00> : vector<8x288xf32>
    %16 = tpu.matmul %14, %15, %cst_11 {dimension_numbers = #tpu.dot_dimension_numbers<[1], [0], [0], [1], [0, 0, 1, 1], [], []>, precision = #tpu.contract_precision<fp32>} : vector<8x4xf32>, vector<4x288xf32>, vector<8x288xf32> -> vector<8x288xf32>
    %17 = arith.addf %12, %16 : vector<8x288xf32>
    %c3 = arith.constant 3 : index
    %c0_12 = arith.constant 0 : index
    %c0_13 = arith.constant 0 : index
    %18 = vector.load %arg2[%c3, %c0_12, %c0_13] : memref<9x8x4xf32, #tpu.memory_space<vmem>>, vector<1x8x4xf32>
    %19 = vector.shape_cast %18 : vector<1x8x4xf32> to vector<8x4xf32>
    %20 = vector.extract_strided_slice %1 {offsets = [0, 18], sizes = [4, 288], strides = [1, 1]} : vector<4x326xf32> to vector<4x288xf32>
    %cst_14 = arith.constant dense<0.000000e+00> : vector<8x288xf32>
    %21 = tpu.matmul %19, %20, %cst_14 {dimension_numbers = #tpu.dot_dimension_numbers<[1], [0], [0], [1], [0, 0, 1, 1], [], []>, precision = #tpu.contract_precision<fp32>} : vector<8x4xf32>, vector<4x288xf32>, vector<8x288xf32> -> vector<8x288xf32>
    %22 = arith.addf %17, %21 : vector<8x288xf32>
    %c4 = arith.constant 4 : index
    %c0_15 = arith.constant 0 : index
    %c0_16 = arith.constant 0 : index
    %23 = vector.load %arg2[%c4, %c0_15, %c0_16] : memref<9x8x4xf32, #tpu.memory_space<vmem>>, vector<1x8x4xf32>
    %24 = vector.shape_cast %23 : vector<1x8x4xf32> to vector<8x4xf32>
    %25 = vector.extract_strided_slice %1 {offsets = [0, 19], sizes = [4, 288], strides = [1, 1]} : vector<4x326xf32> to vector<4x288xf32>
    %cst_17 = arith.constant dense<0.000000e+00> : vector<8x288xf32>
    %26 = tpu.matmul %24, %25, %cst_17 {dimension_numbers = #tpu.dot_dimension_numbers<[1], [0], [0], [1], [0, 0, 1, 1], [], []>, precision = #tpu.contract_precision<fp32>} : vector<8x4xf32>, vector<4x288xf32>, vector<8x288xf32> -> vector<8x288xf32>
    %27 = arith.addf %22, %26 : vector<8x288xf32>
    %c5 = arith.constant 5 : index
    %c0_18 = arith.constant 0 : index
    %c0_19 = arith.constant 0 : index
    %28 = vector.load %arg2[%c5, %c0_18, %c0_19] : memref<9x8x4xf32, #tpu.memory_space<vmem>>, vector<1x8x4xf32>
    %29 = vector.shape_cast %28 : vector<1x8x4xf32> to vector<8x4xf32>
    %30 = vector.extract_strided_slice %1 {offsets = [0, 20], sizes = [4, 288], strides = [1, 1]} : vector<4x326xf32> to vector<4x288xf32>
    %cst_20 = arith.constant dense<0.000000e+00> : vector<8x288xf32>
    %31 = tpu.matmul %29, %30, %cst_20 {dimension_numbers = #tpu.dot_dimension_numbers<[1], [0], [0], [1], [0, 0, 1, 1], [], []>, precision = #tpu.contract_precision<fp32>} : vector<8x4xf32>, vector<4x288xf32>, vector<8x288xf32> -> vector<8x288xf32>
    %32 = arith.addf %27, %31 : vector<8x288xf32>
    %c6 = arith.constant 6 : index
    %c0_21 = arith.constant 0 : index
    %c0_22 = arith.constant 0 : index
    %33 = vector.load %arg2[%c6, %c0_21, %c0_22] : memref<9x8x4xf32, #tpu.memory_space<vmem>>, vector<1x8x4xf32>
    %34 = vector.shape_cast %33 : vector<1x8x4xf32> to vector<8x4xf32>
    %35 = vector.extract_strided_slice %1 {offsets = [0, 36], sizes = [4, 288], strides = [1, 1]} : vector<4x326xf32> to vector<4x288xf32>
    %cst_23 = arith.constant dense<0.000000e+00> : vector<8x288xf32>
    %36 = tpu.matmul %34, %35, %cst_23 {dimension_numbers = #tpu.dot_dimension_numbers<[1], [0], [0], [1], [0, 0, 1, 1], [], []>, precision = #tpu.contract_precision<fp32>} : vector<8x4xf32>, vector<4x288xf32>, vector<8x288xf32> -> vector<8x288xf32>
    %37 = arith.addf %32, %36 : vector<8x288xf32>
    %c7 = arith.constant 7 : index
    %c0_24 = arith.constant 0 : index
    %c0_25 = arith.constant 0 : index
    %38 = vector.load %arg2[%c7, %c0_24, %c0_25] : memref<9x8x4xf32, #tpu.memory_space<vmem>>, vector<1x8x4xf32>
    %39 = vector.shape_cast %38 : vector<1x8x4xf32> to vector<8x4xf32>
    %40 = vector.extract_strided_slice %1 {offsets = [0, 37], sizes = [4, 288], strides = [1, 1]} : vector<4x326xf32> to vector<4x288xf32>
    %cst_26 = arith.constant dense<0.000000e+00> : vector<8x288xf32>
    %41 = tpu.matmul %39, %40, %cst_26 {dimension_numbers = #tpu.dot_dimension_numbers<[1], [0], [0], [1], [0, 0, 1, 1], [], []>, precision = #tpu.contract_precision<fp32>} : vector<8x4xf32>, vector<4x288xf32>, vector<8x288xf32> -> vector<8x288xf32>
    %42 = arith.addf %37, %41 : vector<8x288xf32>
    %c8 = arith.constant 8 : index
    %c0_27 = arith.constant 0 : index
    %c0_28 = arith.constant 0 : index
    %43 = vector.load %arg2[%c8, %c0_27, %c0_28] : memref<9x8x4xf32, #tpu.memory_space<vmem>>, vector<1x8x4xf32>
    %44 = vector.shape_cast %43 : vector<1x8x4xf32> to vector<8x4xf32>
    %45 = vector.extract_strided_slice %1 {offsets = [0, 38], sizes = [4, 288], strides = [1, 1]} : vector<4x326xf32> to vector<4x288xf32>
    %cst_29 = arith.constant dense<0.000000e+00> : vector<8x288xf32>
    %46 = tpu.matmul %44, %45, %cst_29 {dimension_numbers = #tpu.dot_dimension_numbers<[1], [0], [0], [1], [0, 0, 1, 1], [], []>, precision = #tpu.contract_precision<fp32>} : vector<8x4xf32>, vector<4x288xf32>, vector<8x288xf32> -> vector<8x288xf32>
    %47 = arith.addf %42, %46 : vector<8x288xf32>
    %c0_30 = arith.constant 0 : index
    %c0_31 = arith.constant 0 : index
    %48 = vector.load %arg3[%c0_30, %c0_31] : memref<8x1xf32, #tpu.memory_space<vmem>>, vector<8x1xf32>
    %49 = vector.broadcast %48 : vector<8x1xf32> to vector<8x288xf32>
    %50 = arith.addf %47, %49 : vector<8x288xf32>
    %cst_32 = arith.constant 0.000000e+00 : f32
    %51 = vector.broadcast %cst_32 : f32 to vector<8x288xf32>
    %52 = arith.cmpf oge, %50, %51 : vector<8x288xf32>
    %cst_33 = arith.constant 1.000000e-01 : f32
    %53 = vector.broadcast %cst_33 : f32 to vector<8x288xf32>
    %54 = arith.mulf %53, %50 : vector<8x288xf32>
    %55 = arith.select %52, %50, %54 : vector<8x288xi1>, vector<8x288xf32>
    %c0_34 = arith.constant 0 : index
    %c0_35 = arith.constant 0 : index
    %c0_36 = arith.constant 0 : index
    %56 = vector.load %arg4[%c0_34, %c0_35, %c0_36] : memref<1x8x288xf32, #tpu.memory_space<vmem>>, vector<1x8x288xf32>
    %57 = vector.shape_cast %56 : vector<1x8x288xf32> to vector<8x288xf32>
    %58 = arith.mulf %55, %57 : vector<8x288xf32>
    %cst_37 = arith.constant 0.000000e+00 : f32
    %59 = vector.broadcast %cst_37 : f32 to vector<8x19xf32>
    %60 = tpu.concatenate %59, %58, %59 in 1 : vector<8x19xf32>, vector<8x288xf32>, vector<8x19xf32> -> vector<8x326xf32>
    %cst_38 = arith.constant 0.000000e+00 : f32
    %61 = vector.broadcast %cst_38 : f32 to vector<8x288xf32>
    %c0_39 = arith.constant 0 : index
    %c0_40 = arith.constant 0 : index
    %c0_41 = arith.constant 0 : index
    %62 = vector.load %arg5[%c0_39, %c0_40, %c0_41] : memref<9x8x8xf32, #tpu.memory_space<vmem>>, vector<1x8x8xf32>
    %63 = vector.shape_cast %62 : vector<1x8x8xf32> to vector<8x8xf32>
    %64 = vector.extract_strided_slice %60 {offsets = [0, 0], sizes = [8, 288], strides = [1, 1]} : vector<8x326xf32> to vector<8x288xf32>
    %cst_42 = arith.constant dense<0.000000e+00> : vector<8x288xf32>
    %65 = tpu.matmul %63, %64, %cst_42 {dimension_numbers = #tpu.dot_dimension_numbers<[1], [0], [0], [1], [0, 0, 1, 1], [], []>, precision = #tpu.contract_precision<fp32>} : vector<8x8xf32>, vector<8x288xf32>, vector<8x288xf32> -> vector<8x288xf32>
    %66 = arith.addf %61, %65 : vector<8x288xf32>
    %c1_43 = arith.constant 1 : index
    %c0_44 = arith.constant 0 : index
    %c0_45 = arith.constant 0 : index
    %67 = vector.load %arg5[%c1_43, %c0_44, %c0_45] : memref<9x8x8xf32, #tpu.memory_space<vmem>>, vector<1x8x8xf32>
    %68 = vector.shape_cast %67 : vector<1x8x8xf32> to vector<8x8xf32>
    %69 = vector.extract_strided_slice %60 {offsets = [0, 1], sizes = [8, 288], strides = [1, 1]} : vector<8x326xf32> to vector<8x288xf32>
    %cst_46 = arith.constant dense<0.000000e+00> : vector<8x288xf32>
    %70 = tpu.matmul %68, %69, %cst_46 {dimension_numbers = #tpu.dot_dimension_numbers<[1], [0], [0], [1], [0, 0, 1, 1], [], []>, precision = #tpu.contract_precision<fp32>} : vector<8x8xf32>, vector<8x288xf32>, vector<8x288xf32> -> vector<8x288xf32>
    %71 = arith.addf %66, %70 : vector<8x288xf32>
    %c2_47 = arith.constant 2 : index
    %c0_48 = arith.constant 0 : index
    %c0_49 = arith.constant 0 : index
    %72 = vector.load %arg5[%c2_47, %c0_48, %c0_49] : memref<9x8x8xf32, #tpu.memory_space<vmem>>, vector<1x8x8xf32>
    %73 = vector.shape_cast %72 : vector<1x8x8xf32> to vector<8x8xf32>
    %74 = vector.extract_strided_slice %60 {offsets = [0, 2], sizes = [8, 288], strides = [1, 1]} : vector<8x326xf32> to vector<8x288xf32>
    %cst_50 = arith.constant dense<0.000000e+00> : vector<8x288xf32>
    %75 = tpu.matmul %73, %74, %cst_50 {dimension_numbers = #tpu.dot_dimension_numbers<[1], [0], [0], [1], [0, 0, 1, 1], [], []>, precision = #tpu.contract_precision<fp32>} : vector<8x8xf32>, vector<8x288xf32>, vector<8x288xf32> -> vector<8x288xf32>
    %76 = arith.addf %71, %75 : vector<8x288xf32>
    %c3_51 = arith.constant 3 : index
    %c0_52 = arith.constant 0 : index
    %c0_53 = arith.constant 0 : index
    %77 = vector.load %arg5[%c3_51, %c0_52, %c0_53] : memref<9x8x8xf32, #tpu.memory_space<vmem>>, vector<1x8x8xf32>
    %78 = vector.shape_cast %77 : vector<1x8x8xf32> to vector<8x8xf32>
    %79 = vector.extract_strided_slice %60 {offsets = [0, 18], sizes = [8, 288], strides = [1, 1]} : vector<8x326xf32> to vector<8x288xf32>
    %cst_54 = arith.constant dense<0.000000e+00> : vector<8x288xf32>
    %80 = tpu.matmul %78, %79, %cst_54 {dimension_numbers = #tpu.dot_dimension_numbers<[1], [0], [0], [1], [0, 0, 1, 1], [], []>, precision = #tpu.contract_precision<fp32>} : vector<8x8xf32>, vector<8x288xf32>, vector<8x288xf32> -> vector<8x288xf32>
    %81 = arith.addf %76, %80 : vector<8x288xf32>
    %c4_55 = arith.constant 4 : index
    %c0_56 = arith.constant 0 : index
    %c0_57 = arith.constant 0 : index
    %82 = vector.load %arg5[%c4_55, %c0_56, %c0_57] : memref<9x8x8xf32, #tpu.memory_space<vmem>>, vector<1x8x8xf32>
    %83 = vector.shape_cast %82 : vector<1x8x8xf32> to vector<8x8xf32>
    %84 = vector.extract_strided_slice %60 {offsets = [0, 19], sizes = [8, 288], strides = [1, 1]} : vector<8x326xf32> to vector<8x288xf32>
    %cst_58 = arith.constant dense<0.000000e+00> : vector<8x288xf32>
    %85 = tpu.matmul %83, %84, %cst_58 {dimension_numbers = #tpu.dot_dimension_numbers<[1], [0], [0], [1], [0, 0, 1, 1], [], []>, precision = #tpu.contract_precision<fp32>} : vector<8x8xf32>, vector<8x288xf32>, vector<8x288xf32> -> vector<8x288xf32>
    %86 = arith.addf %81, %85 : vector<8x288xf32>
    %c5_59 = arith.constant 5 : index
    %c0_60 = arith.constant 0 : index
    %c0_61 = arith.constant 0 : index
    %87 = vector.load %arg5[%c5_59, %c0_60, %c0_61] : memref<9x8x8xf32, #tpu.memory_space<vmem>>, vector<1x8x8xf32>
    %88 = vector.shape_cast %87 : vector<1x8x8xf32> to vector<8x8xf32>
    %89 = vector.extract_strided_slice %60 {offsets = [0, 20], sizes = [8, 288], strides = [1, 1]} : vector<8x326xf32> to vector<8x288xf32>
    %cst_62 = arith.constant dense<0.000000e+00> : vector<8x288xf32>
    %90 = tpu.matmul %88, %89, %cst_62 {dimension_numbers = #tpu.dot_dimension_numbers<[1], [0], [0], [1], [0, 0, 1, 1], [], []>, precision = #tpu.contract_precision<fp32>} : vector<8x8xf32>, vector<8x288xf32>, vector<8x288xf32> -> vector<8x288xf32>
    %91 = arith.addf %86, %90 : vector<8x288xf32>
    %c6_63 = arith.constant 6 : index
    %c0_64 = arith.constant 0 : index
    %c0_65 = arith.constant 0 : index
    %92 = vector.load %arg5[%c6_63, %c0_64, %c0_65] : memref<9x8x8xf32, #tpu.memory_space<vmem>>, vector<1x8x8xf32>
    %93 = vector.shape_cast %92 : vector<1x8x8xf32> to vector<8x8xf32>
    %94 = vector.extract_strided_slice %60 {offsets = [0, 36], sizes = [8, 288], strides = [1, 1]} : vector<8x326xf32> to vector<8x288xf32>
    %cst_66 = arith.constant dense<0.000000e+00> : vector<8x288xf32>
    %95 = tpu.matmul %93, %94, %cst_66 {dimension_numbers = #tpu.dot_dimension_numbers<[1], [0], [0], [1], [0, 0, 1, 1], [], []>, precision = #tpu.contract_precision<fp32>} : vector<8x8xf32>, vector<8x288xf32>, vector<8x288xf32> -> vector<8x288xf32>
    %96 = arith.addf %91, %95 : vector<8x288xf32>
    %c7_67 = arith.constant 7 : index
    %c0_68 = arith.constant 0 : index
    %c0_69 = arith.constant 0 : index
    %97 = vector.load %arg5[%c7_67, %c0_68, %c0_69] : memref<9x8x8xf32, #tpu.memory_space<vmem>>, vector<1x8x8xf32>
    %98 = vector.shape_cast %97 : vector<1x8x8xf32> to vector<8x8xf32>
    %99 = vector.extract_strided_slice %60 {offsets = [0, 37], sizes = [8, 288], strides = [1, 1]} : vector<8x326xf32> to vector<8x288xf32>
    %cst_70 = arith.constant dense<0.000000e+00> : vector<8x288xf32>
    %100 = tpu.matmul %98, %99, %cst_70 {dimension_numbers = #tpu.dot_dimension_numbers<[1], [0], [0], [1], [0, 0, 1, 1], [], []>, precision = #tpu.contract_precision<fp32>} : vector<8x8xf32>, vector<8x288xf32>, vector<8x288xf32> -> vector<8x288xf32>
    %101 = arith.addf %96, %100 : vector<8x288xf32>
    %c8_71 = arith.constant 8 : index
    %c0_72 = arith.constant 0 : index
    %c0_73 = arith.constant 0 : index
    %102 = vector.load %arg5[%c8_71, %c0_72, %c0_73] : memref<9x8x8xf32, #tpu.memory_space<vmem>>, vector<1x8x8xf32>
    %103 = vector.shape_cast %102 : vector<1x8x8xf32> to vector<8x8xf32>
    %104 = vector.extract_strided_slice %60 {offsets = [0, 38], sizes = [8, 288], strides = [1, 1]} : vector<8x326xf32> to vector<8x288xf32>
    %cst_74 = arith.constant dense<0.000000e+00> : vector<8x288xf32>
    %105 = tpu.matmul %103, %104, %cst_74 {dimension_numbers = #tpu.dot_dimension_numbers<[1], [0], [0], [1], [0, 0, 1, 1], [], []>, precision = #tpu.contract_precision<fp32>} : vector<8x8xf32>, vector<8x288xf32>, vector<8x288xf32> -> vector<8x288xf32>
    %106 = arith.addf %101, %105 : vector<8x288xf32>
    %c0_75 = arith.constant 0 : index
    %c0_76 = arith.constant 0 : index
    %107 = vector.load %arg6[%c0_75, %c0_76] : memref<8x1xf32, #tpu.memory_space<vmem>>, vector<8x1xf32>
    %108 = vector.broadcast %107 : vector<8x1xf32> to vector<8x288xf32>
    %109 = arith.addf %106, %108 : vector<8x288xf32>
    %cst_77 = arith.constant 0.000000e+00 : f32
    %110 = vector.broadcast %cst_77 : f32 to vector<8x288xf32>
    %111 = arith.cmpf oge, %109, %110 : vector<8x288xf32>
    %cst_78 = arith.constant 1.000000e-01 : f32
    %112 = vector.broadcast %cst_78 : f32 to vector<8x288xf32>
    %113 = arith.mulf %112, %109 : vector<8x288xf32>
    %114 = arith.select %111, %109, %113 : vector<8x288xi1>, vector<8x288xf32>
    %c0_79 = arith.constant 0 : index
    %c0_80 = arith.constant 0 : index
    %c0_81 = arith.constant 0 : index
    %115 = vector.load %arg7[%c0_79, %c0_80, %c0_81] : memref<1x8x288xf32, #tpu.memory_space<vmem>>, vector<1x8x288xf32>
    %116 = vector.shape_cast %115 : vector<1x8x288xf32> to vector<8x288xf32>
    %117 = arith.mulf %114, %116 : vector<8x288xf32>
    %cst_82 = arith.constant 0.000000e+00 : f32
    %118 = vector.broadcast %cst_82 : f32 to vector<8x19xf32>
    %119 = tpu.concatenate %118, %117, %118 in 1 : vector<8x19xf32>, vector<8x288xf32>, vector<8x19xf32> -> vector<8x326xf32>
    %cst_83 = arith.constant 0.000000e+00 : f32
    %120 = vector.broadcast %cst_83 : f32 to vector<3x288xf32>
    %c0_84 = arith.constant 0 : index
    %c0_85 = arith.constant 0 : index
    %c0_86 = arith.constant 0 : index
    %121 = vector.load %arg8[%c0_84, %c0_85, %c0_86] : memref<9x3x8xf32, #tpu.memory_space<vmem>>, vector<1x3x8xf32>
    %122 = vector.shape_cast %121 : vector<1x3x8xf32> to vector<3x8xf32>
    %123 = vector.extract_strided_slice %119 {offsets = [0, 0], sizes = [8, 288], strides = [1, 1]} : vector<8x326xf32> to vector<8x288xf32>
    %cst_87 = arith.constant dense<0.000000e+00> : vector<3x288xf32>
    %124 = tpu.matmul %122, %123, %cst_87 {dimension_numbers = #tpu.dot_dimension_numbers<[1], [0], [0], [1], [0, 0, 1, 1], [], []>, precision = #tpu.contract_precision<fp32>} : vector<3x8xf32>, vector<8x288xf32>, vector<3x288xf32> -> vector<3x288xf32>
    %125 = arith.addf %120, %124 : vector<3x288xf32>
    %c1_88 = arith.constant 1 : index
    %c0_89 = arith.constant 0 : index
    %c0_90 = arith.constant 0 : index
    %126 = vector.load %arg8[%c1_88, %c0_89, %c0_90] : memref<9x3x8xf32, #tpu.memory_space<vmem>>, vector<1x3x8xf32>
    %127 = vector.shape_cast %126 : vector<1x3x8xf32> to vector<3x8xf32>
    %128 = vector.extract_strided_slice %119 {offsets = [0, 1], sizes = [8, 288], strides = [1, 1]} : vector<8x326xf32> to vector<8x288xf32>
    %cst_91 = arith.constant dense<0.000000e+00> : vector<3x288xf32>
    %129 = tpu.matmul %127, %128, %cst_91 {dimension_numbers = #tpu.dot_dimension_numbers<[1], [0], [0], [1], [0, 0, 1, 1], [], []>, precision = #tpu.contract_precision<fp32>} : vector<3x8xf32>, vector<8x288xf32>, vector<3x288xf32> -> vector<3x288xf32>
    %130 = arith.addf %125, %129 : vector<3x288xf32>
    %c2_92 = arith.constant 2 : index
    %c0_93 = arith.constant 0 : index
    %c0_94 = arith.constant 0 : index
    %131 = vector.load %arg8[%c2_92, %c0_93, %c0_94] : memref<9x3x8xf32, #tpu.memory_space<vmem>>, vector<1x3x8xf32>
    %132 = vector.shape_cast %131 : vector<1x3x8xf32> to vector<3x8xf32>
    %133 = vector.extract_strided_slice %119 {offsets = [0, 2], sizes = [8, 288], strides = [1, 1]} : vector<8x326xf32> to vector<8x288xf32>
    %cst_95 = arith.constant dense<0.000000e+00> : vector<3x288xf32>
    %134 = tpu.matmul %132, %133, %cst_95 {dimension_numbers = #tpu.dot_dimension_numbers<[1], [0], [0], [1], [0, 0, 1, 1], [], []>, precision = #tpu.contract_precision<fp32>} : vector<3x8xf32>, vector<8x288xf32>, vector<3x288xf32> -> vector<3x288xf32>
    %135 = arith.addf %130, %134 : vector<3x288xf32>
    %c3_96 = arith.constant 3 : index
    %c0_97 = arith.constant 0 : index
    %c0_98 = arith.constant 0 : index
    %136 = vector.load %arg8[%c3_96, %c0_97, %c0_98] : memref<9x3x8xf32, #tpu.memory_space<vmem>>, vector<1x3x8xf32>
    %137 = vector.shape_cast %136 : vector<1x3x8xf32> to vector<3x8xf32>
    %138 = vector.extract_strided_slice %119 {offsets = [0, 18], sizes = [8, 288], strides = [1, 1]} : vector<8x326xf32> to vector<8x288xf32>
    %cst_99 = arith.constant dense<0.000000e+00> : vector<3x288xf32>
    %139 = tpu.matmul %137, %138, %cst_99 {dimension_numbers = #tpu.dot_dimension_numbers<[1], [0], [0], [1], [0, 0, 1, 1], [], []>, precision = #tpu.contract_precision<fp32>} : vector<3x8xf32>, vector<8x288xf32>, vector<3x288xf32> -> vector<3x288xf32>
    %140 = arith.addf %135, %139 : vector<3x288xf32>
    %c4_100 = arith.constant 4 : index
    %c0_101 = arith.constant 0 : index
    %c0_102 = arith.constant 0 : index
    %141 = vector.load %arg8[%c4_100, %c0_101, %c0_102] : memref<9x3x8xf32, #tpu.memory_space<vmem>>, vector<1x3x8xf32>
    %142 = vector.shape_cast %141 : vector<1x3x8xf32> to vector<3x8xf32>
    %143 = vector.extract_strided_slice %119 {offsets = [0, 19], sizes = [8, 288], strides = [1, 1]} : vector<8x326xf32> to vector<8x288xf32>
    %cst_103 = arith.constant dense<0.000000e+00> : vector<3x288xf32>
    %144 = tpu.matmul %142, %143, %cst_103 {dimension_numbers = #tpu.dot_dimension_numbers<[1], [0], [0], [1], [0, 0, 1, 1], [], []>, precision = #tpu.contract_precision<fp32>} : vector<3x8xf32>, vector<8x288xf32>, vector<3x288xf32> -> vector<3x288xf32>
    %145 = arith.addf %140, %144 : vector<3x288xf32>
    %c5_104 = arith.constant 5 : index
    %c0_105 = arith.constant 0 : index
    %c0_106 = arith.constant 0 : index
    %146 = vector.load %arg8[%c5_104, %c0_105, %c0_106] : memref<9x3x8xf32, #tpu.memory_space<vmem>>, vector<1x3x8xf32>
    %147 = vector.shape_cast %146 : vector<1x3x8xf32> to vector<3x8xf32>
    %148 = vector.extract_strided_slice %119 {offsets = [0, 20], sizes = [8, 288], strides = [1, 1]} : vector<8x326xf32> to vector<8x288xf32>
    %cst_107 = arith.constant dense<0.000000e+00> : vector<3x288xf32>
    %149 = tpu.matmul %147, %148, %cst_107 {dimension_numbers = #tpu.dot_dimension_numbers<[1], [0], [0], [1], [0, 0, 1, 1], [], []>, precision = #tpu.contract_precision<fp32>} : vector<3x8xf32>, vector<8x288xf32>, vector<3x288xf32> -> vector<3x288xf32>
    %150 = arith.addf %145, %149 : vector<3x288xf32>
    %c6_108 = arith.constant 6 : index
    %c0_109 = arith.constant 0 : index
    %c0_110 = arith.constant 0 : index
    %151 = vector.load %arg8[%c6_108, %c0_109, %c0_110] : memref<9x3x8xf32, #tpu.memory_space<vmem>>, vector<1x3x8xf32>
    %152 = vector.shape_cast %151 : vector<1x3x8xf32> to vector<3x8xf32>
    %153 = vector.extract_strided_slice %119 {offsets = [0, 36], sizes = [8, 288], strides = [1, 1]} : vector<8x326xf32> to vector<8x288xf32>
    %cst_111 = arith.constant dense<0.000000e+00> : vector<3x288xf32>
    %154 = tpu.matmul %152, %153, %cst_111 {dimension_numbers = #tpu.dot_dimension_numbers<[1], [0], [0], [1], [0, 0, 1, 1], [], []>, precision = #tpu.contract_precision<fp32>} : vector<3x8xf32>, vector<8x288xf32>, vector<3x288xf32> -> vector<3x288xf32>
    %155 = arith.addf %150, %154 : vector<3x288xf32>
    %c7_112 = arith.constant 7 : index
    %c0_113 = arith.constant 0 : index
    %c0_114 = arith.constant 0 : index
    %156 = vector.load %arg8[%c7_112, %c0_113, %c0_114] : memref<9x3x8xf32, #tpu.memory_space<vmem>>, vector<1x3x8xf32>
    %157 = vector.shape_cast %156 : vector<1x3x8xf32> to vector<3x8xf32>
    %158 = vector.extract_strided_slice %119 {offsets = [0, 37], sizes = [8, 288], strides = [1, 1]} : vector<8x326xf32> to vector<8x288xf32>
    %cst_115 = arith.constant dense<0.000000e+00> : vector<3x288xf32>
    %159 = tpu.matmul %157, %158, %cst_115 {dimension_numbers = #tpu.dot_dimension_numbers<[1], [0], [0], [1], [0, 0, 1, 1], [], []>, precision = #tpu.contract_precision<fp32>} : vector<3x8xf32>, vector<8x288xf32>, vector<3x288xf32> -> vector<3x288xf32>
    %160 = arith.addf %155, %159 : vector<3x288xf32>
    %c8_116 = arith.constant 8 : index
    %c0_117 = arith.constant 0 : index
    %c0_118 = arith.constant 0 : index
    %161 = vector.load %arg8[%c8_116, %c0_117, %c0_118] : memref<9x3x8xf32, #tpu.memory_space<vmem>>, vector<1x3x8xf32>
    %162 = vector.shape_cast %161 : vector<1x3x8xf32> to vector<3x8xf32>
    %163 = vector.extract_strided_slice %119 {offsets = [0, 38], sizes = [8, 288], strides = [1, 1]} : vector<8x326xf32> to vector<8x288xf32>
    %cst_119 = arith.constant dense<0.000000e+00> : vector<3x288xf32>
    %164 = tpu.matmul %162, %163, %cst_119 {dimension_numbers = #tpu.dot_dimension_numbers<[1], [0], [0], [1], [0, 0, 1, 1], [], []>, precision = #tpu.contract_precision<fp32>} : vector<3x8xf32>, vector<8x288xf32>, vector<3x288xf32> -> vector<3x288xf32>
    %165 = arith.addf %160, %164 : vector<3x288xf32>
    %c0_120 = arith.constant 0 : index
    %c0_121 = arith.constant 0 : index
    %166 = vector.load %arg9[%c0_120, %c0_121] : memref<3x1xf32, #tpu.memory_space<vmem>>, vector<3x1xf32>
    %167 = vector.broadcast %166 : vector<3x1xf32> to vector<3x288xf32>
    %168 = arith.addf %165, %167 : vector<3x288xf32>
    %169 = arith.negf %168 : vector<3x288xf32>
    %170 = math.exp %169 : vector<3x288xf32>
    %cst_122 = arith.constant 1.000000e+00 : f32
    %171 = vector.broadcast %cst_122 : f32 to vector<3x288xf32>
    %172 = arith.addf %171, %170 : vector<3x288xf32>
    %173 = arith.divf %171, %172 : vector<3x288xf32>
    %c0_123 = arith.constant 0 : index
    %c0_124 = arith.constant 0 : index
    %c0_125 = arith.constant 0 : index
    %174 = vector.load %arg10[%c0_123, %c0_124, %c0_125] : memref<1x3x288xf32, #tpu.memory_space<vmem>>, vector<1x3x288xf32>
    %175 = vector.shape_cast %174 : vector<1x3x288xf32> to vector<3x288xf32>
    %176 = vector.shape_cast %173 : vector<3x288xf32> to vector<1x3x288xf32>
    tpu.vector_store %arg10[%c0_123, %c0_124, %c0_125], %176 {strides = array<i32>} : memref<1x3x288xf32, #tpu.memory_space<vmem>>, vector<1x3x288xf32>,
    return
  }
  func.func @transform_0(%arg0: i32) -> (i32, i32, i32) {
    %c0_i32 = arith.constant 0 : i32
    %c0_i32_0 = arith.constant 0 : i32
    %c0_i32_1 = arith.constant 0 : i32
    return %arg0, %c0_i32, %c0_i32_0 : i32, i32, i32
  }
  func.func @transform_1(%arg0: i32) -> (i32, i32, i32) {
    %c0_i32 = arith.constant 0 : i32
    %c0_i32_0 = arith.constant 0 : i32
    %c0_i32_1 = arith.constant 0 : i32
    %c0_i32_2 = arith.constant 0 : i32
    return %c0_i32, %c0_i32_0, %c0_i32_1 : i32, i32, i32
  }
  func.func @transform_2(%arg0: i32) -> (i32, i32) {
    %c0_i32 = arith.constant 0 : i32
    %c0_i32_0 = arith.constant 0 : i32
    %c0_i32_1 = arith.constant 0 : i32
    return %c0_i32, %c0_i32_0 : i32, i32
  }
  func.func @transform_3(%arg0: i32) -> (i32, i32, i32) {
    %c0_i32 = arith.constant 0 : i32
    %c0_i32_0 = arith.constant 0 : i32
    %c0_i32_1 = arith.constant 0 : i32
    return %arg0, %c0_i32, %c0_i32_0 : i32, i32, i32
  }
  func.func @transform_4(%arg0: i32) -> (i32, i32, i32) {
    %c0_i32 = arith.constant 0 : i32
    %c0_i32_0 = arith.constant 0 : i32
    %c0_i32_1 = arith.constant 0 : i32
    %c0_i32_2 = arith.constant 0 : i32
    return %c0_i32, %c0_i32_0, %c0_i32_1 : i32, i32, i32
  }
  func.func @transform_5(%arg0: i32) -> (i32, i32) {
    %c0_i32 = arith.constant 0 : i32
    %c0_i32_0 = arith.constant 0 : i32
    %c0_i32_1 = arith.constant 0 : i32
    return %c0_i32, %c0_i32_0 : i32, i32
  }
  func.func @transform_6(%arg0: i32) -> (i32, i32, i32) {
    %c0_i32 = arith.constant 0 : i32
    %c0_i32_0 = arith.constant 0 : i32
    %c0_i32_1 = arith.constant 0 : i32
    return %arg0, %c0_i32, %c0_i32_0 : i32, i32, i32
  }
  func.func @transform_7(%arg0: i32) -> (i32, i32, i32) {
    %c0_i32 = arith.constant 0 : i32
    %c0_i32_0 = arith.constant 0 : i32
    %c0_i32_1 = arith.constant 0 : i32
    %c0_i32_2 = arith.constant 0 : i32
    return %c0_i32, %c0_i32_0, %c0_i32_1 : i32, i32, i32
  }
  func.func @transform_8(%arg0: i32) -> (i32, i32) {
    %c0_i32 = arith.constant 0 : i32
    %c0_i32_0 = arith.constant 0 : i32
    %c0_i32_1 = arith.constant 0 : i32
    return %c0_i32, %c0_i32_0 : i32, i32
  }
  func.func @transform_9(%arg0: i32) -> (i32, i32, i32) {
    %c0_i32 = arith.constant 0 : i32
    %c0_i32_0 = arith.constant 0 : i32
    %c0_i32_1 = arith.constant 0 : i32
    return %arg0, %c0_i32, %c0_i32_0 : i32, i32, i32
  }
}

</mosaic_0001>

<bundles_post_ra>
// kernel: tpu_custom_call.1
= control target key start
LH: loop header
LB: loop body
LE: loop exit
PB: predicated region body
PF: predicated region fallthrough
CT: control target
= control target key end

     0   :  { %s26953_s30 = smov 0   ;;  %s29492_s0 = inlined_call_operand.vmem [shape: f32[2,4,326], index: 0, kind: input, shape index: {}]   ;;  %s29493_s1 = inlined_call_operand.vmem [shape: f32[9,8,4], index: 1, kind: input, shape index: {}]   ;;  %s29494_s2 = inlined_call_operand.vmem [shape: f32[8,1], index: 2, kind: input, shape index: {}]   ;;  %s29495_s3 = inlined_call_operand.vmem [shape: f32[2,8,288], index: 3, kind: input, shape index: {}]   ;;  %s29496_s4 = inlined_call_operand.vmem [shape: f32[9,8,8], index: 4, kind: input, shape index: {}]   ;;  %s29497_s5 = inlined_call_operand.vmem [shape: f32[8,1], index: 5, kind: input, shape index: {}]   ;;  %s29498_s6 = inlined_call_operand.vmem [shape: f32[2,8,288], index: 6, kind: input, shape index: {}]   ;;  %s29499_s7 = inlined_call_operand.vmem [shape: f32[9,3,8], index: 7, kind: input, shape index: {}]   ;;  %s29500_s8 = inlined_call_operand.vmem [shape: f32[3,1], index: 8, kind: input, shape index: {}]   ;;  %s29501_s9 = inlined_call_operand.vmem [shape: f32[2,3,288], index: 9, kind: output, shape index: {}]  }
   0x1 LB: > { %s25674_s10 = sadd.s32 4294967295, %s26889_s30   ;;  %p25678_p0 = scmp.ge.s32.totalorder %s26889_s30, 1  ;;  %s26889_s30 = sphi %s26953_s30, %s19_s30  }
   0x2   : > { %p307_p1 = scmp.lt.s32.totalorder %s26889_s30, 3 }
   0x4   : > { %p308_p2 = pnand %p25678_p0, %p307_p1 }
   0x6   : > { %311 = sbr.rel (%p308_p2) target bundleno = 1919 (0x77f), region = 56 }
   0xb   : > { %p353_p3 = scmp.lt.s32.totalorder %s25674_s10, 1  ;;  %v29502_v0 = vmov 0.0   ;;  %s26892_s15 = smov 127   ;;  %v25683_v4 = vld [vmem:[%s29493_s1 + $0x8] sm:$0xff]  ;;  %vm390_vm0 = vcmask 31744   ;;  %vm387_vm1 = vcmask 1039360  }
   0xc   : > { %467 = vmatprep.mubr.f32.mxu0 %v29502_v0  ;;  %553 = vmatprep.mubr.f32.mxu1 %v29502_v0  ;;  %s26893_s16 = smov 126   ;;  %s26894_s17 = smov 110   ;;  %v392_v5 = vsel %vm390_vm0, %v25683_v4, 0  ;;  %vm394_vm2 = vcmask 1043456   ;;  %v375_v25 = vld [vmem:[%s29493_s1] sm:$0xff]  ;;  %vm26900_vm3 = vmmov 0  }
   0xd   : > { %s29532_s10 = smov (!%p353_p3, %s25674_s10), 1  ;;  %s26895_s18 = smov 109   ;;  %v27031_v6 = vand.u32 4294901760, %v392_v5  ;;  %v1313_v29 = vsel %vm390_vm0, %v375_v25, 0  ;;  %vm2240_vm4 = vcmask 1031168   ;;  %v25684_v56 = vld [vmem:[%s29493_s1 + $0x10] sm:$0xff] }
   0xe   : > { %s26846_s11 = smul.u32 12, %s29532_s10  ;;  %s26896_s19 = smov 108   ;;  %v27058_v34 = vand.u32 4294901760, %v1313_v29  ;;  %v2244_v61 = vsel %vm390_vm0, %v25684_v56, 0  ;;  %vm3174_vm5 = vcmask 900096   ;;  %vm4108_vm6 = vcmask 891904  }
   0xf   : > { %s26897_s20 = smov 92   ;;  %s26898_s21 = smov 91   ;;  %v27034_v7 = vsub.f32 %v392_v5, %v27031_v6  ;;  %vm5042_vm7 = vcmask 883712   ;;  %vm5976_vm8 = vcmask 752640   ;;  %vm6910_vm9 = vcmask 744448  }
  0x10   : > { %s357_s14 = scalar_lea.vmem %s29492_s0, %s26846_s11  ;;  %s26899_s22 = smov 90   ;;  %v27070_v39 = vsub.f32 %v1313_v29, %v27058_v34  ;;  %vm7844_vm10 = vcmask 736256   ;;  %vm8803_vm14 = vcmask 154624   ;;  %vm8810_vm15 = vcmask 416768  }
  0x11   : > { %v26971_v1 = vld [vmem:[%s357_s14] sm:$0xff]  ;;  %v26981_v3 = vld [vmem:[%s357_s14 + $0x8] sm:$0xf]  ;;  %v27037_v9 = vand.u32 4294901760, %v27034_v7  ;;  %s26847_s23 = smul.u32 24, %s29532_s10  ;;  %s26902_s27 = smov 19  }
  0x12   : > { %381 = vrot.lane.b32.xlu1 %v26971_v1, %s26892_s15  ;;  %v26977_v2 = vcombine.high %v26971_v1, %v26971_v1  ;;  %v1315_v35 = vsel %vm394_vm2, %v26971_v1, 0  ;;  %v27080_v42 = vand.u32 4294901760, %v27070_v39  ;;  %v1319_v48 = vsel %vm394_vm2, %v26981_v3, 0 }
  0x13   : > { %v471_v14 = vsub.f32 %v27034_v7, %v27037_v9  ;;  %v27067_v38 = vand.u32 4294901760, %v1315_v35  ;;  %v27103_v53 = vand.u32 4294901760, %v1319_v48  ;;  %s27866_s26 = scalar_lea.vmem %s29495_s3, %s26847_s23  ;;  %s367_s25 = scalar_lea.vmem %s29498_s6, %s26847_s23 }
  0x14   : > { %383 = vrot.lane.b32.xlu0 %v26977_v2, %s26892_s15  ;;  %v1317_v32 = vsel %vm394_vm2, %v26977_v2, 0  ;;  %v1391_v46 = vsub.f32 %v27070_v39, %v27080_v42 }
  0x15   : > { %v472_v21 = vand.u32 4294901760, %v471_v14  ;;  %v27063_v37 = vand.u32 4294901760, %v1317_v32  ;;  %v1436_v43 = vsub.f32 %v1315_v35, %v27067_v38  ;;  %v1894_v58 = vsub.f32 %v1319_v48, %v27103_v53 }
  0x16   : > { %2236 = vrot.lane.b32.xlu1 %v26977_v2, %s26893_s16  ;;  %v1392_v51 = vand.u32 4294901760, %v1391_v46 }
  0x17   : > { %v1430_v41 = vsub.f32 %v1317_v32, %v27063_v37  ;;  %v1437_v47 = vand.u32 4294901760, %v1436_v43 }
  0x18   : > { %385 = vrot.lane.b32.xlu0 %v26981_v3, %s26892_s15 }
  0x19   : > { %v1431_v45 = vand.u32 4294901760, %v1430_v41  ;;  %v1438_v52 = vsub.f32 %v1436_v43, %v1437_v47 }
  0x1a   : > { %2234 = vrot.lane.b32.xlu1 %v26971_v1, %s26893_s16 }
  0x1b   : > { %v1432_v49 = vsub.f32 %v1430_v41, %v1431_v45  ;;  %v1439_v57 = vand.u32 4294901760, %v1438_v52  ;;  %v25686_v52 = vld [vmem:[%s29493_s1 + $0x20] sm:$0xff] }
  0x1c   : > { %2238 = vrot.lane.b32.xlu0 %v26981_v3, %s26893_s16  ;;  %v4112_v56 = vsel %vm390_vm0, %v25686_v52, 0 }
  0x1d   : > { %v1433_v54 = vand.u32 4294901760, %v1432_v49 }
  0x1e   : > { %3172 = vrot.lane.b32.xlu1 %v26981_v3, %s26894_s17 }
  0x20   : > { %3170 = vrot.lane.b32.xlu0 %v26977_v2, %s26894_s17 }
  0x22   : > { %4104 = vrot.lane.b32.xlu1 %v26977_v2, %s26895_s18 }
  0x24   : > { %3168 = vrot.lane.b32.xlu0 %v26971_v1, %s26894_s17 }
  0x26   : > { %4102 = vrot.lane.b32.xlu1 %v26971_v1, %s26895_s18 }
  0x28   : > { %4106 = vrot.lane.b32.xlu0 %v26981_v3, %s26895_s18 }
  0x2a   : > { %5040 = vrot.lane.b32.xlu1 %v26981_v3, %s26896_s19 }
  0x2c   : > { %5038 = vrot.lane.b32.xlu0 %v26977_v2, %s26896_s19 }
  0x2e   : > { %5972 = vrot.lane.b32.xlu1 %v26977_v2, %s26897_s20 }
  0x30   : > { %5036 = vrot.lane.b32.xlu0 %v26971_v1, %s26896_s19 }
  0x32   : > { %5970 = vrot.lane.b32.xlu1 %v26971_v1, %s26897_s20 }
  0x34   : > { %5974 = vrot.lane.b32.xlu0 %v26981_v3, %s26897_s20 }
  0x36   : > { %6908 = vrot.lane.b32.xlu1 %v26981_v3, %s26898_s21 }
  0x38   : > { %6906 = vrot.lane.b32.xlu0 %v26977_v2, %s26898_s21 }
  0x3a   : > { %7840 = vrot.lane.b32.xlu1 %v26977_v2, %s26899_s22  ;;  %v27128_v2 = vand.u32 4294901760, %v2244_v61 }
  0x3c   : > { %6904 = vrot.lane.b32.xlu0 %v26971_v1, %s26898_s21 }
  0x3e   : > { %7838 = vrot.lane.b32.xlu1 %v26971_v1, %s26899_s22  ;;  %v1895_v1 = vand.u32 4294901760, %v1894_v58 }
  0x40   : > { %7842 = vrot.lane.b32.xlu0 %v26981_v3, %s26899_s22  ;;  %v1896_v5 = vsub.f32 %v1894_v58, %v1895_v1 }
  0x84   : > { %v382_v8 = vpop.permute.xlu1 %381 }
  0x86   : > { %v384_v10 = vpop.permute.xlu0 %383 }
  0x87   : > { %v388_v11 = vsel %vm387_vm1, %v382_v8, %v384_v10 }
  0x88   : > { %v395_v12 = vsel %vm394_vm2, %v388_v11, 0  ;;  %v2237_v50 = vpop.permute.xlu1 %2236 }
  0x89   : > { %v433_v13 = vand.u32 4294901760, %v395_v12 }
  0x8a   : > { %v386_v15 = vpop.permute.xlu0 %385 }
  0x8b   : > { %v516_v16 = vsub.f32 %v395_v12, %v433_v13  ;;  %v389_v17 = vsel %vm387_vm1, %v384_v10, %v386_v15  ;;  %v399_v19 = vsel %vm394_vm2, %v386_v15, 0 }
  0x8c   : > { %v397_v18 = vsel %vm394_vm2, %v389_v17, 0  ;;  %v27046_v24 = vand.u32 4294901760, %v399_v19  ;;  %v2235_v59 = vpop.permute.xlu1 %2234 }
  0x8d   : > { %v431_v20 = vand.u32 4294901760, %v397_v18  ;;  %v517_v22 = vand.u32 4294901760, %v516_v16  ;;  %v2241_v62 = vsel %vm2240_vm4, %v2235_v59, %v2237_v50 }
  0x8e   : > { %v974_v30 = vsub.f32 %v399_v19, %v27046_v24  ;;  %v27110_v55 = vpop.permute.xlu0 %2238  ;;  %v2246_v3 = vsel %vm394_vm2, %v2241_v62, 0 }
  0x8f   : > { %v510_v23 = vsub.f32 %v397_v18, %v431_v20  ;;  %432 = vmatprep.subr.mxu0 %v431_v20  ;;  %v518_v27 = vsub.f32 %v516_v16, %v517_v22  ;;  %v2242_v60 = vsel %vm2240_vm4, %v2237_v50, %v27110_v55  ;;  %v2250_v15 = vsel %vm394_vm2, %v27110_v55, 0 }
  0x90   : > { %434 = vmatpush1.msra.mxu0 %v433_v13  ;;  %v975_v36 = vand.u32 4294901760, %v974_v30  ;;  %v2248_v63 = vsel %vm394_vm2, %v2242_v60, 0  ;;  %v27181_v19 = vand.u32 4294901760, %v2250_v15 }
  0x91   : > { %473 = vmatmul.mubr.f32.vlgmr.msra.gmra.mxu0 %v472_v21  ;;  %593 = vmatprep.subr.mxu0 %v510_v23  ;;  %v511_v26 = vand.u32 4294901760, %v510_v23  ;;  %v519_v33 = vand.u32 4294901760, %v518_v27  ;;  %v27135_v4 = vand.u32 4294901760, %v2248_v63 }
  0x92   : > { %596 = vmatpush1.msra.mxu0 %v516_v16  ;;  %629 = vmatprep.mubr.f32.mxu0 %v29502_v0  ;;  %v976_v40 = vsub.f32 %v974_v30, %v975_v36  ;;  %v3171_v17 = vpop.permute.xlu0 %3170  ;;  %v2825_v27 = vsub.f32 %v2250_v15, %v27181_v19 }
  0x93   : > { %747 = vmatprep.subr.mxu0 %v511_v26  ;;  %v512_v28 = vsub.f32 %v510_v23, %v511_v26  ;;  %v2361_v8 = vsub.f32 %v2248_v63, %v27135_v4 }
  0x94   : > { %v977_v44 = vand.u32 4294901760, %v976_v40  ;;  %v2826_v32 = vand.u32 4294901760, %v2825_v27 }
  0x95   : > { %632 = vmatmul.mubr.f32.vlgmr.msra.gmra.mxu0 %v27034_v7  ;;  %v513_v31 = vand.u32 4294901760, %v512_v28  ;;  %v2362_v12 = vand.u32 4294901760, %v2361_v8 }
  0x96   : > { %751 = vmatpush1.msra.mxu0 %v517_v22  ;;  %784 = vmatprep.mubr.f32.mxu0 %v29502_v0  ;;  %v25685_v22 = vld [vmem:[%s29493_s1 + $0x18] sm:$0xff]  ;;  %v3169_v25 = vpop.permute.xlu0 %3168 }
  0x97   : > { %514 = vmatprep.subr.mxu1 %v513_v31  ;;  %26036 = vmatprep.subr.mxu0 %v29502_v0  ;;  %v2363_v16 = vsub.f32 %v2361_v8, %v2362_v12  ;;  %v3178_v26 = vsel %vm390_vm0, %v25685_v22, 0 }
  0x98   : > { %520 = vmatpush1.msra.mxu1 %v519_v33  ;;  %v27203_v31 = vand.u32 4294901760, %v3178_v26 }
  0x99   : > { %555 = vmatmul.mubr.f32.vlgmr.msra.gmra.mxu1 %v27031_v6  ;;  %669 = vmatprep.subr.mxu1 %v431_v20  ;;  %v2364_v23 = vand.u32 4294901760, %v2363_v16 }
  0x9a   : > { %786 = vmatmul.mubr.f32.vlgmr.msra.gmra.mxu0 %v27031_v6  ;;  %671 = vmatpush1.msra.mxu1 %v433_v13  ;;  %v27216_v35 = vsub.f32 %v3178_v26, %v27203_v31 }
  0x9b   : > { %26037 = vmatpush3.msra.mxu0 %v27046_v24  ;;  %823 = vmatprep.subr.mxu1 %v431_v20 }
  0x9c   : > { %704 = vmatprep.mubr.f32.mxu1 %v29502_v0  ;;  %26038 = vmatprep.mubr.msk.f32.mxu0 %vm26900_vm3, %v29502_v0 }
  0x9d   : > { %26046 = vmatprep.subr.mxu0 %v29502_v0  ;;  %708 = vmatmul.mubr.f32.vlgmr.msra.gmra.mxu1 %v27037_v9 }
  0x9e   : > { %825 = vmatpush1.msra.mxu1 %v433_v13  ;;  %26039 = vmatmul.mubr.f32.vlgmr.msra.gmra.mxu0 %v472_v21  ;;  %v27184_v21 = vpop.permute.xlu1 %3172 }
  0x9f   : > { %26047 = vmatpush3.msra.mxu0 %v974_v30  ;;  %858 = vmatprep.mubr.f32.mxu1 %v29502_v0  ;;  %v3175_v30 = vsel %vm3174_vm5, %v3169_v25, %v3171_v17 }
  0xa0   : > { %26041 = vmatprep.subr.mxu1 %v29502_v0  ;;  %26048 = vmatprep.mubr.msk.f32.mxu0 %vm26900_vm3, %v29502_v0 }
  0xa1   : > { %26056 = vmatprep.subr.mxu0 %v29502_v0  ;;  %860 = vmatmul.mubr.f32.vlgmr.msra.gmra.mxu1 %v27031_v6 }
  0xa2   : > { %26042 = vmatpush3.msra.mxu1 %v977_v44  ;;  %26049 = vmatmul.mubr.f32.vlgmr.msra.gmra.mxu0 %v27034_v7  ;;  %v27145_v7 = vand.u32 4294901760, %v2246_v3 }
  0xa3   : > { %26057 = vmatpush3.msra.mxu0 %v975_v36  ;;  %26043 = vmatprep.mubr.msk.f32.mxu1 %vm26900_vm3, %v29502_v0  ;;  %v2827_v36 = vsub.f32 %v2825_v27, %v2826_v32 }
  0xa4   : > { %26051 = vmatprep.subr.mxu1 %v29502_v0  ;;  %26058 = vmatprep.mubr.msk.f32.mxu0 %vm26900_vm3, %v29502_v0  ;;  %v2367_v11 = vsub.f32 %v2246_v3, %v27145_v7 }
  0xa5   : > { %26044 = vmatmul.mubr.f32.vlgmr.msra.gmra.mxu1 %v27031_v6  ;;  %1352 = vmatprep.subr.mxu0 %v27063_v37 }
  0xa6   : > { %26052 = vmatpush3.msra.mxu1 %v27046_v24  ;;  %26059 = vmatmul.mubr.f32.vlgmr.msra.gmra.mxu0 %v27031_v6  ;;  %v2368_v14 = vand.u32 4294901760, %v2367_v11 }
  0xa7   : > { %26053 = vmatprep.mubr.msk.f32.mxu1 %vm26900_vm3, %v29502_v0  ;;  %26061 = vmatprep.subr.mxu1 %v29502_v0 }
  0xa8   : > { %1354 = vmatpush1.msra.mxu0 %v27067_v38  ;;  %1387 = vmatprep.mubr.f32.mxu0 %v29502_v0  ;;  %v2369_v20 = vsub.f32 %v2367_v11, %v2368_v14 }
  0xa9   : > { %26054 = vmatmul.mubr.f32.vlgmr.msra.gmra.mxu1 %v27037_v9  ;;  %1513 = vmatprep.subr.mxu0 %v1430_v41  ;;  %v1897_v9 = vand.u32 4294901760, %v1896_v5  ;;  %v2828_v41 = vand.u32 4294901760, %v2827_v36 }
  0xaa   : > { %26062 = vmatpush3.msra.mxu1 %v27046_v24  ;;  %1393 = vmatmul.mubr.f32.vlgmr.msra.gmra.mxu0 %v1392_v51  ;;  %v3176_v24 = vsel %vm3174_vm5, %v3171_v17, %v27184_v21  ;;  %v2370_v28 = vand.u32 4294901760, %v2369_v20 }
  0xab   : > { %26063 = vmatprep.mubr.msk.f32.mxu1 %vm26900_vm3, %v29502_v0  ;;  %1516 = vmatpush1.msra.mxu0 %v1436_v43  ;;  %v3182_v29 = vsel %vm394_vm2, %v3176_v24, 0 }
  0xac   : > { %1549 = vmatprep.mubr.f32.mxu0 %v29502_v0  ;;  %1434 = vmatprep.subr.mxu1 %v1433_v54  ;;  %v27210_v33 = vand.u32 4294901760, %v3182_v29 }
  0xad   : > { %26064 = vmatmul.mubr.f32.vlgmr.msra.gmra.mxu1 %v27031_v6  ;;  %1667 = vmatprep.subr.mxu0 %v1431_v45  ;;  %v27141_v6 = vsub.f32 %v2244_v61, %v27128_v2  ;;  %v3184_v45 = vsel %vm394_vm2, %v27184_v21, 0  ;;  %v27278_v61 = vand.u32 4294901760, %v4112_v56 }
  0xae   : > { %1552 = vmatmul.mubr.f32.vlgmr.msra.gmra.mxu0 %v27070_v39  ;;  %1440 = vmatpush1.msra.mxu1 %v1439_v57  ;;  %v27256_v49 = vand.u32 4294901760, %v3184_v45 }
  0xaf   : > { %1473 = vmatprep.mubr.f32.mxu1 %v29502_v0  ;;  %1671 = vmatpush1.msra.mxu0 %v1437_v47  ;;  %v27155_v10 = vand.u32 4294901760, %v27141_v6  ;;  %v4105_v47 = vpop.permute.xlu1 %4104 }
  0xb0   : > { %1704 = vmatprep.mubr.f32.mxu0 %v29502_v0  ;;  %1589 = vmatprep.subr.mxu1 %v27063_v37  ;;  %v3759_v57 = vsub.f32 %v3184_v45, %v27256_v49 }
  0xb1   : > { %1475 = vmatmul.mubr.f32.vlgmr.msra.gmra.mxu1 %v27058_v34  ;;  %26066 = vmatprep.subr.mxu0 %v29502_v0  ;;  %v2322_v13 = vsub.f32 %v27141_v6, %v27155_v10 }
  0xb2   : > { %1706 = vmatmul.mubr.f32.vlgmr.msra.gmra.mxu0 %v27058_v34  ;;  %1591 = vmatpush1.msra.mxu1 %v27067_v38  ;;  %v3760_v62 = vand.u32 4294901760, %v3759_v57 }
  0xb3   : > { %1624 = vmatprep.mubr.f32.mxu1 %v29502_v0  ;;  %26067 = vmatpush3.msra.mxu0 %v27103_v53  ;;  %v2323_v18 = vand.u32 4294901760, %v2322_v13  ;;  %v4103_v54 = vpop.permute.xlu1 %4102 }
  0xb4   : > { %26068 = vmatprep.mubr.msk.f32.mxu0 %vm26900_vm3, %v29502_v0  ;;  %1743 = vmatprep.subr.mxu1 %v27063_v37  ;;  %v4109_v59 = vsel %vm4108_vm6, %v4103_v54, %v4105_v47  ;;  %v3761_v3 = vsub.f32 %v3759_v57, %v3760_v62 }
  0xb5   : > { %1628 = vmatmul.mubr.f32.vlgmr.msra.gmra.mxu1 %v27080_v42  ;;  %26076 = vmatprep.subr.mxu0 %v29502_v0  ;;  %v4114_v63 = vsel %vm394_vm2, %v4109_v59, 0 }
  0xb6   : > { %26069 = vmatmul.mubr.f32.vlgmr.msra.gmra.mxu0 %v1392_v51  ;;  %1745 = vmatpush1.msra.mxu1 %v27067_v38  ;;  %v3295_v38 = vsub.f32 %v3182_v29, %v27210_v33  ;;  %v27259_v51 = vpop.permute.xlu0 %4106 }
  0xb7   : > { %1778 = vmatprep.mubr.f32.mxu1 %v29502_v0  ;;  %26077 = vmatpush3.msra.mxu0 %v1894_v58  ;;  %v4110_v55 = vsel %vm4108_vm6, %v4105_v47, %v27259_v51 }
  0xb8   : > { %26078 = vmatprep.mubr.msk.f32.mxu0 %vm26900_vm3, %v29502_v0  ;;  %26086 = vmatprep.subr.mxu0 %v29502_v0  ;;  %v4116_v60 = vsel %vm394_vm2, %v4110_v55, 0 }
  0xb9   : > { %1780 = vmatmul.mubr.f32.vlgmr.msra.gmra.mxu1 %v27058_v34  ;;  %26071 = vmatprep.subr.mxu1 %v29502_v0 }
  0xba   : > { %26079 = vmatmul.mubr.f32.vlgmr.msra.gmra.mxu0 %v27070_v39  ;;  %26072 = vmatpush3.msra.mxu1 %v1897_v9  ;;  %v27230_v39 = vand.u32 4294901760, %v27216_v35 }
  0xbb   : > { %26087 = vmatpush3.msra.mxu0 %v1895_v1  ;;  %26073 = vmatprep.mubr.msk.f32.mxu1 %vm26900_vm3, %v29502_v0  ;;  %v27286_v1 = vand.u32 4294901760, %v4116_v60 }
  0xbc   : > { %26088 = vmatprep.mubr.msk.f32.mxu0 %vm26900_vm3, %v29502_v0  ;;  %2283 = vmatprep.subr.mxu0 %v27135_v4  ;;  %v3256_v43 = vsub.f32 %v27216_v35, %v27230_v39 }
  0xbd   : > { %26074 = vmatmul.mubr.f32.vlgmr.msra.gmra.mxu1 %v27058_v34  ;;  %26081 = vmatprep.subr.mxu1 %v29502_v0  ;;  %v4229_v5 = vsub.f32 %v4116_v60, %v27286_v1 }
  0xbe   : > { %26089 = vmatmul.mubr.f32.vlgmr.msra.gmra.mxu0 %v27058_v34  ;;  %26082 = vmatpush3.msra.mxu1 %v27103_v53  ;;  %v3257_v48 = vand.u32 4294901760, %v3256_v43 }
  0xbf   : > { %2285 = vmatpush1.msra.mxu0 %v27145_v7  ;;  %26083 = vmatprep.mubr.msk.f32.mxu1 %vm26900_vm3, %v29502_v0  ;;  %v4230_v9 = vand.u32 4294901760, %v4229_v5 }
  0xc0   : > { %2444 = vmatprep.subr.mxu0 %v2361_v8  ;;  %26091 = vmatprep.subr.mxu1 %v29502_v0  ;;  %v3762_v8 = vand.u32 4294901760, %v3761_v3 }
  0xc1   : > { %2318 = vmatprep.mubr.f32.mxu0 %v29502_v0  ;;  %26084 = vmatmul.mubr.f32.vlgmr.msra.gmra.mxu1 %v27080_v42  ;;  %v3296_v42 = vand.u32 4294901760, %v3295_v38  ;;  %v4231_v13 = vsub.f32 %v4229_v5, %v4230_v9 }
  0xc2   : > { %26092 = vmatpush3.msra.mxu1 %v27103_v53  ;;  %2324 = vmatmul.mubr.f32.vlgmr.msra.gmra.mxu0 %v2323_v18 }
  0xc3   : > { %2447 = vmatpush1.msra.mxu0 %v2367_v11  ;;  %2365 = vmatprep.subr.mxu1 %v2364_v23  ;;  %v3297_v46 = vsub.f32 %v3295_v38, %v3296_v42  ;;  %v4232_v20 = vand.u32 4294901760, %v4231_v13 }
  0xc4   : > { %2598 = vmatprep.subr.mxu0 %v2362_v12  ;;  %26093 = vmatprep.mubr.msk.f32.mxu1 %vm26900_vm3, %v29502_v0  ;;  %v4118_v12 = vsel %vm394_vm2, %v27259_v51, 0 }
  0xc5   : > { %2480 = vmatprep.mubr.f32.mxu0 %v29502_v0  ;;  %26094 = vmatmul.mubr.f32.vlgmr.msra.gmra.mxu1 %v27058_v34  ;;  %v3180_v34 = vsel %vm394_vm2, %v3175_v30, 0  ;;  %v3298_v53 = vand.u32 4294901760, %v3297_v46  ;;  %v27331_v16 = vand.u32 4294901760, %v4118_v12 }
  0xc6   : > { %2371 = vmatpush1.msra.mxu1 %v2370_v28  ;;  %2483 = vmatmul.mubr.f32.vlgmr.msra.gmra.mxu0 %v27141_v6  ;;  %v27220_v37 = vand.u32 4294901760, %v3180_v34 }
  0xc7   : > { %2602 = vmatpush1.msra.mxu0 %v2368_v14  ;;  %2520 = vmatprep.subr.mxu1 %v27135_v4  ;;  %v5039_v14 = vpop.permute.xlu0 %5038  ;;  %v4693_v24 = vsub.f32 %v4118_v12, %v27331_v16 }
  0xc8   : > { %2404 = vmatprep.mubr.f32.mxu1 %v29502_v0  ;;  %2635 = vmatprep.mubr.f32.mxu0 %v29502_v0  ;;  %v3301_v40 = vsub.f32 %v3180_v34, %v27220_v37 }
  0xc9   : > { %26096 = vmatprep.subr.mxu0 %v29502_v0  ;;  %2406 = vmatmul.mubr.f32.vlgmr.msra.gmra.mxu1 %v27128_v2  ;;  %v4694_v29 = vand.u32 4294901760, %v4693_v24 }
  0xca   : > { %2522 = vmatpush1.msra.mxu1 %v27145_v7  ;;  %2637 = vmatmul.mubr.f32.vlgmr.msra.gmra.mxu0 %v27128_v2  ;;  %v3302_v44 = vand.u32 4294901760, %v3301_v40 }
  0xcb   : > { %26097 = vmatpush3.msra.mxu0 %v27181_v19  ;;  %2674 = vmatprep.subr.mxu1 %v27135_v4  ;;  %v27295_v4 = vand.u32 4294901760, %v4114_v63  ;;  %v5037_v22 = vpop.permute.xlu0 %5036 }
  0xcc   : > { %2555 = vmatprep.mubr.f32.mxu1 %v29502_v0  ;;  %26098 = vmatprep.mubr.msk.f32.mxu0 %vm26900_vm3, %v29502_v0  ;;  %v3303_v50 = vsub.f32 %v3301_v40, %v3302_v44 }
  0xcd   : > { %26106 = vmatprep.subr.mxu0 %v29502_v0  ;;  %2559 = vmatmul.mubr.f32.vlgmr.msra.gmra.mxu1 %v27155_v10 }
  0xce   : > { %2676 = vmatpush1.msra.mxu1 %v27145_v7  ;;  %26099 = vmatmul.mubr.f32.vlgmr.msra.gmra.mxu0 %v2323_v18  ;;  %v3304_v58 = vand.u32 4294901760, %v3303_v50  ;;  %v4235_v7 = vsub.f32 %v4114_v63, %v27295_v4  ;;  %v27334_v18 = vpop.permute.xlu1 %5040 }
  0xcf   : > { %26107 = vmatpush3.msra.mxu0 %v2825_v27  ;;  %2709 = vmatprep.mubr.f32.mxu1 %v29502_v0  ;;  %v5044_v21 = vsel %vm5042_vm7, %v5039_v14, %v27334_v18  ;;  %v5043_v27 = vsel %vm5042_vm7, %v5037_v22, %v5039_v14 }
  0xd0   : > { %26101 = vmatprep.subr.mxu1 %v29502_v0  ;;  %26108 = vmatprep.mubr.msk.f32.mxu0 %vm26900_vm3, %v29502_v0  ;;  %v4236_v11 = vand.u32 4294901760, %v4235_v7  ;;  %v5050_v26 = vsel %vm394_vm2, %v5044_v21, 0 }
  0xd1   : > { %26116 = vmatprep.subr.mxu0 %v29502_v0  ;;  %2711 = vmatmul.mubr.f32.vlgmr.msra.gmra.mxu1 %v27128_v2  ;;  %v27360_v30 = vand.u32 4294901760, %v5050_v26 }
  0xd2   : > { %26102 = vmatpush3.msra.mxu1 %v2828_v41  ;;  %26109 = vmatmul.mubr.f32.vlgmr.msra.gmra.mxu0 %v27141_v6  ;;  %v4237_v17 = vsub.f32 %v4235_v7, %v4236_v11 }
  0xd3   : > { %26117 = vmatpush3.msra.mxu0 %v2826_v32  ;;  %26103 = vmatprep.mubr.msk.f32.mxu1 %vm26900_vm3, %v29502_v0 }
  0xd4   : > { %26111 = vmatprep.subr.mxu1 %v29502_v0  ;;  %26118 = vmatprep.mubr.msk.f32.mxu0 %vm26900_vm3, %v29502_v0  ;;  %v4238_v25 = vand.u32 4294901760, %v4237_v17 }
  0xd5   : > { %3217 = vmatprep.subr.mxu0 %v27210_v33  ;;  %26104 = vmatmul.mubr.f32.vlgmr.msra.gmra.mxu1 %v27128_v2 }
  0xd6   : > { %26112 = vmatpush3.msra.mxu1 %v27181_v19  ;;  %26119 = vmatmul.mubr.f32.vlgmr.msra.gmra.mxu0 %v27128_v2 }
  0xd7   : > { %3219 = vmatpush1.msra.mxu0 %v27220_v37  ;;  %26113 = vmatprep.mubr.msk.f32.mxu1 %vm26900_vm3, %v29502_v0 }
  0xd8   : > { %3378 = vmatprep.subr.mxu0 %v3295_v38  ;;  %26121 = vmatprep.subr.mxu1 %v29502_v0 }
  0xd9   : > { %3252 = vmatprep.mubr.f32.mxu0 %v29502_v0  ;;  %26114 = vmatmul.mubr.f32.vlgmr.msra.gmra.mxu1 %v27155_v10 }
  0xda   : > { %26122 = vmatpush3.msra.mxu1 %v27181_v19  ;;  %3258 = vmatmul.mubr.f32.vlgmr.msra.gmra.mxu0 %v3257_v48  ;;  %v25687_v19 = vld [vmem:[%s29493_s1 + $0x28] sm:$0xff] }
  0xdb   : > { %3381 = vmatpush1.msra.mxu0 %v3301_v40  ;;  %3299 = vmatprep.subr.mxu1 %v3298_v53  ;;  %v5046_v23 = vsel %vm390_vm0, %v25687_v19, 0 }
  0xdc   : > { %3532 = vmatprep.subr.mxu0 %v3296_v42  ;;  %26123 = vmatprep.mubr.msk.f32.mxu1 %vm26900_vm3, %v29502_v0  ;;  %v27353_v28 = vand.u32 4294901760, %v5046_v23  ;;  %v5052_v42 = vsel %vm394_vm2, %v27334_v18, 0 }
  0xdd   : > { %3414 = vmatprep.mubr.f32.mxu0 %v29502_v0  ;;  %26124 = vmatmul.mubr.f32.vlgmr.msra.gmra.mxu1 %v27128_v2  ;;  %v27291_v2 = vsub.f32 %v4112_v56, %v27278_v61  ;;  %v27406_v46 = vand.u32 4294901760, %v5052_v42 }
  0xde   : > { %3305 = vmatpush1.msra.mxu1 %v3304_v58  ;;  %3417 = vmatmul.mubr.f32.vlgmr.msra.gmra.mxu0 %v27216_v35  ;;  %v27366_v32 = vsub.f32 %v5046_v23, %v27353_v28 }
  0xdf   : > { %3536 = vmatpush1.msra.mxu0 %v3302_v44  ;;  %3454 = vmatprep.subr.mxu1 %v27210_v33  ;;  %v27305_v6 = vand.u32 4294901760, %v27291_v2  ;;  %v5973_v44 = vpop.permute.xlu1 %5972  ;;  %v5627_v54 = vsub.f32 %v5052_v42, %v27406_v46 }
  0xe0   : > { %3338 = vmatprep.mubr.f32.mxu1 %v29502_v0  ;;  %3569 = vmatprep.mubr.f32.mxu0 %v29502_v0  ;;  %v27380_v36 = vand.u32 4294901760, %v27366_v32 }
  0xe1   : > { %26126 = vmatprep.subr.mxu0 %v29502_v0  ;;  %3340 = vmatmul.mubr.f32.vlgmr.msra.gmra.mxu1 %v27203_v31  ;;  %v4190_v10 = vsub.f32 %v27291_v2, %v27305_v6  ;;  %v5628_v59 = vand.u32 4294901760, %v5627_v54 }
  0xe2   : > { %3456 = vmatpush1.msra.mxu1 %v27220_v37  ;;  %3571 = vmatmul.mubr.f32.vlgmr.msra.gmra.mxu0 %v27203_v31  ;;  %v5124_v40 = vsub.f32 %v27366_v32, %v27380_v36 }
  0xe3   : > { %26127 = vmatpush3.msra.mxu0 %v27256_v49  ;;  %3608 = vmatprep.subr.mxu1 %v27210_v33  ;;  %v4191_v15 = vand.u32 4294901760, %v4190_v10  ;;  %v4695_v33 = vsub.f32 %v4693_v24, %v4694_v29  ;;  %v5971_v51 = vpop.permute.xlu1 %5970  ;;  %v5629_v63 = vsub.f32 %v5627_v54, %v5628_v59 }
  0xe4   : > { %3489 = vmatprep.mubr.f32.mxu1 %v29502_v0  ;;  %26128 = vmatprep.mubr.msk.f32.mxu0 %vm26900_vm3, %v29502_v0  ;;  %v5125_v45 = vand.u32 4294901760, %v5124_v40  ;;  %v5977_v56 = vsel %vm5976_vm8, %v5971_v51, %v5973_v44 }
  0xe5   : > { %26136 = vmatprep.subr.mxu0 %v29502_v0  ;;  %3493 = vmatmul.mubr.f32.vlgmr.msra.gmra.mxu1 %v27230_v39  ;;  %v4696_v38 = vand.u32 4294901760, %v4695_v33  ;;  %v5982_v60 = vsel %vm394_vm2, %v5977_v56, 0 }
  0xe6   : > { %3610 = vmatpush1.msra.mxu1 %v27220_v37  ;;  %26129 = vmatmul.mubr.f32.vlgmr.msra.gmra.mxu0 %v3257_v48  ;;  %v27409_v48 = vpop.permute.xlu0 %5974 }
  0xe7   : > { %26137 = vmatpush3.msra.mxu0 %v3759_v57  ;;  %3643 = vmatprep.mubr.f32.mxu1 %v29502_v0  ;;  %v5978_v52 = vsel %vm5976_vm8, %v5973_v44, %v27409_v48 }
  0xe8   : > { %26131 = vmatprep.subr.mxu1 %v29502_v0  ;;  %26138 = vmatprep.mubr.msk.f32.mxu0 %vm26900_vm3, %v29502_v0  ;;  %v5984_v57 = vsel %vm394_vm2, %v5978_v52, 0 }
  0xe9   : > { %26146 = vmatprep.subr.mxu0 %v29502_v0  ;;  %3645 = vmatmul.mubr.f32.vlgmr.msra.gmra.mxu1 %v27203_v31 }
  0xea   : > { %26132 = vmatpush3.msra.mxu1 %v3762_v8  ;;  %26139 = vmatmul.mubr.f32.vlgmr.msra.gmra.mxu0 %v27216_v35  ;;  %v5163_v35 = vsub.f32 %v5050_v26, %v27360_v30 }
  0xeb   : > { %26147 = vmatpush3.msra.mxu0 %v3760_v62  ;;  %26133 = vmatprep.mubr.msk.f32.mxu1 %vm26900_vm3, %v29502_v0 }
  0xec   : > { %26141 = vmatprep.subr.mxu1 %v29502_v0  ;;  %26148 = vmatprep.mubr.msk.f32.mxu0 %vm26900_vm3, %v29502_v0 }
  0xed   : > { %4151 = vmatprep.subr.mxu0 %v27286_v1  ;;  %26134 = vmatmul.mubr.f32.vlgmr.msra.gmra.mxu1 %v27203_v31 }
  0xee   : > { %26142 = vmatpush3.msra.mxu1 %v27256_v49  ;;  %26149 = vmatmul.mubr.f32.vlgmr.msra.gmra.mxu0 %v27203_v31 }
  0xef   : > { %4153 = vmatpush1.msra.mxu0 %v27295_v4  ;;  %26143 = vmatprep.mubr.msk.f32.mxu1 %vm26900_vm3, %v29502_v0 }
  0xf0   : > { %4312 = vmatprep.subr.mxu0 %v4229_v5  ;;  %26151 = vmatprep.subr.mxu1 %v29502_v0  ;;  %v5630_v5 = vand.u32 4294901760, %v5629_v63 }
  0xf1   : > { %4186 = vmatprep.mubr.f32.mxu0 %v29502_v0  ;;  %26144 = vmatmul.mubr.f32.vlgmr.msra.gmra.mxu1 %v27230_v39  ;;  %v5164_v39 = vand.u32 4294901760, %v5163_v35 }
  0xf2   : > { %26152 = vmatpush3.msra.mxu1 %v27256_v49  ;;  %4192 = vmatmul.mubr.f32.vlgmr.msra.gmra.mxu0 %v4191_v15  ;;  %v25688_v49 = vld [vmem:[%s29493_s1 + $0x30] sm:$0xff] }
  0xf3   : > { %4315 = vmatpush1.msra.mxu0 %v4235_v7  ;;  %4233 = vmatprep.subr.mxu1 %v4232_v20  ;;  %v5165_v43 = vsub.f32 %v5163_v35, %v5164_v39  ;;  %v5980_v53 = vsel %vm390_vm0, %v25688_v49, 0 }
  0xf4   : > { %4466 = vmatprep.subr.mxu0 %v4230_v9  ;;  %26153 = vmatprep.mubr.msk.f32.mxu1 %vm26900_vm3, %v29502_v0  ;;  %v27428_v58 = vand.u32 4294901760, %v5980_v53  ;;  %v5986_v9 = vsel %vm394_vm2, %v27409_v48, 0 }
  0xf5   : > { %4348 = vmatprep.mubr.f32.mxu0 %v29502_v0  ;;  %26154 = vmatmul.mubr.f32.vlgmr.msra.gmra.mxu1 %v27203_v31  ;;  %v5048_v31 = vsel %vm394_vm2, %v5043_v27, 0  ;;  %v5166_v50 = vand.u32 4294901760, %v5165_v43  ;;  %v27481_v13 = vand.u32 4294901760, %v5986_v9 }
  0xf6   : > { %4239 = vmatpush1.msra.mxu1 %v4238_v25  ;;  %4351 = vmatmul.mubr.f32.vlgmr.msra.gmra.mxu0 %v27291_v2  ;;  %v27370_v34 = vand.u32 4294901760, %v5048_v31  ;;  %v27441_v62 = vsub.f32 %v5980_v53, %v27428_v58 }
  0xf7   : > { %4470 = vmatpush1.msra.mxu0 %v4236_v11  ;;  %4388 = vmatprep.subr.mxu1 %v27286_v1  ;;  %v6907_v11 = vpop.permute.xlu0 %6906  ;;  %v6561_v21 = vsub.f32 %v5986_v9, %v27481_v13 }
  0xf8   : > { %4272 = vmatprep.mubr.f32.mxu1 %v29502_v0  ;;  %4503 = vmatprep.mubr.f32.mxu0 %v29502_v0  ;;  %v5169_v37 = vsub.f32 %v5048_v31, %v27370_v34  ;;  %v27455_v3 = vand.u32 4294901760, %v27441_v62 }
  0xf9   : > { %26156 = vmatprep.subr.mxu0 %v29502_v0  ;;  %4274 = vmatmul.mubr.f32.vlgmr.msra.gmra.mxu1 %v27278_v61  ;;  %v6562_v26 = vand.u32 4294901760, %v6561_v21 }
  0xfa   : > { %4390 = vmatpush1.msra.mxu1 %v27295_v4  ;;  %4505 = vmatmul.mubr.f32.vlgmr.msra.gmra.mxu0 %v27278_v61  ;;  %v5170_v41 = vand.u32 4294901760, %v5169_v37  ;;  %v6058_v7 = vsub.f32 %v27441_v62, %v27455_v3 }
  0xfb   : > { %26157 = vmatpush3.msra.mxu0 %v27331_v16  ;;  %4542 = vmatprep.subr.mxu1 %v27286_v1  ;;  %v27445_v1 = vand.u32 4294901760, %v5982_v60  ;;  %v6905_v19 = vpop.permute.xlu0 %6904 }
  0xfc   : > { %4423 = vmatprep.mubr.f32.mxu1 %v29502_v0  ;;  %26158 = vmatprep.mubr.msk.f32.mxu0 %vm26900_vm3, %v29502_v0  ;;  %v5171_v47 = vsub.f32 %v5169_v37, %v5170_v41  ;;  %v6059_v12 = vand.u32 4294901760, %v6058_v7 }
  0xfd   : > { %26166 = vmatprep.subr.mxu0 %v29502_v0  ;;  %4427 = vmatmul.mubr.f32.vlgmr.msra.gmra.mxu1 %v27305_v6 }
  0xfe   : > { %4544 = vmatpush1.msra.mxu1 %v27295_v4  ;;  %26159 = vmatmul.mubr.f32.vlgmr.msra.gmra.mxu0 %v4191_v15  ;;  %v5172_v55 = vand.u32 4294901760, %v5171_v47  ;;  %v6103_v4 = vsub.f32 %v5982_v60, %v27445_v1  ;;  %v27484_v15 = vpop.permute.xlu1 %6908 }
  0xff   : > { %26167 = vmatpush3.msra.mxu0 %v4693_v24  ;;  %4577 = vmatprep.mubr.f32.mxu1 %v29502_v0  ;;  %v6912_v18 = vsel %vm6910_vm9, %v6907_v11, %v27484_v15  ;;  %v6911_v24 = vsel %vm6910_vm9, %v6905_v19, %v6907_v11 }
 0x100   : > { %26161 = vmatprep.subr.mxu1 %v29502_v0  ;;  %26168 = vmatprep.mubr.msk.f32.mxu0 %vm26900_vm3, %v29502_v0  ;;  %v6104_v8 = vand.u32 4294901760, %v6103_v4  ;;  %v6918_v23 = vsel %vm394_vm2, %v6912_v18, 0 }
 0x101   : > { %26176 = vmatprep.subr.mxu0 %v29502_v0  ;;  %4579 = vmatmul.mubr.f32.vlgmr.msra.gmra.mxu1 %v27278_v61  ;;  %v27510_v27 = vand.u32 4294901760, %v6918_v23 }
 0x102   : > { %26162 = vmatpush3.msra.mxu1 %v4696_v38  ;;  %26169 = vmatmul.mubr.f32.vlgmr.msra.gmra.mxu0 %v27291_v2  ;;  %v6105_v14 = vsub.f32 %v6103_v4, %v6104_v8 }
 0x103   : > { %26177 = vmatpush3.msra.mxu0 %v4694_v29  ;;  %26163 = vmatprep.mubr.msk.f32.mxu1 %vm26900_vm3, %v29502_v0 }
 0x104   : > { %26171 = vmatprep.subr.mxu1 %v29502_v0  ;;  %26178 = vmatprep.mubr.msk.f32.mxu0 %vm26900_vm3, %v29502_v0  ;;  %v6106_v22 = vand.u32 4294901760, %v6105_v14 }
 0x105   : > { %5085 = vmatprep.subr.mxu0 %v27360_v30  ;;  %26164 = vmatmul.mubr.f32.vlgmr.msra.gmra.mxu1 %v27278_v61 }
 0x106   : > { %26172 = vmatpush3.msra.mxu1 %v27331_v16  ;;  %26179 = vmatmul.mubr.f32.vlgmr.msra.gmra.mxu0 %v27278_v61 }
 0x107   : > { %5087 = vmatpush1.msra.mxu0 %v27370_v34  ;;  %26173 = vmatprep.mubr.msk.f32.mxu1 %vm26900_vm3, %v29502_v0 }
 0x108   : > { %5246 = vmatprep.subr.mxu0 %v5163_v35  ;;  %26181 = vmatprep.subr.mxu1 %v29502_v0 }
 0x109   : > { %5120 = vmatprep.mubr.f32.mxu0 %v29502_v0  ;;  %26174 = vmatmul.mubr.f32.vlgmr.msra.gmra.mxu1 %v27305_v6 }
 0x10a   : > { %26182 = vmatpush3.msra.mxu1 %v27331_v16  ;;  %5126 = vmatmul.mubr.f32.vlgmr.msra.gmra.mxu0 %v5125_v45  ;;  %v25689_v16 = vld [vmem:[%s29493_s1 + $0x38] sm:$0xff] }
 0x10b   : > { %5249 = vmatpush1.msra.mxu0 %v5169_v37  ;;  %5167 = vmatprep.subr.mxu1 %v5166_v50  ;;  %v6914_v20 = vsel %vm390_vm0, %v25689_v16, 0 }
 0x10c   : > { %5400 = vmatprep.subr.mxu0 %v5164_v39  ;;  %26183 = vmatprep.mubr.msk.f32.mxu1 %vm26900_vm3, %v29502_v0  ;;  %v27503_v25 = vand.u32 4294901760, %v6914_v20  ;;  %v6920_v39 = vsel %vm394_vm2, %v27484_v15, 0 }
 0x10d   : > { %5282 = vmatprep.mubr.f32.mxu0 %v29502_v0  ;;  %26184 = vmatmul.mubr.f32.vlgmr.msra.gmra.mxu1 %v27278_v61  ;;  %v27436_v61 = vand.u32 4294901760, %v5984_v57  ;;  %v27556_v43 = vand.u32 4294901760, %v6920_v39 }
 0x10e   : > { %5173 = vmatpush1.msra.mxu1 %v5172_v55  ;;  %5285 = vmatmul.mubr.f32.vlgmr.msra.gmra.mxu0 %v27366_v32  ;;  %v27516_v29 = vsub.f32 %v6914_v20, %v27503_v25 }
 0x10f   : > { %5404 = vmatpush1.msra.mxu0 %v5170_v41  ;;  %5322 = vmatprep.subr.mxu1 %v27360_v30  ;;  %v6097_v2 = vsub.f32 %v5984_v57, %v27436_v61  ;;  %v7841_v41 = vpop.permute.xlu1 %7840  ;;  %v7495_v51 = vsub.f32 %v6920_v39, %v27556_v43  ;;  %v26901_v39 = vmov 0  }
 0x110   : > { %5206 = vmatprep.mubr.f32.mxu1 %v29502_v0  ;;  %5437 = vmatprep.mubr.f32.mxu0 %v29502_v0  ;;  %v27530_v33 = vand.u32 4294901760, %v27516_v29 }
 0x111   : > { %26186 = vmatprep.subr.mxu0 %v29502_v0  ;;  %5208 = vmatmul.mubr.f32.vlgmr.msra.gmra.mxu1 %v27353_v28  ;;  %v6098_v6 = vand.u32 4294901760, %v6097_v2  ;;  %v7496_v56 = vand.u32 4294901760, %v7495_v51 }
 0x112   : > { %5324 = vmatpush1.msra.mxu1 %v27370_v34  ;;  %5439 = vmatmul.mubr.f32.vlgmr.msra.gmra.mxu0 %v27353_v28  ;;  %v6992_v37 = vsub.f32 %v27516_v29, %v27530_v33 }
 0x113   : > { %26187 = vmatpush3.msra.mxu0 %v27406_v46  ;;  %5476 = vmatprep.subr.mxu1 %v27360_v30  ;;  %v6099_v10 = vsub.f32 %v6097_v2, %v6098_v6  ;;  %v6563_v30 = vsub.f32 %v6561_v21, %v6562_v26  ;;  %v7839_v48 = vpop.permute.xlu1 %7838  ;;  %v7497_v60 = vsub.f32 %v7495_v51, %v7496_v56 }
 0x114   : > { %5357 = vmatprep.mubr.f32.mxu1 %v29502_v0  ;;  %26188 = vmatprep.mubr.msk.f32.mxu0 %vm26900_vm3, %v29502_v0  ;;  %v6993_v42 = vand.u32 4294901760, %v6992_v37  ;;  %v7845_v53 = vsel %vm7844_vm10, %v7839_v48, %v7841_v41 }
 0x115   : > { %26196 = vmatprep.subr.mxu0 %v29502_v0  ;;  %5361 = vmatmul.mubr.f32.vlgmr.msra.gmra.mxu1 %v27380_v36  ;;  %v6100_v17 = vand.u32 4294901760, %v6099_v10  ;;  %v6564_v35 = vand.u32 4294901760, %v6563_v30  ;;  %v7850_v57 = vsel %vm394_vm2, %v7845_v53, 0 }
 0x116   : > { %5478 = vmatpush1.msra.mxu1 %v27370_v34  ;;  %26189 = vmatmul.mubr.f32.vlgmr.msra.gmra.mxu0 %v5125_v45  ;;  %v27559_v45 = vpop.permute.xlu0 %7842 }
 0x117   : > { %26197 = vmatpush3.msra.mxu0 %v5627_v54  ;;  %5511 = vmatprep.mubr.f32.mxu1 %v29502_v0  ;;  %v7846_v49 = vsel %vm7844_vm10, %v7841_v41, %v27559_v45 }
 0x118   : > { %26191 = vmatprep.subr.mxu1 %v29502_v0  ;;  %26198 = vmatprep.mubr.msk.f32.mxu0 %vm26900_vm3, %v29502_v0  ;;  %v7852_v54 = vsel %vm394_vm2, %v7846_v49, 0 }
 0x119   : > { %26206 = vmatprep.subr.mxu0 %v29502_v0  ;;  %5513 = vmatmul.mubr.f32.vlgmr.msra.gmra.mxu1 %v27353_v28 }
 0x11a   : > { %26192 = vmatpush3.msra.mxu1 %v5630_v5  ;;  %26199 = vmatmul.mubr.f32.vlgmr.msra.gmra.mxu0 %v27366_v32  ;;  %v7031_v32 = vsub.f32 %v6918_v23, %v27510_v27 }
 0x11b   : > { %26207 = vmatpush3.msra.mxu0 %v5628_v59  ;;  %26193 = vmatprep.mubr.msk.f32.mxu1 %vm26900_vm3, %v29502_v0 }
 0x11c   : > { %26201 = vmatprep.subr.mxu1 %v29502_v0  ;;  %26208 = vmatprep.mubr.msk.f32.mxu0 %vm26900_vm3, %v29502_v0 }
 0x11d   : > { %6019 = vmatprep.subr.mxu0 %v27436_v61  ;;  %26194 = vmatmul.mubr.f32.vlgmr.msra.gmra.mxu1 %v27353_v28 }
 0x11e   : > { %26202 = vmatpush3.msra.mxu1 %v27406_v46  ;;  %26209 = vmatmul.mubr.f32.vlgmr.msra.gmra.mxu0 %v27353_v28 }
 0x11f   : > { %6021 = vmatpush1.msra.mxu0 %v27445_v1  ;;  %26203 = vmatprep.mubr.msk.f32.mxu1 %vm26900_vm3, %v29502_v0 }
 0x120   : > { %6180 = vmatprep.subr.mxu0 %v6097_v2  ;;  %26211 = vmatprep.subr.mxu1 %v29502_v0  ;;  %v7498_v2 = vand.u32 4294901760, %v7497_v60 }
 0x121   : > { %6054 = vmatprep.mubr.f32.mxu0 %v29502_v0  ;;  %26204 = vmatmul.mubr.f32.vlgmr.msra.gmra.mxu1 %v27380_v36  ;;  %v7032_v36 = vand.u32 4294901760, %v7031_v32 }
 0x122   : > { %26212 = vmatpush3.msra.mxu1 %v27406_v46  ;;  %6060 = vmatmul.mubr.f32.vlgmr.msra.gmra.mxu0 %v6059_v12  ;;  %v25690_v46 = vld [vmem:[%s29493_s1 + $0x40] sm:$0xff] }
 0x123   : > { %6183 = vmatpush1.msra.mxu0 %v6103_v4  ;;  %6101 = vmatprep.subr.mxu1 %v6100_v17  ;;  %v7033_v40 = vsub.f32 %v7031_v32, %v7032_v36  ;;  %v7848_v50 = vsel %vm390_vm0, %v25690_v46, 0  ;;  %vm8828_vm0 = vcmask 64512  }
 0x124   : > { %6334 = vmatprep.subr.mxu0 %v6098_v6  ;;  %26213 = vmatprep.mubr.msk.f32.mxu1 %vm26900_vm3, %v29502_v0  ;;  %v27578_v55 = vand.u32 4294901760, %v7848_v50  ;;  %v7854_v6 = vsel %vm394_vm2, %v27559_v45, 0 }
 0x125   : > { %6216 = vmatprep.mubr.f32.mxu0 %v29502_v0  ;;  %26214 = vmatmul.mubr.f32.vlgmr.msra.gmra.mxu1 %v27353_v28  ;;  %v6916_v28 = vsel %vm394_vm2, %v6911_v24, 0  ;;  %v7034_v47 = vand.u32 4294901760, %v7033_v40  ;;  %v27631_v9 = vand.u32 4294901760, %v7854_v6  ;;  %v8770_v40 = vld [vmem:[%s29494_s2] sm:$0xff] }
 0x126   : > { %6107 = vmatpush1.msra.mxu1 %v6106_v22  ;;  %6219 = vmatmul.mubr.f32.vlgmr.msra.gmra.mxu0 %v27441_v62  ;;  %v27520_v31 = vand.u32 4294901760, %v6916_v28  ;;  %v27591_v59 = vsub.f32 %v7848_v50, %v27578_v55 }
 0x127   : > { %6338 = vmatpush1.msra.mxu0 %v6104_v8  ;;  %6256 = vmatprep.subr.mxu1 %v27436_v61  ;;  %v8429_v14 = vsub.f32 %v7854_v6, %v27631_v9 }
 0x128   : > { %6140 = vmatprep.mubr.f32.mxu1 %v29502_v0  ;;  %6371 = vmatprep.mubr.f32.mxu0 %v29502_v0  ;;  %v7037_v34 = vsub.f32 %v6916_v28, %v27520_v31  ;;  %v27605_v63 = vand.u32 4294901760, %v27591_v59 }
 0x129   : > { %26216 = vmatprep.subr.mxu0 %v29502_v0  ;;  %6142 = vmatmul.mubr.f32.vlgmr.msra.gmra.mxu1 %v27428_v58  ;;  %v8430_v18 = vand.u32 4294901760, %v8429_v14 }
 0x12a   : > { %6258 = vmatpush1.msra.mxu1 %v27445_v1  ;;  %6373 = vmatmul.mubr.f32.vlgmr.msra.gmra.mxu0 %v27428_v58  ;;  %v7038_v38 = vand.u32 4294901760, %v7037_v34  ;;  %v7926_v4 = vsub.f32 %v27591_v59, %v27605_v63 }
 0x12b   : > { %26217 = vmatpush3.msra.mxu0 %v27481_v13  ;;  %6410 = vmatprep.subr.mxu1 %v27436_v61  ;;  %v27595_v61 = vand.u32 4294901760, %v7850_v57  ;;  %v8431_v23 = vsub.f32 %v8429_v14, %v8430_v18 }
 0x12c   : > { %6291 = vmatprep.mubr.f32.mxu1 %v29502_v0  ;;  %26218 = vmatprep.mubr.msk.f32.mxu0 %vm26900_vm3, %v29502_v0  ;;  %v7039_v44 = vsub.f32 %v7037_v34, %v7038_v38  ;;  %v7927_v8 = vand.u32 4294901760, %v7926_v4 }
 0x12d   : > { %26226 = vmatprep.subr.mxu0 %v29502_v0  ;;  %6295 = vmatmul.mubr.f32.vlgmr.msra.gmra.mxu1 %v27455_v3 }
 0x12e   : > { %6412 = vmatpush1.msra.mxu1 %v27445_v1  ;;  %26219 = vmatmul.mubr.f32.vlgmr.msra.gmra.mxu0 %v6059_v12  ;;  %v7040_v52 = vand.u32 4294901760, %v7039_v44  ;;  %v7971_v1 = vsub.f32 %v7850_v57, %v27595_v61 }
 0x12f   : > { %26227 = vmatpush3.msra.mxu0 %v6561_v21  ;;  %6445 = vmatprep.mubr.f32.mxu1 %v29502_v0 }
 0x130   : > { %26221 = vmatprep.subr.mxu1 %v29502_v0  ;;  %26228 = vmatprep.mubr.msk.f32.mxu0 %vm26900_vm3, %v29502_v0  ;;  %v7972_v5 = vand.u32 4294901760, %v7971_v1 }
 0x131   : > { %26236 = vmatprep.subr.mxu0 %v29502_v0  ;;  %6447 = vmatmul.mubr.f32.vlgmr.msra.gmra.mxu1 %v27428_v58 }
 0x132   : > { %26222 = vmatpush3.msra.mxu1 %v6564_v35  ;;  %26229 = vmatmul.mubr.f32.vlgmr.msra.gmra.mxu0 %v27441_v62  ;;  %v7973_v10 = vsub.f32 %v7971_v1, %v7972_v5 }
 0x133   : > { %26237 = vmatpush3.msra.mxu0 %v6562_v26  ;;  %26223 = vmatprep.mubr.msk.f32.mxu1 %vm26900_vm3, %v29502_v0 }
 0x134   : > { %26231 = vmatprep.subr.mxu1 %v29502_v0  ;;  %26238 = vmatprep.mubr.msk.f32.mxu0 %vm26900_vm3, %v29502_v0  ;;  %v7974_v15 = vand.u32 4294901760, %v7973_v10 }
 0x135   : > { %6953 = vmatprep.subr.mxu0 %v27510_v27  ;;  %26224 = vmatmul.mubr.f32.vlgmr.msra.gmra.mxu1 %v27428_v58 }
 0x136   : > { %26232 = vmatpush3.msra.mxu1 %v27481_v13  ;;  %26239 = vmatmul.mubr.f32.vlgmr.msra.gmra.mxu0 %v27428_v58 }
 0x137   : > { %6955 = vmatpush1.msra.mxu0 %v27520_v31  ;;  %26233 = vmatprep.mubr.msk.f32.mxu1 %vm26900_vm3, %v29502_v0 }
 0x138   : > { %7114 = vmatprep.subr.mxu0 %v7031_v32  ;;  %26241 = vmatprep.subr.mxu1 %v29502_v0  ;;  %v8432_v32 = vand.u32 4294901760, %v8431_v23 }
 0x139   : > { %6988 = vmatprep.mubr.f32.mxu0 %v29502_v0  ;;  %26234 = vmatmul.mubr.f32.vlgmr.msra.gmra.mxu1 %v27455_v3 }
 0x13a   : > { %26242 = vmatpush3.msra.mxu1 %v27481_v13  ;;  %6994 = vmatmul.mubr.f32.vlgmr.msra.gmra.mxu0 %v6993_v42 }
 0x13b   : > { %7117 = vmatpush1.msra.mxu0 %v7037_v34  ;;  %7035 = vmatprep.subr.mxu1 %v7034_v47 }
 0x13c   : > { %7268 = vmatprep.subr.mxu0 %v7032_v36  ;;  %26243 = vmatprep.mubr.msk.f32.mxu1 %vm26900_vm3, %v29502_v0 }
 0x13d   : > { %7150 = vmatprep.mubr.f32.mxu0 %v29502_v0  ;;  %26244 = vmatmul.mubr.f32.vlgmr.msra.gmra.mxu1 %v27428_v58  ;;  %v27586_v58 = vand.u32 4294901760, %v7852_v54 }
 0x13e   : > { %7041 = vmatpush1.msra.mxu1 %v7040_v52  ;;  %7153 = vmatmul.mubr.f32.vlgmr.msra.gmra.mxu0 %v27516_v29 }
 0x13f   : > { %7272 = vmatpush1.msra.mxu0 %v7038_v38  ;;  %7190 = vmatprep.subr.mxu1 %v27510_v27  ;;  %v7965_v62 = vsub.f32 %v7852_v54, %v27586_v58 }
 0x140   : > { %7074 = vmatprep.mubr.f32.mxu1 %v29502_v0  ;;  %7305 = vmatprep.mubr.f32.mxu0 %v29502_v0 }
 0x141   : > { %26246 = vmatprep.subr.mxu0 %v29502_v0  ;;  %7076 = vmatmul.mubr.f32.vlgmr.msra.gmra.mxu1 %v27503_v25  ;;  %v7966_v3 = vand.u32 4294901760, %v7965_v62 }
 0x142   : > { %7192 = vmatpush1.msra.mxu1 %v27520_v31  ;;  %7307 = vmatmul.mubr.f32.vlgmr.msra.gmra.mxu0 %v27503_v25 }
 0x143   : > { %26247 = vmatpush3.msra.mxu0 %v27556_v43  ;;  %7344 = vmatprep.subr.mxu1 %v27510_v27  ;;  %v7967_v7 = vsub.f32 %v7965_v62, %v7966_v3 }
 0x144   : > { %7225 = vmatprep.mubr.f32.mxu1 %v29502_v0  ;;  %26248 = vmatprep.mubr.msk.f32.mxu0 %vm26900_vm3, %v29502_v0 }
 0x145   : > { %26256 = vmatprep.subr.mxu0 %v29502_v0  ;;  %7229 = vmatmul.mubr.f32.vlgmr.msra.gmra.mxu1 %v27530_v33  ;;  %v7968_v12 = vand.u32 4294901760, %v7967_v7 }
 0x146   : > { %7346 = vmatpush1.msra.mxu1 %v27520_v31  ;;  %26249 = vmatmul.mubr.f32.vlgmr.msra.gmra.mxu0 %v6993_v42 }
 0x147   : > { %26257 = vmatpush3.msra.mxu0 %v7495_v51  ;;  %7379 = vmatprep.mubr.f32.mxu1 %v29502_v0 }
 0x148   : > { %26251 = vmatprep.subr.mxu1 %v29502_v0  ;;  %26258 = vmatprep.mubr.msk.f32.mxu0 %vm26900_vm3, %v29502_v0 }
 0x149   : > { %26266 = vmatprep.subr.mxu0 %v29502_v0  ;;  %7381 = vmatmul.mubr.f32.vlgmr.msra.gmra.mxu1 %v27503_v25 }
 0x14a   : > { %26252 = vmatpush3.msra.mxu1 %v7498_v2  ;;  %26259 = vmatmul.mubr.f32.vlgmr.msra.gmra.mxu0 %v27516_v29 }
 0x14b   : > { %26267 = vmatpush3.msra.mxu0 %v7496_v56  ;;  %26253 = vmatprep.mubr.msk.f32.mxu1 %vm26900_vm3, %v29502_v0 }
 0x14c   : > { %26261 = vmatprep.subr.mxu1 %v29502_v0  ;;  %26268 = vmatprep.mubr.msk.f32.mxu0 %vm26900_vm3, %v29502_v0 }
 0x14d   : > { %7887 = vmatprep.subr.mxu0 %v27586_v58  ;;  %26254 = vmatmul.mubr.f32.vlgmr.msra.gmra.mxu1 %v27503_v25 }
 0x14e   : > { %26262 = vmatpush3.msra.mxu1 %v27556_v43  ;;  %26269 = vmatmul.mubr.f32.vlgmr.msra.gmra.mxu0 %v27503_v25 }
 0x14f   : > { %7889 = vmatpush1.msra.mxu0 %v27595_v61  ;;  %26263 = vmatprep.mubr.msk.f32.mxu1 %vm26900_vm3, %v29502_v0 }
 0x150   : > { %8048 = vmatprep.subr.mxu0 %v7965_v62  ;;  %26271 = vmatprep.subr.mxu1 %v29502_v0 }
 0x151   : > { %7922 = vmatprep.mubr.f32.mxu0 %v29502_v0  ;;  %v474_v11 = vpop.f32.mrf.mxu0  ;;  %26264 = vmatmul.mubr.f32.vlgmr.msra.gmra.mxu1 %v27530_v33 }
 0x152   : > { %26272 = vmatpush3.msra.mxu1 %v27556_v43  ;;  %7928 = vmatmul.mubr.f32.vlgmr.msra.gmra.mxu0 %v7927_v8 }
 0x153   : > { %8051 = vmatpush1.msra.mxu0 %v7971_v1  ;;  %7969 = vmatprep.subr.mxu1 %v7968_v12  ;;  %v27637_v13 = vpop.f32.mrf.mxu0 }
 0x154   : > { %8202 = vmatprep.subr.mxu0 %v7966_v3  ;;  %26273 = vmatprep.mubr.msk.f32.mxu1 %vm26900_vm3, %v29502_v0 }
 0x155   : > { %8084 = vmatprep.mubr.f32.mxu0 %v29502_v0  ;;  %v633_v16 = vpop.f32.mrf.mxu0  ;;  %26274 = vmatmul.mubr.f32.vlgmr.msra.gmra.mxu1 %v27503_v25 }
 0x156   : > { %7975 = vmatpush1.msra.mxu1 %v7974_v15  ;;  %8087 = vmatmul.mubr.f32.vlgmr.msra.gmra.mxu0 %v27591_v59 }
 0x157   : > { %8206 = vmatpush1.msra.mxu0 %v7972_v5  ;;  %8124 = vmatprep.subr.mxu1 %v27586_v58  ;;  %v27646_v17 = vpop.f32.mrf.mxu0 }
 0x158   : > { %8008 = vmatprep.mubr.f32.mxu1 %v29502_v0  ;;  %8239 = vmatprep.mubr.f32.mxu0 %v29502_v0 }
 0x159   : > { %26276 = vmatprep.subr.mxu0 %v29502_v0  ;;  %v556_v19 = vpop.f32.mrf.mxu1  ;;  %8010 = vmatmul.mubr.f32.vlgmr.msra.gmra.mxu1 %v27578_v55 }
 0x15a   : > { %v557_v20 = vadd.f32 %v556_v19, %v474_v11  ;;  %v787_v21 = vpop.f32.mrf.mxu0  ;;  %8126 = vmatpush1.msra.mxu1 %v27595_v61  ;;  %8241 = vmatmul.mubr.f32.vlgmr.msra.gmra.mxu0 %v27578_v55 }
 0x15b   : > { %26277 = vmatpush3.msra.mxu0 %v27631_v9  ;;  %8278 = vmatprep.subr.mxu1 %v27586_v58  ;;  %v27656_v22 = vpop.f32.mrf.mxu1 }
 0x15c   : > { %v27658_v24 = vpop.f32.mrf.mxu0  ;;  %8159 = vmatprep.mubr.f32.mxu1 %v29502_v0  ;;  %26278 = vmatprep.mubr.msk.f32.mxu0 %vm26900_vm3, %v29502_v0  ;;  %v634_v25 = vadd.f32 %v633_v16, %v557_v20 }
 0x15d   : > { %26286 = vmatprep.subr.mxu0 %v29502_v0  ;;  %v709_v26 = vpop.f32.mrf.mxu1  ;;  %8163 = vmatmul.mubr.f32.vlgmr.msra.gmra.mxu1 %v27605_v63 }
 0x15e   : > { %v710_v27 = vadd.f32 %v709_v26, %v634_v25  ;;  %v938_v28 = vpop.f32.mrf.mxu0  ;;  %8280 = vmatpush1.msra.mxu1 %v27595_v61  ;;  %26279 = vmatmul.mubr.f32.vlgmr.msra.gmra.mxu0 %v7927_v8 }
 0x15f   : > { %26287 = vmatpush3.msra.mxu0 %v8429_v14  ;;  %v27666_v29 = vpop.f32.mrf.mxu1  ;;  %8313 = vmatprep.mubr.f32.mxu1 %v29502_v0 }
 0x160   : > { %v26040_v30 = vpop.f32.mrf.mxu0  ;;  %26281 = vmatprep.subr.mxu1 %v29502_v0  ;;  %26288 = vmatprep.mubr.msk.f32.mxu0 %vm26900_vm3, %v29502_v0  ;;  %v788_v31 = vadd.f32 %v787_v21, %v710_v27 }
 0x161   : > { %26296 = vmatprep.subr.mxu0 %v29502_v0  ;;  %v861_v33 = vpop.f32.mrf.mxu1  ;;  %8315 = vmatmul.mubr.f32.vlgmr.msra.gmra.mxu1 %v27578_v55 }
 0x162   : > { %v862_v34 = vadd.f32 %v861_v33, %v788_v31  ;;  %v1088_v35 = vpop.f32.mrf.mxu0  ;;  %26282 = vmatpush3.msra.mxu1 %v8432_v32  ;;  %26289 = vmatmul.mubr.f32.vlgmr.msra.gmra.mxu0 %v27591_v59 }
 0x163   : > { %26297 = vmatpush3.msra.mxu0 %v8430_v18  ;;  %v27675_v36 = vpop.f32.mrf.mxu1  ;;  %26283 = vmatprep.mubr.msk.f32.mxu1 %vm26900_vm3, %v29502_v0 }
 0x164   : > { %v26050_v37 = vpop.f32.mrf.mxu0  ;;  %26291 = vmatprep.subr.mxu1 %v29502_v0  ;;  %26298 = vmatprep.mubr.msk.f32.mxu0 %vm26900_vm3, %v29502_v0 }
 0x165   : > { %v1014_v38 = vpop.f32.mrf.mxu1  ;;  %26284 = vmatmul.mubr.f32.vlgmr.msra.gmra.mxu1 %v27578_v55  ;;  %26868 = vset.pattern.permute.xlu0 %v26901_v39 }
 0x166   : > { %v1015_v41 = vadd.f32 %v1014_v38, %v938_v28  ;;  %v1236_v42 = vpop.f32.mrf.mxu0  ;;  %26292 = vmatpush3.msra.mxu1 %v27631_v9  ;;  %26293 = vmatprep.mubr.msk.f32.mxu1 %vm26900_vm3, %v29502_v0 }
 0x167   : > { %v26045_v43 = vpop.f32.mrf.mxu1  ;;  %26301 = vmatprep.subr.mxu1 %v29502_v0  ;;  %26299 = vmatmul.mubr.f32.vlgmr.msra.gmra.mxu0 %v27578_v55 }
 0x168   : > { %v26060_v44 = vpop.f32.mrf.mxu0  ;;  %v1089_v45 = vadd.f32 %v1088_v35, %v1015_v41  ;;  %8773 = vperm.xlu0 %26868, %v8770_v40   ;;  %8898 = vmatprep.mubr.f32.mxu0 %v29502_v0 }
 0x169   : > { %v1162_v46 = vpop.f32.mrf.mxu1  ;;  %26294 = vmatmul.mubr.f32.vlgmr.msra.gmra.mxu1 %v27605_v63  ;;  %26869 = vset.pattern.permute.xlu1 %v26901_v39 }
 0x16a   : > { %v1163_v47 = vadd.f32 %v1162_v46, %v1089_v45  ;;  %v1394_v48 = vpop.f32.mrf.mxu0  ;;  %26302 = vmatpush3.msra.mxu1 %v27631_v9  ;;  %26303 = vmatprep.mubr.msk.f32.mxu1 %vm26900_vm3, %v29502_v0 }
 0x16b   : > { %v1395_v49 = vadd.f32 %v1394_v48, %v862_v34  ;;  %v26055_v50 = vpop.f32.mrf.mxu1 }
 0x16c   : > { %v27696_v51 = vpop.f32.mrf.mxu0  ;;  %v1237_v52 = vadd.f32 %v1236_v42, %v1163_v47 }
 0x16d   : > { %v1308_v53 = vpop.f32.mrf.mxu1  ;;  %26304 = vmatmul.mubr.f32.vlgmr.msra.gmra.mxu1 %v27578_v55 }
 0x16e   : > { %v1309_v54 = vadd.f32 %v1308_v53, %v1237_v52  ;;  %v1553_v56 = vpop.f32.mrf.mxu0  ;;  %8984 = vmatprep.mubr.f32.mxu1 %v29502_v0 }
 0x16f   : > { %v26065_v57 = vpop.f32.mrf.mxu1 }
 0x170   : > { %v27700_v58 = vpop.f32.mrf.mxu0 }
 0x171   : > { %v1476_v59 = vpop.f32.mrf.mxu1 }
 0x172   : > { %v1477_v60 = vadd.f32 %v1476_v59, %v1395_v49  ;;  %v1707_v61 = vpop.f32.mrf.mxu0 }
 0x173   : > { %v27702_v62 = vpop.f32.mrf.mxu1 }
 0x174   : > { %v27704_v63 = vpop.f32.mrf.mxu0  ;;  %v1554_v1 = vadd.f32 %v1553_v56, %v1477_v60 }
 0x175   : > { %v1629_v2 = vpop.f32.mrf.mxu1 }
 0x176   : > { %v1630_v3 = vadd.f32 %v1629_v2, %v1554_v1  ;;  %v1858_v4 = vpop.f32.mrf.mxu0 }
 0x177   : > { %v1859_v5 = vadd.f32 %v1858_v4, %v1309_v54  ;;  %v27706_v55 = vpop.f32.mrf.mxu1 }
 0x178   : > { %v1708_v6 = vadd.f32 %v1707_v61, %v1630_v3  ;;  %v26070_v7 = vpop.f32.mrf.mxu0 }
 0x179   : > { %v1781_v8 = vpop.f32.mrf.mxu1 }
 0x17a   : > { %v1782_v9 = vadd.f32 %v1781_v8, %v1708_v6  ;;  %v2008_v10 = vpop.f32.mrf.mxu0 }
 0x17b   : > { %v27708_v11 = vpop.f32.mrf.mxu1 }
 0x17c   : > { %v26080_v12 = vpop.f32.mrf.mxu0 }
 0x17d   : > { %v1934_v14 = vpop.f32.mrf.mxu1 }
 0x17e   : > { %v1935_v15 = vadd.f32 %v1934_v14, %v1859_v5  ;;  %v2156_v16 = vpop.f32.mrf.mxu0 }
 0x17f   : > { %v26075_v18 = vpop.f32.mrf.mxu1 }
 0x180   : > { %v2009_v19 = vadd.f32 %v2008_v10, %v1935_v15  ;;  %v26090_v20 = vpop.f32.mrf.mxu0 }
 0x181   : > { %v2082_v21 = vpop.f32.mrf.mxu1 }
 0x182   : > { %v2083_v23 = vadd.f32 %v2082_v21, %v2009_v19  ;;  %v2325_v25 = vpop.f32.mrf.mxu0 }
 0x183   : > { %v26085_v26 = vpop.f32.mrf.mxu1 }
 0x184   : > { %v2157_v27 = vadd.f32 %v2156_v16, %v2083_v23  ;;  %v27710_v28 = vpop.f32.mrf.mxu0 }
 0x185   : > { %v2228_v30 = vpop.f32.mrf.mxu1 }
 0x186   : > { %v2229_v31 = vadd.f32 %v2228_v30, %v2157_v27  ;;  %v2484_v32 = vpop.f32.mrf.mxu0 }
 0x187   : > { %v26095_v33 = vpop.f32.mrf.mxu1 }
 0x188   : > { %v27712_v34 = vpop.f32.mrf.mxu0 }
 0x189   : > { %v2407_v35 = vpop.f32.mrf.mxu1 }
 0x18a   : > { %v2408_v37 = vadd.f32 %v2407_v35, %v2325_v25  ;;  %v2638_v38 = vpop.f32.mrf.mxu0 }
 0x18b   : > { %v27714_v39 = vpop.f32.mrf.mxu1 }
 0x18c   : > { %v2485_v40 = vadd.f32 %v2484_v32, %v2408_v37  ;;  %v27716_v41 = vpop.f32.mrf.mxu0 }
 0x18d   : > { %v2560_v42 = vpop.f32.mrf.mxu1 }
 0x18e   : > { %v2561_v43 = vadd.f32 %v2560_v42, %v2485_v40  ;;  %v2789_v44 = vpop.f32.mrf.mxu0 }
 0x18f   : > { %v27718_v45 = vpop.f32.mrf.mxu1 }
 0x190   : > { %v2639_v46 = vadd.f32 %v2638_v38, %v2561_v43  ;;  %v26100_v47 = vpop.f32.mrf.mxu0 }
 0x191   : > { %v2712_v48 = vpop.f32.mrf.mxu1 }
 0x192   : > { %v2713_v49 = vadd.f32 %v2712_v48, %v2639_v46  ;;  %v2939_v50 = vpop.f32.mrf.mxu0 }
 0x193   : > { %v27720_v52 = vpop.f32.mrf.mxu1 }
 0x194   : > { %v3163_v53 = vadd.f32 %v2713_v49, %v1782_v9  ;;  %v26110_v54 = vpop.f32.mrf.mxu0 }
 0x195   : > { %v2865_v56 = vpop.f32.mrf.mxu1 }
 0x196   : > { %v2866_v57 = vadd.f32 %v2865_v56, %v2789_v44  ;;  %v3087_v59 = vpop.f32.mrf.mxu0 }
 0x197   : > { %v26105_v60 = vpop.f32.mrf.mxu1 }
 0x198   : > { %v2940_v61 = vadd.f32 %v2939_v50, %v2866_v57  ;;  %v26120_v1 = vpop.f32.mrf.mxu0 }
 0x199   : > { %v3013_v2 = vpop.f32.mrf.mxu1 }
 0x19a   : > { %v3014_v3 = vadd.f32 %v3013_v2, %v2940_v61  ;;  %v3259_v4 = vpop.f32.mrf.mxu0 }
 0x19b   : > { %v26115_v5 = vpop.f32.mrf.mxu1 }
 0x19c   : > { %v3088_v6 = vadd.f32 %v3087_v59, %v3014_v3  ;;  %v27722_v7 = vpop.f32.mrf.mxu0 }
 0x19d   : > { %v3159_v8 = vpop.f32.mrf.mxu1 }
 0x19e   : > { %v3160_v10 = vadd.f32 %v3159_v8, %v3088_v6  ;;  %v3418_v12 = vpop.f32.mrf.mxu0 }
 0x19f   : > { %v26125_v14 = vpop.f32.mrf.mxu1 }
 0x1a0   : > { %v3165_v15 = vadd.f32 %v3160_v10, %v2229_v31  ;;  %v27724_v9 = vpop.f32.mrf.mxu0 }
 0x1a1   : > { %v3341_v16 = vpop.f32.mrf.mxu1 }
 0x1a2   : > { %v3342_v18 = vadd.f32 %v3341_v16, %v3259_v4  ;;  %v3572_v19 = vpop.f32.mrf.mxu0 }
 0x1a3   : > { %v27726_v20 = vpop.f32.mrf.mxu1 }
 0x1a4   : > { %v3419_v21 = vadd.f32 %v3418_v12, %v3342_v18  ;;  %v27728_v23 = vpop.f32.mrf.mxu0 }
 0x1a5   : > { %v3494_v25 = vpop.f32.mrf.mxu1 }
 0x1a6   : > { %v3495_v26 = vadd.f32 %v3494_v25, %v3419_v21  ;;  %v3723_v27 = vpop.f32.mrf.mxu0 }
 0x1a7   : > { %v27730_v30 = vpop.f32.mrf.mxu1 }
 0x1a8   : > { %v3573_v32 = vadd.f32 %v3572_v19, %v3495_v26  ;;  %v26130_v33 = vpop.f32.mrf.mxu0 }
 0x1a9   : > { %v3646_v35 = vpop.f32.mrf.mxu1 }
 0x1aa   : > { %v3647_v37 = vadd.f32 %v3646_v35, %v3573_v32  ;;  %v3873_v31 = vpop.f32.mrf.mxu0 }
 0x1ab   : > { %v27732_v38 = vpop.f32.mrf.mxu1 }
 0x1ac   : > { %v4097_v40 = vadd.f32 %v3647_v37, %v3163_v53  ;;  %v26140_v42 = vpop.f32.mrf.mxu0 }
 0x1ad   : > { %v3799_v43 = vpop.f32.mrf.mxu1 }
 0x1ae   : > { %v3800_v44 = vadd.f32 %v3799_v43, %v3723_v27  ;;  %v4021_v46 = vpop.f32.mrf.mxu0 }
 0x1af   : > { %v26135_v47 = vpop.f32.mrf.mxu1 }
 0x1b0   : > { %v3874_v48 = vadd.f32 %v3873_v31, %v3800_v44  ;;  %v26150_v49 = vpop.f32.mrf.mxu0 }
 0x1b1   : > { %v3947_v50 = vpop.f32.mrf.mxu1 }
 0x1b2   : > { %v3948_v54 = vadd.f32 %v3947_v50, %v3874_v48  ;;  %v4193_v56 = vpop.f32.mrf.mxu0 }
 0x1b3   : > { %v26145_v57 = vpop.f32.mrf.mxu1 }
 0x1b4   : > { %v4022_v59 = vadd.f32 %v4021_v46, %v3948_v54  ;;  %v27734_v60 = vpop.f32.mrf.mxu0 }
 0x1b5   : > { %v4093_v61 = vpop.f32.mrf.mxu1 }
 0x1b6   : > { %v4094_v1 = vadd.f32 %v4093_v61, %v4022_v59  ;;  %v4352_v2 = vpop.f32.mrf.mxu0 }
 0x1b7   : > { %v26155_v3 = vpop.f32.mrf.mxu1 }
 0x1b8   : > { %v4099_v4 = vadd.f32 %v4094_v1, %v3165_v15  ;;  %v27736_v53 = vpop.f32.mrf.mxu0 }
 0x1b9   : > { %v4275_v5 = vpop.f32.mrf.mxu1 }
 0x1ba   : > { %v4276_v6 = vadd.f32 %v4275_v5, %v4193_v56  ;;  %v4506_v8 = vpop.f32.mrf.mxu0 }
 0x1bb   : > { %v27738_v10 = vpop.f32.mrf.mxu1 }
 0x1bc   : > { %v4353_v12 = vadd.f32 %v4352_v2, %v4276_v6  ;;  %v27740_v14 = vpop.f32.mrf.mxu0 }
 0x1bd   : > { %v4428_v16 = vpop.f32.mrf.mxu1 }
 0x1be   : > { %v4429_v18 = vadd.f32 %v4428_v16, %v4353_v12  ;;  %v4657_v19 = vpop.f32.mrf.mxu0 }
 0x1bf   : > { %v27742_v21 = vpop.f32.mrf.mxu1 }
 0x1c0   : > { %v4507_v25 = vadd.f32 %v4506_v8, %v4429_v18  ;;  %v26160_v26 = vpop.f32.mrf.mxu0 }
 0x1c1   : > { %v4580_v27 = vpop.f32.mrf.mxu1 }
 0x1c2   : > { %v4581_v32 = vadd.f32 %v4580_v27, %v4507_v25  ;;  %v4807_v15 = vpop.f32.mrf.mxu0 }
 0x1c3   : > { %v27744_v33 = vpop.f32.mrf.mxu1 }
 0x1c4   : > { %v5031_v35 = vadd.f32 %v4581_v32, %v4097_v40  ;;  %v26170_v37 = vpop.f32.mrf.mxu0 }
 0x1c5   : > { %v4733_v31 = vpop.f32.mrf.mxu1 }
 0x1c6   : > { %v4734_v42 = vadd.f32 %v4733_v31, %v4657_v19  ;;  %v4955_v43 = vpop.f32.mrf.mxu0 }
 0x1c7   : > { %v26165_v44 = vpop.f32.mrf.mxu1 }
 0x1c8   : > { %v4808_v46 = vadd.f32 %v4807_v15, %v4734_v42  ;;  %v26180_v47 = vpop.f32.mrf.mxu0 }
 0x1c9   : > { %v4881_v48 = vpop.f32.mrf.mxu1 }
 0x1ca   : > { %v4882_v49 = vadd.f32 %v4881_v48, %v4808_v46  ;;  %v5127_v50 = vpop.f32.mrf.mxu0 }
 0x1cb   : > { %v26175_v54 = vpop.f32.mrf.mxu1 }
 0x1cc   : > { %v4956_v56 = vadd.f32 %v4955_v43, %v4882_v49  ;;  %v27746_v57 = vpop.f32.mrf.mxu0 }
 0x1cd   : > { %v5027_v59 = vpop.f32.mrf.mxu1 }
 0x1ce   : > { %v5028_v61 = vadd.f32 %v5027_v59, %v4956_v56  ;;  %v5286_v1 = vpop.f32.mrf.mxu0 }
 0x1cf   : > { %v26185_v2 = vpop.f32.mrf.mxu1 }
 0x1d0   : > { %v5033_v3 = vadd.f32 %v5028_v61, %v4099_v4  ;;  %v27748_v40 = vpop.f32.mrf.mxu0 }
 0x1d1   : > { %v5209_v5 = vpop.f32.mrf.mxu1 }
 0x1d2   : > { %v5210_v6 = vadd.f32 %v5209_v5, %v5127_v50  ;;  %v5440_v8 = vpop.f32.mrf.mxu0 }
 0x1d3   : > { %v27750_v12 = vpop.f32.mrf.mxu1 }
 0x1d4   : > { %v5287_v16 = vadd.f32 %v5286_v1, %v5210_v6  ;;  %v27752_v18 = vpop.f32.mrf.mxu0 }
 0x1d5   : > { %v5362_v19 = vpop.f32.mrf.mxu1 }
 0x1d6   : > { %v5363_v25 = vadd.f32 %v5362_v19, %v5287_v16  ;;  %v5591_v26 = vpop.f32.mrf.mxu0 }
 0x1d7   : > { %v27754_v27 = vpop.f32.mrf.mxu1 }
 0x1d8   : > { %v5441_v32 = vadd.f32 %v5440_v8, %v5363_v25  ;;  %v26190_v15 = vpop.f32.mrf.mxu0 }
 0x1d9   : > { %v5514_v37 = vpop.f32.mrf.mxu1 }
 0x1da   : > { %v5515_v31 = vadd.f32 %v5514_v37, %v5441_v32  ;;  %v5741_v4 = vpop.f32.mrf.mxu0 }
 0x1db   : > { %v27756_v42 = vpop.f32.mrf.mxu1 }
 0x1dc   : > { %v27758_v43 = vadd.f32 %v5515_v31, %v5031_v35  ;;  %v26200_v44 = vpop.f32.mrf.mxu0 }
 0x1dd   : > { %v5667_v46 = vpop.f32.mrf.mxu1 }
 0x1de   : > { %29505 = vst [vmem:[#allocation2_spill] sm:$0xff] %v27758_v43  ;;  %v5668_v47 = vadd.f32 %v5667_v46, %v5591_v26  ;;  %v5889_v48 = vpop.f32.mrf.mxu0 }
 0x1df   : > { %v26195_v49 = vpop.f32.mrf.mxu1 }
 0x1e0   : > { %v5742_v50 = vadd.f32 %v5741_v4, %v5668_v47  ;;  %v26210_v54 = vpop.f32.mrf.mxu0 }
 0x1e1   : > { %v5815_v56 = vpop.f32.mrf.mxu1 }
 0x1e2   : > { %v5816_v59 = vadd.f32 %v5815_v56, %v5742_v50  ;;  %v6061_v61 = vpop.f32.mrf.mxu0 }
 0x1e3   : > { %v26205_v1 = vpop.f32.mrf.mxu1 }
 0x1e4   : > { %v5890_v2 = vadd.f32 %v5889_v48, %v5816_v59  ;;  %v6063_v5 = vpop.f32.mrf.mxu0 }
 0x1e5   : > { %v5961_v6 = vpop.f32.mrf.mxu1 }
 0x1e6   : > { %v5962_v8 = vadd.f32 %v5961_v6, %v5890_v2  ;;  %v27760_v16 = vpop.f32.mrf.mxu0 }
 0x1e7   : > { %v26215_v19 = vpop.f32.mrf.mxu1 }
 0x1e8   : > { %v27762_v35 = vadd.f32 %v5962_v8, %v5033_v3  ;;  %v27764_v25 = vpop.f32.mrf.mxu0  ;;  %v559_v3 = vadd.f32 %v27656_v22, %v27637_v13 }
 0x1e9   : > { %v6143_v26 = vpop.f32.mrf.mxu1 }
 0x1ea   : > { %29506 = vst [vmem:[#allocation3_spill] sm:$0xff] %v27762_v35  ;;  %v27766_v32 = vpop.f32.mrf.mxu0  ;;  %v636_v59 = vadd.f32 %v27646_v17, %v559_v3 }
 0x1eb   : > { %v6145_v15 = vpop.f32.mrf.mxu1 }
 0x1ec   : > { %v27768_v37 = vpop.f32.mrf.mxu0  ;;  %v712_v19 = vadd.f32 %v27666_v29, %v636_v59  ;;  %v2410_v29 = vadd.f32 %v27714_v39, %v27710_v28 }
 0x1ed   : > { %v27770_v31 = vpop.f32.mrf.mxu1 }
 0x1ee   : > { %v27772_v4 = vpop.f32.mrf.mxu0  ;;  %v790_v22 = vadd.f32 %v27658_v24, %v712_v19  ;;  %v3344_v24 = vadd.f32 %v27726_v20, %v27722_v7  ;;  %v6144_v7 = vadd.f32 %v6143_v26, %v6061_v61 }
 0x1ef   : > { %v27774_v44 = vpop.f32.mrf.mxu1 }
 0x1f0   : > { %v26220_v46 = vpop.f32.mrf.mxu0  ;;  %v864_v17 = vadd.f32 %v27675_v36, %v790_v22  ;;  %v4278_v36 = vadd.f32 %v27738_v10, %v27734_v60  ;;  %v3421_v39 = vadd.f32 %v27724_v9, %v3344_v24  ;;  %v6146_v10 = vadd.f32 %v6145_v15, %v6063_v5 }
 0x1f1   : > { %v27776_v47 = vpop.f32.mrf.mxu1 }
 0x1f2   : > { %v27778_v48 = vpop.f32.mrf.mxu0  ;;  %v3497_v9 = vadd.f32 %v27730_v30, %v3421_v39  ;;  %v6223_v5 = vadd.f32 %v27764_v25, %v6146_v10 }
 0x1f3   : > { %v27782_v49 = vpop.f32.mrf.mxu1 }
 0x1f4   : > { %29507 = vst [vmem:[#allocation4_spill] sm:$0xff] %v27782_v49  ;;  %v26230_v50 = vpop.f32.mrf.mxu0  ;;  %v3575_v30 = vadd.f32 %v27728_v23, %v3497_v9  ;;  %v6299_v25 = vadd.f32 %v27774_v44, %v6223_v5 }
 0x1f5   : > { %v27784_v54 = vpop.f32.mrf.mxu1 }
 0x1f6   : > { %v27786_v56 = vpop.f32.mrf.mxu0  ;;  %v3649_v23 = vadd.f32 %v27732_v38, %v3575_v30 }
 0x1f7   : > { %29508 = vst [vmem:[#allocation5_spill] sm:$0xff] %v27786_v56  ;;  %v26225_v1 = vpop.f32.mrf.mxu1 }
 0x1f8   : > { %v26240_v2 = vpop.f32.mrf.mxu0 }
 0x1f9   : > { %v27789_v6 = vpop.f32.mrf.mxu1  ;;  %v1397_v2 = vadd.f32 %v27696_v51, %v864_v17 }
 0x1fa   : > { %29509 = vst [vmem:[#allocation6_spill] sm:$0xff] %v27789_v6  ;;  %v6995_v8 = vpop.f32.mrf.mxu0  ;;  %v2487_v6 = vadd.f32 %v27712_v34, %v2410_v29 }
 0x1fb   : > { %v26235_v46 = vpop.f32.mrf.mxu1 }
 0x1fc   : > { %v6997_v0 = vpop.f32.mrf.mxu0  ;;  %v2563_v34 = vadd.f32 %v27718_v45, %v2487_v6 }
 0x1fd   : > { %v27792_v35 = vpop.f32.mrf.mxu1 }
 0x1fe   : > { %29510 = vst [vmem:[#allocation7_spill] sm:$0xff] %v27792_v35  ;;  %v7154_v13 = vpop.f32.mrf.mxu0  ;;  %v1479_v35 = vadd.f32 %v27702_v62, %v1397_v2  ;;  %v5212_v62 = vadd.f32 %v27750_v12, %v27746_v57  ;;  %v4355_v2 = vadd.f32 %v27736_v53, %v4278_v36  ;;  %v6221_v12 = vadd.f32 %v27760_v16, %v6144_v7 }
 0x1ff   : > { %v26245_v50 = vpop.f32.mrf.mxu1  ;;  %v2641_v45 = vadd.f32 %v27716_v41, %v2563_v34  ;;  %v6377_v7 = vadd.f32 %v27768_v37, %v6299_v25 }
 0x200   : > { %v7156_v43 = vpop.f32.mrf.mxu0  ;;  %v1556_v28 = vadd.f32 %v27700_v58, %v1479_v35  ;;  %v5289_v35 = vadd.f32 %v27748_v40, %v5212_v62  ;;  %v4431_v53 = vadd.f32 %v27742_v21, %v4355_v2  ;;  %v6297_v16 = vadd.f32 %v27770_v31, %v6221_v12 }
 0x201   : > { %v7077_v49 = vpop.f32.mrf.mxu1  ;;  %v2715_v41 = vadd.f32 %v27720_v52, %v2641_v45 }
 0x202   : > { %v27795_v56 = vpop.f32.mrf.mxu0  ;;  %v7078_v29 = vadd.f32 %v7077_v49, %v6995_v8  ;;  %v1632_v58 = vadd.f32 %v27706_v55, %v1556_v28  ;;  %v5365_v40 = vadd.f32 %v27754_v27, %v5289_v35  ;;  %v4509_v21 = vadd.f32 %v27740_v14, %v4431_v53 }
 0x203   : > { %v7079_v3 = vpop.f32.mrf.mxu1  ;;  %v6375_v52 = vadd.f32 %v27766_v32, %v6297_v16 }
 0x204   : > { %v27798_v1 = vpop.f32.mrf.mxu0  ;;  %v7080_v61 = vadd.f32 %v7079_v3, %v6997_v0  ;;  %v7155_v15 = vadd.f32 %v7154_v13, %v7078_v29  ;;  %v1710_v55 = vadd.f32 %v27704_v63, %v1632_v58  ;;  %v5443_v27 = vadd.f32 %v27752_v18, %v5365_v40 }
 0x205   : > { %v7230_v59 = vpop.f32.mrf.mxu1  ;;  %v4583_v62 = vadd.f32 %v27744_v33, %v4509_v21  ;;  %v6449_v32 = vadd.f32 %v27776_v47, %v6375_v52 }
 0x206   : > { %v7459_v46 = vpop.f32.mrf.mxu0  ;;  %v7157_v0 = vadd.f32 %v7156_v43, %v7080_v61  ;;  %v7231_v13 = vadd.f32 %v7230_v59, %v7155_v15  ;;  %v1784_v63 = vadd.f32 %v27708_v11, %v1710_v55  ;;  %v6602_v43 = vadd.f32 %v27784_v54, %v27772_v4 }
 0x207   : > { %v7232_v19 = vpop.f32.mrf.mxu1  ;;  %v5517_v34 = vadd.f32 %v27756_v42, %v5443_v27  ;;  %v29515_v27 = vld [vmem:[#allocation7_spill] sm:$0xff] }
 0x208   : > { %v26250_v50 = vpop.f32.mrf.mxu0  ;;  %v7233_v28 = vadd.f32 %v7232_v19, %v7157_v0  ;;  %v3164_v39 = vadd.f32 %v2715_v41, %v1784_v63  ;;  %v7309_v11 = vadd.f32 %v27795_v56, %v7231_v13  ;;  %v6676_v4 = vadd.f32 %v27778_v48, %v6602_v43  ;;  %v29511_v56 = vld [vmem:[#allocation4_spill] sm:$0xff] }
 0x209   : > { %v27809_v22 = vpop.f32.mrf.mxu1  ;;  %v6451_v29 = vadd.f32 %v29511_v56, %v6377_v7 }
 0x20a   : > { %v27811_v51 = vpop.f32.mrf.mxu0  ;;  %v4098_v18 = vadd.f32 %v3649_v23, %v3164_v39  ;;  %v7311_v19 = vadd.f32 %v27798_v1, %v7233_v28  ;;  %v7383_v58 = vadd.f32 %v27809_v22, %v7309_v11  ;;  %v29513_v1 = vld [vmem:[#allocation2_spill] sm:$0xff] }
 0x20b   : > { %v27817_v17 = vpop.f32.mrf.mxu1  ;;  %v6899_v61 = vadd.f32 %v6449_v32, %v29513_v1 }
 0x20c   : > { %v26260_v20 = vpop.f32.mrf.mxu0 }
 0x20d   : > { %v7535_v60 = vpop.f32.mrf.mxu1  ;;  %v7833_v22 = vadd.f32 %v7383_v58, %v6899_v61  ;;  %v25691_v61 = vld [vmem:[%s29496_s4 + $0x8] sm:$0xff] }
 0x20e   : > { %v27821_v50 = vpop.f32.mrf.mxu0  ;;  %v7536_v44 = vadd.f32 %v7535_v60, %v7459_v46  ;;  %v5032_v60 = vadd.f32 %v4583_v62, %v4098_v18 }
 0x20f   : > { %v26255_v57 = vpop.f32.mrf.mxu1 }
 0x210   : > { %v26270_v26 = vpop.f32.mrf.mxu0  ;;  %v7610_v37 = vadd.f32 %v27811_v51, %v7536_v44  ;;  %v5966_v35 = vadd.f32 %v5517_v34, %v5032_v60  ;;  %v29512_v57 = vld [vmem:[#allocation6_spill] sm:$0xff] }
 0x211   : > { %v7683_v6 = vpop.f32.mrf.mxu1  ;;  %v6750_v47 = vadd.f32 %v29512_v57, %v6676_v4  ;;  %v7385_v26 = vadd.f32 %v27817_v17, %v7311_v19  ;;  %v29516_v4 = vld [vmem:[#allocation3_spill] sm:$0xff] }
 0x212   : > { %v7929_v49 = vpop.f32.mrf.mxu0  ;;  %v7684_v5 = vadd.f32 %v7683_v6, %v7610_v37 }
 0x213   : > { %v26265_v8 = vpop.f32.mrf.mxu1 }
 0x214   : > { %v7931_v3 = vpop.f32.mrf.mxu0  ;;  %v29514_v8 = vld [vmem:[#allocation5_spill] sm:$0xff]  ;;  %v7758_v13 = vadd.f32 %v27821_v50, %v7684_v5  ;;  %v8788_v50 = vld [vmem:[%s27866_s26] sm:$0xff] }
 0x215   : > { %v27836_v24 = vpop.f32.mrf.mxu1  ;;  %v6824_v16 = vadd.f32 %v29514_v8, %v6750_v47 }
 0x216   : > { %v8088_v36 = vpop.f32.mrf.mxu0  ;;  %v7830_v62 = vadd.f32 %v27836_v24, %v7758_v13 }
 0x217   : > { %v26275_v31 = vpop.f32.mrf.mxu1  ;;  %v6896_v43 = vadd.f32 %v29515_v27, %v6824_v16 }
 0x218   : > { %v8090_v14 = vpop.f32.mrf.mxu0 }
 0x219   : > { %v8011_v59 = vpop.f32.mrf.mxu1 }
 0x21a   : > { %v8012_v38 = vadd.f32 %v8011_v59, %v7929_v49  ;;  %v8242_v20 = vpop.f32.mrf.mxu0  ;;  %v6900_v49 = vadd.f32 %v6451_v29, %v5966_v35  ;;  %v8790_v29 = vld [vmem:[%s27866_s26 + $0x10] sm:$0xff] }
 0x21b   : > { %v8013_v54 = vpop.f32.mrf.mxu1 }
 0x21c   : > { %v8089_v2 = vadd.f32 %v8088_v36, %v8012_v38  ;;  %v8014_v33 = vadd.f32 %v8013_v54, %v7931_v3  ;;  %v8244_v46 = vpop.f32.mrf.mxu0  ;;  %v8774_v3 = vpop.permute.xlu0 %8773  ;;  %v7834_v41 = vadd.f32 %v7385_v26, %v6900_v49  ;;  %v6901_v54 = vadd.f32 %v6896_v43, %v29516_v4 }
 0x21d   : > { %v8164_v10 = vpop.f32.mrf.mxu1  ;;  %v8830_v26 = vsel %vm8828_vm0, %v25691_v61, 0 }
 0x21e   : > { %v8091_v42 = vadd.f32 %v8090_v14, %v8014_v33  ;;  %v8165_v9 = vadd.f32 %v8164_v10, %v8089_v2  ;;  %v8393_v48 = vpop.f32.mrf.mxu0  ;;  %v7835_v24 = vadd.f32 %v7830_v62, %v6901_v54 }
 0x21f   : > { %v8166_v12 = vpop.f32.mrf.mxu1 }
 0x220   : > { %v8243_v45 = vadd.f32 %v8242_v20, %v8165_v9  ;;  %v8167_v53 = vadd.f32 %v8166_v12, %v8091_v42  ;;  %v26280_v51 = vpop.f32.mrf.mxu0  ;;  %v8789_v20 = vld [vmem:[%s27866_s26 + $0x8] sm:$0xff] }
 0x221   : > { %v8316_v15 = vpop.f32.mrf.mxu1 }
 0x222   : > { %v8245_v55 = vadd.f32 %v8244_v46, %v8167_v53  ;;  %v8317_v30 = vadd.f32 %v8316_v15, %v8243_v45  ;;  %v8543_v40 = vpop.f32.mrf.mxu0  ;;  %v27939_v45 = vand.u32 4294901760, %v8830_v26 }
 0x223   : > { %v8318_v0 = vpop.f32.mrf.mxu1 }
 0x224   : > { %v8767_v21 = vadd.f32 %v8317_v30, %v7833_v22  ;;  %v8319_v25 = vadd.f32 %v8318_v0, %v8245_v55  ;;  %v26290_v17 = vpop.f32.mrf.mxu0  ;;  %v27942_v51 = vsub.f32 %v8830_v26, %v27939_v45 }
 0x225   : > { %v8469_v36 = vpop.f32.mrf.mxu1 }
 0x226   : > { %v8768_v6 = vadd.f32 %v8319_v25, %v7834_v41  ;;  %v8776_v63 = vadd.f32 %v8774_v3, %v8767_v21  ;;  %v8470_v23 = vadd.f32 %v8469_v36, %v8393_v48  ;;  %v27946_v49 = vand.u32 4294901760, %v27942_v51  ;;  %v8812_v25 = vld [vmem:[%s29496_s4] sm:$0xff] }
 0x227   : > { %v26285_v31 = vpop.f32.mrf.mxu1  ;;  %v8691_v52 = vpop.f32.mrf.mxu0  ;;  %v29517_v36 = vmov 0.0  }
 0x228   : > { %v8777_v28 = vadd.f32 %v8774_v3, %v8768_v6  ;;  %v8782_v14 = vmul.f32 0.1, %v8776_v63  ;;  %v8544_v39 = vadd.f32 %v8543_v40, %v8470_v23  ;;  %vm8779_vm11 = vcmp.ge.f32.partialorder %v8776_v63, 0.0 }
 0x229   : > { %v8617_v44 = vpop.f32.mrf.mxu1  ;;  %v26300_v59 = vpop.f32.mrf.mxu0  ;;  %v8902_v55 = vsub.f32 %v27942_v51, %v27946_v49 }
 0x22a   : > { %v8783_v7 = vmul.f32 0.1, %v8777_v28  ;;  %v8618_v11 = vadd.f32 %v8617_v44, %v8544_v39  ;;  %v8785_v38 = vsel %vm8779_vm11, %v8776_v63, %v8782_v14  ;;  %vm8780_vm12 = vcmp.ge.f32.partialorder %v8777_v28, 0.0 }
 0x22b   : > { %v26295_v18 = vpop.f32.mrf.mxu1  ;;  %v8791_v34 = vmul.f32 %v8788_v50, %v8785_v38  ;;  %v8903_v0 = vand.u32 4294901760, %v8902_v55  ;;  %v9744_v63 = vsel %vm8828_vm0, %v8812_v25, 0 }
 0x22c   : > { %v8692_v32 = vadd.f32 %v8691_v52, %v8618_v11  ;;  %v8786_v19 = vsel %vm8780_vm12, %v8777_v28, %v8783_v7  ;;  %v27961_v31 = vand.u32 4294901760, %v9744_v63 }
 0x22d   : > { %v8763_v2 = vpop.f32.mrf.mxu1  ;;  %8797 = vrot.lane.b32.xlu0 %v8791_v34, %s26902_s27  ;;  %v8792_v33 = vmul.f32 %v8789_v20, %v8786_v19  ;;  %v25692_v19 = vld [vmem:[%s29496_s4 + $0x10] sm:$0xff] }
 0x22e   : > { %v8764_v46 = vadd.f32 %v8763_v2, %v8692_v32  ;;  %v27970_v14 = vsub.f32 %v9744_v63, %v27961_v31 }
 0x22f   : > { %v26305_v60 = vpop.f32.mrf.mxu1  ;;  %8799 = vrot.lane.b32.xlu1 %v8792_v33, %s26902_s27  ;;  %v10671_v33 = vsel %vm8828_vm0, %v25692_v19, 0 }
 0x230   : > { %v8769_v37 = vadd.f32 %v8764_v46, %v7835_v24  ;;  %v27984_v44 = vand.u32 4294901760, %v27970_v14 }
 0x232   : > { %v8778_v10 = vadd.f32 %v8774_v3, %v8769_v37  ;;  %v9816_v38 = vsub.f32 %v27970_v14, %v27984_v44 }
 0x234   : > { %v8784_v56 = vmul.f32 0.1, %v8778_v10  ;;  %vm8781_vm13 = vcmp.ge.f32.partialorder %v8778_v10, 0.0  ;;  %v9817_v34 = vand.u32 4294901760, %v9816_v38 }
 0x236   : > { %v8787_v58 = vsel %vm8781_vm13, %v8778_v10, %v8784_v56  ;;  %v28031_v56 = vand.u32 4294901760, %v10671_v33 }
 0x237   : > { %v8793_v42 = vmul.f32 %v8790_v29, %v8787_v58 }
 0x239   : > { %8801 = vrot.lane.b32.xlu1 %v8793_v42, %s26902_s27 }
 0x29f   : > { %v8798_v9 = vpop.permute.xlu0 %8797 }
 0x2a0   : > { %v27883_v57 = vsel %vm8803_vm14, 0.0, %v8798_v9 }
 0x2a1   : > { %v8800_v48 = vpop.permute.xlu1 %8799  ;;  %v27977_v50 = vand.u32 4294901760, %v27883_v57 }
 0x2a2   : > { %v27878_v35 = vsel %vm8803_vm14, %v8798_v9, %v8800_v48  ;;  %v28044_v9 = vsub.f32 %v10671_v33, %v28031_v56 }
 0x2a3   : > { %8819 = vrot.lane.b32.xlu1 %v27878_v35, %s26892_s15  ;;  %v27966_v28 = vand.u32 4294901760, %v27878_v35  ;;  %v9861_v7 = vsub.f32 %v27883_v57, %v27977_v50 }
 0x2a5   : > { %v9855_v62 = vsub.f32 %v27878_v35, %v27966_v28  ;;  %v9862_v20 = vand.u32 4294901760, %v9861_v7 }
 0x2a7   : > { %8817 = vrot.lane.b32.xlu1 %v27883_v57, %s26892_s15  ;;  %v9856_v11 = vand.u32 4294901760, %v9855_v62  ;;  %v9863_v54 = vsub.f32 %v9861_v7, %v9862_v20 }
 0x2a9   : > { %v9857_v18 = vsub.f32 %v9855_v62, %v9856_v11  ;;  %v9864_v24 = vand.u32 4294901760, %v9863_v54 }
 0x2ab   : > { %v8802_v47 = vpop.permute.xlu1 %8801  ;;  %v9858_v2 = vand.u32 4294901760, %v9857_v18 }
 0x2ac   : > { %v8805_v12 = vsel %vm8803_vm14, %v8800_v48, %v8802_v47  ;;  %v28058_v47 = vand.u32 4294901760, %v28044_v9 }
 0x2ad   : > { %v27889_v1 = vsel %vm8810_vm15, %v8805_v12, 0.0 }
 0x2ae   : > { %8821 = vrot.lane.b32.xlu0 %v27889_v1, %s26892_s15  ;;  %10663 = vrot.lane.b32.xlu1 %v27889_v1, %s26893_s16  ;;  %v28011_v32 = vand.u32 4294901760, %v27889_v1  ;;  %v10743_v26 = vsub.f32 %v28044_v9, %v28058_v47 }
 0x2b0   : > { %v10319_v46 = vsub.f32 %v27889_v1, %v28011_v32 }
 0x2b2   : > { %10661 = vrot.lane.b32.xlu0 %v27878_v35, %s26893_s16  ;;  %11591 = vrot.lane.b32.xlu1 %v27878_v35, %s26894_s17  ;;  %v10320_v29 = vand.u32 4294901760, %v10319_v46 }
 0x2b6   : > { %10659 = vrot.lane.b32.xlu0 %v27883_v57, %s26893_s16  ;;  %11589 = vrot.lane.b32.xlu1 %v27883_v57, %s26894_s17 }
 0x2ba   : > { %11593 = vrot.lane.b32.xlu0 %v27889_v1, %s26894_s17  ;;  %12523 = vrot.lane.b32.xlu1 %v27889_v1, %s26895_s18 }
 0x2be   : > { %12521 = vrot.lane.b32.xlu0 %v27878_v35, %s26895_s18  ;;  %13451 = vrot.lane.b32.xlu1 %v27878_v35, %s26896_s19 }
 0x2c2   : > { %12519 = vrot.lane.b32.xlu0 %v27883_v57, %s26895_s18  ;;  %13449 = vrot.lane.b32.xlu1 %v27883_v57, %s26896_s19 }
 0x2c6   : > { %13453 = vrot.lane.b32.xlu0 %v27889_v1, %s26896_s19  ;;  %14383 = vrot.lane.b32.xlu1 %v27889_v1, %s26897_s20 }
 0x2ca   : > { %14381 = vrot.lane.b32.xlu0 %v27878_v35, %s26897_s20  ;;  %15311 = vrot.lane.b32.xlu1 %v27878_v35, %s26898_s21 }
 0x2ce   : > { %14379 = vrot.lane.b32.xlu0 %v27883_v57, %s26897_s20  ;;  %15309 = vrot.lane.b32.xlu1 %v27883_v57, %s26898_s21 }
 0x2d2   : > { %15313 = vrot.lane.b32.xlu0 %v27889_v1, %s26898_s21  ;;  %16243 = vrot.lane.b32.xlu1 %v27889_v1, %s26899_s22 }
 0x2d6   : > { %16241 = vrot.lane.b32.xlu0 %v27878_v35, %s26899_s22  ;;  %v10321_v35 = vsub.f32 %v10319_v46, %v10320_v29 }
 0x2d8   : > { %v10322_v1 = vand.u32 4294901760, %v10321_v35 }
 0x2da   : > { %16239 = vrot.lane.b32.xlu0 %v27883_v57, %s26899_s22 }
 0x315   : > { %v8820_v53 = vpop.permute.xlu1 %8819 }
 0x319   : > { %v8818_v5 = vpop.permute.xlu1 %8817 }
 0x31a   : > { %v8823_v15 = vsel %vm387_vm1, %v8818_v5, %v8820_v53 }
 0x31b   : > { %v8864_v22 = vand.u32 4294901760, %v8823_v15 }
 0x31d   : > { %v8947_v30 = vsub.f32 %v8823_v15, %v8864_v22 }
 0x31f   : > { %v8948_v3 = vand.u32 4294901760, %v8947_v30 }
 0x320   : > { %v8822_v40 = vpop.permute.xlu0 %8821  ;;  %v28024_v60 = vpop.permute.xlu1 %10663 }
 0x321   : > { %v8824_v8 = vsel %vm387_vm1, %v8820_v53, %v8822_v40  ;;  %v27951_v21 = vand.u32 4294901760, %v8822_v40  ;;  %v8949_v13 = vsub.f32 %v8947_v30, %v8948_v3  ;;  %v28083_v5 = vand.u32 4294901760, %v28024_v60 }
 0x322   : > { %v8862_v16 = vand.u32 4294901760, %v8824_v8 }
 0x323   : > { %v9405_v23 = vsub.f32 %v8822_v40, %v27951_v21  ;;  %v8950_v43 = vand.u32 4294901760, %v8949_v13 }
 0x324   : > { %8863 = vmatprep.subr.mxu0 %v8862_v16  ;;  %v8941_v41 = vsub.f32 %v8824_v8, %v8862_v16  ;;  %v10662_v4 = vpop.permute.xlu0 %10661  ;;  %v11592_v15 = vpop.permute.xlu1 %11591  ;;  %v11246_v8 = vsub.f32 %v28024_v60, %v28083_v5 }
 0x325   : > { %8865 = vmatpush1.msra.mxu0 %v8864_v22  ;;  %v9406_v52 = vand.u32 4294901760, %v9405_v23  ;;  %v10666_v37 = vsel %vm2240_vm4, %v10662_v4, %v28024_v60 }
 0x326   : > { %8904 = vmatmul.mubr.f32.vlgmr.msra.gmra.mxu0 %v8903_v0  ;;  %9024 = vmatprep.subr.mxu0 %v8941_v41  ;;  %v8942_v17 = vand.u32 4294901760, %v8941_v41  ;;  %v28036_v58 = vand.u32 4294901760, %v10666_v37 }
 0x327   : > { %9027 = vmatpush1.msra.mxu0 %v8947_v30  ;;  %9060 = vmatprep.mubr.f32.mxu0 %v29517_v36  ;;  %v9407_v39 = vsub.f32 %v9405_v23, %v9406_v52 }
 0x328   : > { %9178 = vmatprep.subr.mxu0 %v8942_v17  ;;  %v8943_v6 = vsub.f32 %v8941_v41, %v8942_v17  ;;  %v10660_v10 = vpop.permute.xlu0 %10659  ;;  %v10782_v57 = vsub.f32 %v10666_v37, %v28036_v58 }
 0x329   : > { %v9408_v59 = vand.u32 4294901760, %v9407_v39  ;;  %v10665_v42 = vsel %vm2240_vm4, %v10660_v10, %v10662_v4 }
 0x32a   : > { %9063 = vmatmul.mubr.f32.vlgmr.msra.gmra.mxu0 %v27942_v51  ;;  %v8944_v27 = vand.u32 4294901760, %v8943_v6  ;;  %v28048_v48 = vand.u32 4294901760, %v10665_v42  ;;  %v10783_v61 = vand.u32 4294901760, %v10782_v57 }
 0x32b   : > { %9182 = vmatpush1.msra.mxu0 %v8948_v3  ;;  %9215 = vmatprep.mubr.f32.mxu0 %v29517_v36 }
 0x32c   : > { %8945 = vmatprep.subr.mxu1 %v8944_v27  ;;  %26306 = vmatprep.subr.mxu0 %v29517_v36  ;;  %v10788_v12 = vsub.f32 %v10665_v42, %v28048_v48  ;;  %v10784_v53 = vsub.f32 %v10782_v57, %v10783_v61  ;;  %v28092_v30 = vpop.permute.xlu0 %11593 }
 0x32d   : > { %8951 = vmatpush1.msra.mxu1 %v8950_v43  ;;  %v11596_v3 = vsel %vm3174_vm5, %v11592_v15, %v28092_v30 }
 0x32e   : > { %8986 = vmatmul.mubr.f32.vlgmr.msra.gmra.mxu1 %v27939_v45  ;;  %9100 = vmatprep.subr.mxu1 %v8862_v16  ;;  %v10785_v55 = vand.u32 4294901760, %v10784_v53  ;;  %v28110_v17 = vand.u32 4294901760, %v11596_v3 }
 0x32f   : > { %9217 = vmatmul.mubr.f32.vlgmr.msra.gmra.mxu0 %v27939_v45  ;;  %9102 = vmatpush1.msra.mxu1 %v8864_v22 }
 0x330   : > { %26307 = vmatpush3.msra.mxu0 %v27951_v21  ;;  %9254 = vmatprep.subr.mxu1 %v8862_v16 }
 0x331   : > { %9135 = vmatprep.mubr.f32.mxu1 %v29517_v36  ;;  %26308 = vmatprep.mubr.msk.f32.mxu0 %vm26900_vm3, %v29517_v36 }
 0x332   : > { %26316 = vmatprep.subr.mxu0 %v29517_v36  ;;  %9139 = vmatmul.mubr.f32.vlgmr.msra.gmra.mxu1 %v27946_v49 }
 0x333   : > { %9256 = vmatpush1.msra.mxu1 %v8864_v22  ;;  %26309 = vmatmul.mubr.f32.vlgmr.msra.gmra.mxu0 %v8903_v0  ;;  %v25693_v22 = vld [vmem:[%s29496_s4 + $0x18] sm:$0xff]  ;;  %v11590_v0 = vpop.permute.xlu1 %11589 }
 0x334   : > { %26317 = vmatpush3.msra.mxu0 %v9405_v23  ;;  %9289 = vmatprep.mubr.f32.mxu1 %v29517_v36  ;;  %v11601_v40 = vsel %vm8828_vm0, %v25693_v22, 0  ;;  %v11595_v25 = vsel %vm3174_vm5, %v11590_v0, %v11592_v15  ;;  %v11712_v23 = vsub.f32 %v11596_v3, %v28110_v17 }
 0x335   : > { %26311 = vmatprep.subr.mxu1 %v29517_v36  ;;  %26318 = vmatprep.mubr.msk.f32.mxu0 %vm26900_vm3, %v29517_v36  ;;  %v28104_v41 = vand.u32 4294901760, %v11601_v40  ;;  %v28121_v6 = vand.u32 4294901760, %v11595_v25 }
 0x336   : > { %26326 = vmatprep.subr.mxu0 %v29517_v36  ;;  %9291 = vmatmul.mubr.f32.vlgmr.msra.gmra.mxu1 %v27939_v45 }
 0x337   : > { %26312 = vmatpush3.msra.mxu1 %v9408_v59  ;;  %26319 = vmatmul.mubr.f32.vlgmr.msra.gmra.mxu0 %v27942_v51  ;;  %v10744_v51 = vand.u32 4294901760, %v10743_v26  ;;  %v28117_v13 = vsub.f32 %v11601_v40, %v28104_v41  ;;  %v11718_v43 = vsub.f32 %v11595_v25, %v28121_v6  ;;  %v12522_v59 = vpop.permute.xlu0 %12521 }
 0x338   : > { %26327 = vmatpush3.msra.mxu0 %v9406_v52  ;;  %26313 = vmatprep.mubr.msk.f32.mxu1 %vm26900_vm3, %v29517_v36  ;;  %v11713_v52 = vand.u32 4294901760, %v11712_v23 }
 0x339   : > { %9777 = vmatprep.subr.mxu0 %v27966_v28  ;;  %26321 = vmatprep.subr.mxu1 %v29517_v36  ;;  %v28131_v27 = vand.u32 4294901760, %v28117_v13 }
 0x33a   : > { %26328 = vmatprep.mubr.msk.f32.mxu0 %vm26900_vm3, %v29517_v36  ;;  %26314 = vmatmul.mubr.f32.vlgmr.msra.gmra.mxu1 %v27939_v45  ;;  %v11714_v39 = vsub.f32 %v11712_v23, %v11713_v52 }
 0x33b   : > { %26322 = vmatpush3.msra.mxu1 %v27951_v21  ;;  %26329 = vmatmul.mubr.f32.vlgmr.msra.gmra.mxu0 %v27939_v45  ;;  %v12520_v54 = vpop.permute.xlu0 %12519 }
 0x33c   : > { %9779 = vmatpush1.msra.mxu0 %v27977_v50  ;;  %26323 = vmatprep.mubr.msk.f32.mxu1 %vm26900_vm3, %v29517_v36  ;;  %v12525_v33 = vsel %vm4108_vm6, %v12520_v54, %v12522_v59 }
 0x33d   : > { %9938 = vmatprep.subr.mxu0 %v9855_v62  ;;  %26331 = vmatprep.subr.mxu1 %v29517_v36 }
 0x33e   : > { %9812 = vmatprep.mubr.f32.mxu0 %v29517_v36  ;;  %26324 = vmatmul.mubr.f32.vlgmr.msra.gmra.mxu1 %v27946_v49 }
 0x33f   : > { %26332 = vmatpush3.msra.mxu1 %v27951_v21  ;;  %9818 = vmatmul.mubr.f32.vlgmr.msra.gmra.mxu0 %v9817_v34  ;;  %v11247_v21 = vand.u32 4294901760, %v11246_v8  ;;  %v28238_v26 = vpop.permute.xlu0 %13453 }
 0x340   : > { %9941 = vmatpush1.msra.mxu0 %v9861_v7  ;;  %9859 = vmatprep.subr.mxu1 %v9858_v2  ;;  %v25694_v7 = vld [vmem:[%s29496_s4 + $0x20] sm:$0xff] }
 0x341   : > { %10092 = vmatprep.subr.mxu0 %v9856_v11  ;;  %26333 = vmatprep.mubr.msk.f32.mxu1 %vm26900_vm3, %v29517_v36  ;;  %v11248_v63 = vsub.f32 %v11246_v8, %v11247_v21  ;;  %v11715_v11 = vand.u32 4294901760, %v11714_v39  ;;  %v12531_v38 = vsel %vm8828_vm0, %v25694_v7, 0 }
 0x342   : > { %9974 = vmatprep.mubr.f32.mxu0 %v29517_v36  ;;  %26334 = vmatmul.mubr.f32.vlgmr.msra.gmra.mxu1 %v27939_v45  ;;  %v10789_v45 = vand.u32 4294901760, %v10788_v12 }
 0x343   : > { %9865 = vmatpush1.msra.mxu1 %v9864_v24  ;;  %9977 = vmatmul.mubr.f32.vlgmr.msra.gmra.mxu0 %v27970_v14 }
 0x344   : > { %10096 = vmatpush1.msra.mxu0 %v9862_v20  ;;  %10014 = vmatprep.subr.mxu1 %v27966_v28  ;;  %v10790_v49 = vsub.f32 %v10788_v12, %v10789_v45 }
 0x345   : > { %9898 = vmatprep.mubr.f32.mxu1 %v29517_v36  ;;  %10129 = vmatprep.mubr.f32.mxu0 %v29517_v36 }
 0x346   : > { %26336 = vmatprep.subr.mxu0 %v29517_v36  ;;  %9900 = vmatmul.mubr.f32.vlgmr.msra.gmra.mxu1 %v27961_v31  ;;  %v10791_v16 = vand.u32 4294901760, %v10790_v49 }
 0x347   : > { %10016 = vmatpush1.msra.mxu1 %v27977_v50  ;;  %10131 = vmatmul.mubr.f32.vlgmr.msra.gmra.mxu0 %v27961_v31 }
 0x348   : > { %26337 = vmatpush3.msra.mxu0 %v28011_v32  ;;  %10168 = vmatprep.subr.mxu1 %v27966_v28  ;;  %v11673_v28 = vsub.f32 %v28117_v13, %v28131_v27 }
 0x349   : > { %10049 = vmatprep.mubr.f32.mxu1 %v29517_v36  ;;  %26338 = vmatprep.mubr.msk.f32.mxu0 %vm26900_vm3, %v29517_v36 }
 0x34a   : > { %26346 = vmatprep.subr.mxu0 %v29517_v36  ;;  %10053 = vmatmul.mubr.f32.vlgmr.msra.gmra.mxu1 %v27984_v44 }
 0x34b   : > { %10170 = vmatpush1.msra.mxu1 %v27977_v50  ;;  %26339 = vmatmul.mubr.f32.vlgmr.msra.gmra.mxu0 %v9817_v34  ;;  %v11674_v50 = vand.u32 4294901760, %v11673_v28  ;;  %v28170_v34 = vpop.permute.xlu1 %12523 }
 0x34c   : > { %26347 = vmatpush3.msra.mxu0 %v10319_v46  ;;  %10203 = vmatprep.mubr.f32.mxu1 %v29517_v36  ;;  %v12526_v4 = vsel %vm4108_vm6, %v12522_v59, %v28170_v34  ;;  %v28194_v46 = vand.u32 4294901760, %v12525_v33 }
 0x34d   : > { %26341 = vmatprep.subr.mxu1 %v29517_v36  ;;  %26348 = vmatprep.mubr.msk.f32.mxu0 %vm26900_vm3, %v29517_v36  ;;  %v28182_v2 = vand.u32 4294901760, %v12526_v4 }
 0x34e   : > { %26356 = vmatprep.subr.mxu0 %v29517_v36  ;;  %10205 = vmatmul.mubr.f32.vlgmr.msra.gmra.mxu1 %v27961_v31 }
 0x34f   : > { %26342 = vmatpush3.msra.mxu1 %v10322_v1  ;;  %26349 = vmatmul.mubr.f32.vlgmr.msra.gmra.mxu0 %v27970_v14  ;;  %v11719_v14 = vand.u32 4294901760, %v11718_v43  ;;  %v12642_v37 = vsub.f32 %v12526_v4, %v28182_v2  ;;  %v25695_v1 = vld [vmem:[%s29496_s4 + $0x28] sm:$0xff] }
 0x350   : > { %26357 = vmatpush3.msra.mxu0 %v10320_v29  ;;  %26343 = vmatprep.mubr.msk.f32.mxu1 %vm26900_vm3, %v29517_v36 }
 0x351   : > { %10704 = vmatprep.subr.mxu0 %v28036_v58  ;;  %26351 = vmatprep.subr.mxu1 %v29517_v36  ;;  %v11720_v62 = vsub.f32 %v11718_v43, %v11719_v14 }
 0x352   : > { %26358 = vmatprep.mubr.msk.f32.mxu0 %vm26900_vm3, %v29517_v36  ;;  %26344 = vmatmul.mubr.f32.vlgmr.msra.gmra.mxu1 %v27961_v31 }
 0x353   : > { %26352 = vmatpush3.msra.mxu1 %v28011_v32  ;;  %26359 = vmatmul.mubr.f32.vlgmr.msra.gmra.mxu0 %v27961_v31  ;;  %v11721_v18 = vand.u32 4294901760, %v11720_v62 }
 0x354   : > { %10706 = vmatpush1.msra.mxu0 %v28048_v48  ;;  %26353 = vmatprep.mubr.msk.f32.mxu1 %vm26900_vm3, %v29517_v36 }
 0x355   : > { %10865 = vmatprep.subr.mxu0 %v10782_v57  ;;  %26361 = vmatprep.subr.mxu1 %v29517_v36  ;;  %v28229_v57 = vand.u32 4294901760, %v28170_v34 }
 0x356   : > { %10739 = vmatprep.mubr.f32.mxu0 %v29517_v36  ;;  %26354 = vmatmul.mubr.f32.vlgmr.msra.gmra.mxu1 %v27984_v44  ;;  %v28156_v44 = vand.u32 4294901760, %v28092_v30 }
 0x357   : > { %26362 = vmatpush3.msra.mxu1 %v28011_v32  ;;  %10745 = vmatmul.mubr.f32.vlgmr.msra.gmra.mxu0 %v10744_v51  ;;  %v28177_v32 = vand.u32 4294901760, %v12531_v38  ;;  %v13106_v53 = vsub.f32 %v28170_v34, %v28229_v57 }
 0x358   : > { %10868 = vmatpush1.msra.mxu0 %v10788_v12  ;;  %10786 = vmatprep.subr.mxu1 %v10785_v55  ;;  %v12176_v20 = vsub.f32 %v28092_v30, %v28156_v44 }
 0x359   : > { %11019 = vmatprep.subr.mxu0 %v10783_v61  ;;  %26363 = vmatprep.mubr.msk.f32.mxu1 %vm26900_vm3, %v29517_v36  ;;  %v28190_v24 = vsub.f32 %v12531_v38, %v28177_v32  ;;  %v13107_v22 = vand.u32 4294901760, %v13106_v53 }
 0x35a   : > { %10901 = vmatprep.mubr.f32.mxu0 %v29517_v36  ;;  %26364 = vmatmul.mubr.f32.vlgmr.msra.gmra.mxu1 %v27961_v31  ;;  %v11249_v31 = vand.u32 4294901760, %v11248_v63  ;;  %v12177_v19 = vand.u32 4294901760, %v12176_v20 }
 0x35b   : > { %10792 = vmatpush1.msra.mxu1 %v10791_v16  ;;  %10904 = vmatmul.mubr.f32.vlgmr.msra.gmra.mxu0 %v28044_v9  ;;  %v28204_v10 = vand.u32 4294901760, %v28190_v24  ;;  %v13108_v16 = vsub.f32 %v13106_v53, %v13107_v22 }
 0x35c   : > { %11023 = vmatpush1.msra.mxu0 %v10789_v45  ;;  %10941 = vmatprep.subr.mxu1 %v28036_v58  ;;  %v12178_v60 = vsub.f32 %v12176_v20, %v12177_v19  ;;  %v13461_v45 = vsel %vm8828_vm0, %v25695_v1, 0 }
 0x35d   : > { %10825 = vmatprep.mubr.f32.mxu1 %v29517_v36  ;;  %11056 = vmatprep.mubr.f32.mxu0 %v29517_v36  ;;  %v12603_v42 = vsub.f32 %v28190_v24, %v28204_v10  ;;  %v28250_v49 = vand.u32 4294901760, %v13461_v45 }
 0x35e   : > { %26366 = vmatprep.subr.mxu0 %v29517_v36  ;;  %10827 = vmatmul.mubr.f32.vlgmr.msra.gmra.mxu1 %v28031_v56  ;;  %v12179_v29 = vand.u32 4294901760, %v12178_v60 }
 0x35f   : > { %10943 = vmatpush1.msra.mxu1 %v28048_v48  ;;  %11058 = vmatmul.mubr.f32.vlgmr.msra.gmra.mxu0 %v28031_v56  ;;  %v12604_v35 = vand.u32 4294901760, %v12603_v42  ;;  %v28263_v40 = vsub.f32 %v13461_v45, %v28250_v49 }
 0x360   : > { %26367 = vmatpush3.msra.mxu0 %v28083_v5  ;;  %11095 = vmatprep.subr.mxu1 %v28036_v58  ;;  %v12643_v58 = vand.u32 4294901760, %v12642_v37 }
 0x361   : > { %10976 = vmatprep.mubr.f32.mxu1 %v29517_v36  ;;  %26368 = vmatprep.mubr.msk.f32.mxu0 %vm26900_vm3, %v29517_v36  ;;  %v28277_v3 = vand.u32 4294901760, %v28263_v40 }
 0x362   : > { %26376 = vmatprep.subr.mxu0 %v29517_v36  ;;  %10980 = vmatmul.mubr.f32.vlgmr.msra.gmra.mxu1 %v28058_v47 }
 0x363   : > { %11097 = vmatpush1.msra.mxu1 %v28048_v48  ;;  %26369 = vmatmul.mubr.f32.vlgmr.msra.gmra.mxu0 %v10744_v51  ;;  %v12644_v48 = vsub.f32 %v12642_v37, %v12643_v58 }
 0x364   : > { %26377 = vmatpush3.msra.mxu0 %v11246_v8  ;;  %11130 = vmatprep.mubr.f32.mxu1 %v29517_v36 }
 0x365   : > { %26371 = vmatprep.subr.mxu1 %v29517_v36  ;;  %26378 = vmatprep.mubr.msk.f32.mxu0 %vm26900_vm3, %v29517_v36  ;;  %v12645_v61 = vand.u32 4294901760, %v12644_v48 }
 0x366   : > { %26386 = vmatprep.subr.mxu0 %v29517_v36  ;;  %11132 = vmatmul.mubr.f32.vlgmr.msra.gmra.mxu1 %v28031_v56 }
 0x367   : > { %26372 = vmatpush3.msra.mxu1 %v11249_v31  ;;  %26379 = vmatmul.mubr.f32.vlgmr.msra.gmra.mxu0 %v28044_v9  ;;  %v25696_v31 = vld [vmem:[%s29496_s4 + $0x30] sm:$0xff] }
 0x368   : > { %26387 = vmatpush3.msra.mxu0 %v11247_v21  ;;  %26373 = vmatprep.mubr.msk.f32.mxu1 %vm26900_vm3, %v29517_v36  ;;  %v13109_v21 = vand.u32 4294901760, %v13108_v16  ;;  %v14391_v28 = vsel %vm8828_vm0, %v25696_v31, 0 }
 0x369   : > { %11634 = vmatprep.subr.mxu0 %v28110_v17  ;;  %26381 = vmatprep.subr.mxu1 %v29517_v36  ;;  %v28323_v59 = vand.u32 4294901760, %v14391_v28 }
 0x36a   : > { %26388 = vmatprep.mubr.msk.f32.mxu0 %vm26900_vm3, %v29517_v36  ;;  %26374 = vmatmul.mubr.f32.vlgmr.msra.gmra.mxu1 %v28031_v56 }
 0x36b   : > { %26382 = vmatpush3.msra.mxu1 %v28083_v5  ;;  %26389 = vmatmul.mubr.f32.vlgmr.msra.gmra.mxu0 %v28031_v56 }
 0x36c   : > { %11636 = vmatpush1.msra.mxu0 %v28121_v6  ;;  %26383 = vmatprep.mubr.msk.f32.mxu1 %vm26900_vm3, %v29517_v36 }
 0x36d   : > { %11795 = vmatprep.subr.mxu0 %v11712_v23  ;;  %26391 = vmatprep.subr.mxu1 %v29517_v36 }
 0x36e   : > { %11669 = vmatprep.mubr.f32.mxu0 %v29517_v36  ;;  %26384 = vmatmul.mubr.f32.vlgmr.msra.gmra.mxu1 %v28058_v47  ;;  %v13452_v47 = vpop.permute.xlu1 %13451 }
 0x36f   : > { %26392 = vmatpush3.msra.mxu1 %v28083_v5  ;;  %11675 = vmatmul.mubr.f32.vlgmr.msra.gmra.mxu0 %v11674_v50  ;;  %v13456_v15 = vsel %vm5042_vm7, %v13452_v47, %v28238_v26 }
 0x370   : > { %11798 = vmatpush1.msra.mxu0 %v11718_v43  ;;  %11716 = vmatprep.subr.mxu1 %v11715_v11  ;;  %v28256_v30 = vand.u32 4294901760, %v13456_v15  ;;  %v14382_v43 = vpop.permute.xlu0 %14381 }
 0x371   : > { %11949 = vmatprep.subr.mxu0 %v11713_v52  ;;  %26393 = vmatprep.mubr.msk.f32.mxu1 %vm26900_vm3, %v29517_v36 }
 0x372   : > { %11831 = vmatprep.mubr.f32.mxu0 %v29517_v36  ;;  %26394 = vmatmul.mubr.f32.vlgmr.msra.gmra.mxu1 %v28031_v56  ;;  %v12648_v56 = vsub.f32 %v12525_v33, %v28194_v46  ;;  %v13450_v5 = vpop.permute.xlu1 %13449  ;;  %v13572_v0 = vsub.f32 %v13456_v15, %v28256_v30 }
 0x373   : > { %11722 = vmatpush1.msra.mxu1 %v11721_v18  ;;  %11834 = vmatmul.mubr.f32.vlgmr.msra.gmra.mxu0 %v28117_v13  ;;  %v13455_v55 = vsel %vm5042_vm7, %v13450_v5, %v13452_v47 }
 0x374   : > { %11953 = vmatpush1.msra.mxu0 %v11719_v14  ;;  %11871 = vmatprep.subr.mxu1 %v28110_v17  ;;  %v12649_v9 = vand.u32 4294901760, %v12648_v56  ;;  %v28267_v8 = vand.u32 4294901760, %v13455_v55  ;;  %v13573_v25 = vand.u32 4294901760, %v13572_v0 }
 0x375   : > { %11755 = vmatprep.mubr.f32.mxu1 %v29517_v36  ;;  %11986 = vmatprep.mubr.f32.mxu0 %v29517_v36 }
 0x376   : > { %26396 = vmatprep.subr.mxu0 %v29517_v36  ;;  %11757 = vmatmul.mubr.f32.vlgmr.msra.gmra.mxu1 %v28104_v41  ;;  %v12650_v12 = vsub.f32 %v12648_v56, %v12649_v9 }
 0x377   : > { %11873 = vmatpush1.msra.mxu1 %v28121_v6  ;;  %11988 = vmatmul.mubr.f32.vlgmr.msra.gmra.mxu0 %v28104_v41 }
 0x378   : > { %26397 = vmatpush3.msra.mxu0 %v28156_v44  ;;  %12025 = vmatprep.subr.mxu1 %v28110_v17  ;;  %v12651_v51 = vand.u32 4294901760, %v12650_v12  ;;  %v13533_v17 = vsub.f32 %v28263_v40, %v28277_v3 }
 0x379   : > { %11906 = vmatprep.mubr.f32.mxu1 %v29517_v36  ;;  %26398 = vmatprep.mubr.msk.f32.mxu0 %vm26900_vm3, %v29517_v36 }
 0x37a   : > { %26406 = vmatprep.subr.mxu0 %v29517_v36  ;;  %11910 = vmatmul.mubr.f32.vlgmr.msra.gmra.mxu1 %v28131_v27  ;;  %v13534_v63 = vand.u32 4294901760, %v13533_v17 }
 0x37b   : > { %12027 = vmatpush1.msra.mxu1 %v28121_v6  ;;  %26399 = vmatmul.mubr.f32.vlgmr.msra.gmra.mxu0 %v11674_v50  ;;  %v13574_v6 = vsub.f32 %v13572_v0, %v13573_v25  ;;  %v28316_v50 = vpop.permute.xlu1 %14383 }
 0x37c   : > { %26407 = vmatpush3.msra.mxu0 %v12176_v20  ;;  %12060 = vmatprep.mubr.f32.mxu1 %v29517_v36  ;;  %v14386_v62 = vsel %vm5976_vm8, %v14382_v43, %v28316_v50  ;;  %v28336_v20 = vsub.f32 %v14391_v28, %v28323_v59 }
 0x37d   : > { %26401 = vmatprep.subr.mxu1 %v29517_v36  ;;  %26408 = vmatprep.mubr.msk.f32.mxu0 %vm26900_vm3, %v29517_v36  ;;  %v13575_v52 = vand.u32 4294901760, %v13574_v6  ;;  %v28328_v11 = vand.u32 4294901760, %v14386_v62 }
 0x37e   : > { %26416 = vmatprep.subr.mxu0 %v29517_v36  ;;  %12062 = vmatmul.mubr.f32.vlgmr.msra.gmra.mxu1 %v28104_v41  ;;  %v28350_v54 = vand.u32 4294901760, %v28336_v20 }
 0x37f   : > { %26402 = vmatpush3.msra.mxu1 %v12179_v29  ;;  %26409 = vmatmul.mubr.f32.vlgmr.msra.gmra.mxu0 %v28117_v13  ;;  %v14502_v4 = vsub.f32 %v14386_v62, %v28328_v11  ;;  %v25697_v29 = vld [vmem:[%s29496_s4 + $0x38] sm:$0xff] }
 0x380   : > { %26417 = vmatpush3.msra.mxu0 %v12177_v19  ;;  %26403 = vmatprep.mubr.msk.f32.mxu1 %vm26900_vm3, %v29517_v36  ;;  %v14463_v33 = vsub.f32 %v28336_v20, %v28350_v54 }
 0x381   : > { %12564 = vmatprep.subr.mxu0 %v28182_v2  ;;  %26411 = vmatprep.subr.mxu1 %v29517_v36 }
 0x382   : > { %26418 = vmatprep.mubr.msk.f32.mxu0 %vm26900_vm3, %v29517_v36  ;;  %26404 = vmatmul.mubr.f32.vlgmr.msra.gmra.mxu1 %v28104_v41  ;;  %v14464_v60 = vand.u32 4294901760, %v14463_v33 }
 0x383   : > { %26412 = vmatpush3.msra.mxu1 %v28156_v44  ;;  %26419 = vmatmul.mubr.f32.vlgmr.msra.gmra.mxu0 %v28104_v41 }
 0x384   : > { %12566 = vmatpush1.msra.mxu0 %v28194_v46  ;;  %26413 = vmatprep.mubr.msk.f32.mxu1 %vm26900_vm3, %v29517_v36 }
 0x385   : > { %12725 = vmatprep.subr.mxu0 %v12642_v37  ;;  %26421 = vmatprep.subr.mxu1 %v29517_v36  ;;  %v28375_v37 = vand.u32 4294901760, %v28316_v50 }
 0x386   : > { %12599 = vmatprep.mubr.f32.mxu0 %v29517_v36  ;;  %26414 = vmatmul.mubr.f32.vlgmr.msra.gmra.mxu1 %v28131_v27  ;;  %v28302_v27 = vand.u32 4294901760, %v28238_v26 }
 0x387   : > { %26422 = vmatpush3.msra.mxu1 %v28156_v44  ;;  %12605 = vmatmul.mubr.f32.vlgmr.msra.gmra.mxu0 %v12604_v35  ;;  %v14380_v44 = vpop.permute.xlu0 %14379  ;;  %v14966_v48 = vsub.f32 %v28316_v50, %v28375_v37 }
 0x388   : > { %12728 = vmatpush1.msra.mxu0 %v12648_v56  ;;  %12646 = vmatprep.subr.mxu1 %v12645_v61  ;;  %v14036_v14 = vsub.f32 %v28238_v26, %v28302_v27  ;;  %v14385_v38 = vsel %vm5976_vm8, %v14380_v44, %v14382_v43 }
 0x389   : > { %12879 = vmatprep.subr.mxu0 %v12643_v58  ;;  %26423 = vmatprep.mubr.msk.f32.mxu1 %vm26900_vm3, %v29517_v36  ;;  %v28340_v18 = vand.u32 4294901760, %v14385_v38  ;;  %v14967_v1 = vand.u32 4294901760, %v14966_v48 }
 0x38a   : > { %12761 = vmatprep.mubr.f32.mxu0 %v29517_v36  ;;  %26424 = vmatmul.mubr.f32.vlgmr.msra.gmra.mxu1 %v28104_v41  ;;  %v13578_v41 = vsub.f32 %v13455_v55, %v28267_v8  ;;  %v14037_v7 = vand.u32 4294901760, %v14036_v14 }
 0x38b   : > { %12652 = vmatpush1.msra.mxu1 %v12651_v51  ;;  %12764 = vmatmul.mubr.f32.vlgmr.msra.gmra.mxu0 %v28190_v24  ;;  %v28384_v42 = vpop.permute.xlu0 %15313  ;;  %v14968_v51 = vsub.f32 %v14966_v48, %v14967_v1 }
 0x38c   : > { %12883 = vmatpush1.msra.mxu0 %v12649_v9  ;;  %12801 = vmatprep.subr.mxu1 %v28182_v2  ;;  %v13579_v13 = vand.u32 4294901760, %v13578_v41  ;;  %v14038_v34 = vsub.f32 %v14036_v14, %v14037_v7  ;;  %v15321_v9 = vsel %vm8828_vm0, %v25697_v29, 0 }
 0x38d   : > { %12685 = vmatprep.mubr.f32.mxu1 %v29517_v36  ;;  %12916 = vmatprep.mubr.f32.mxu0 %v29517_v36  ;;  %v28396_v12 = vand.u32 4294901760, %v15321_v9 }
 0x38e   : > { %26426 = vmatprep.subr.mxu0 %v29517_v36  ;;  %12687 = vmatmul.mubr.f32.vlgmr.msra.gmra.mxu1 %v28177_v32  ;;  %v13580_v23 = vsub.f32 %v13578_v41, %v13579_v13  ;;  %v14039_v19 = vand.u32 4294901760, %v14038_v34 }
 0x38f   : > { %12803 = vmatpush1.msra.mxu1 %v28194_v46  ;;  %12918 = vmatmul.mubr.f32.vlgmr.msra.gmra.mxu0 %v28177_v32  ;;  %v28409_v45 = vsub.f32 %v15321_v9, %v28396_v12 }
 0x390   : > { %26427 = vmatpush3.msra.mxu0 %v28229_v57  ;;  %12955 = vmatprep.subr.mxu1 %v28182_v2  ;;  %v13581_v39 = vand.u32 4294901760, %v13580_v23  ;;  %v14503_v2 = vand.u32 4294901760, %v14502_v4 }
 0x391   : > { %12836 = vmatprep.mubr.f32.mxu1 %v29517_v36  ;;  %26428 = vmatprep.mubr.msk.f32.mxu0 %vm26900_vm3, %v29517_v36  ;;  %v28423_v15 = vand.u32 4294901760, %v28409_v45 }
 0x392   : > { %26436 = vmatprep.subr.mxu0 %v29517_v36  ;;  %12840 = vmatmul.mubr.f32.vlgmr.msra.gmra.mxu1 %v28204_v10 }
 0x393   : > { %12957 = vmatpush1.msra.mxu1 %v28194_v46  ;;  %26429 = vmatmul.mubr.f32.vlgmr.msra.gmra.mxu0 %v12604_v35  ;;  %v14504_v46 = vsub.f32 %v14502_v4, %v14503_v2 }
 0x394   : > { %26437 = vmatpush3.msra.mxu0 %v13106_v53  ;;  %12990 = vmatprep.mubr.f32.mxu1 %v29517_v36 }
 0x395   : > { %26431 = vmatprep.subr.mxu1 %v29517_v36  ;;  %26438 = vmatprep.mubr.msk.f32.mxu0 %vm26900_vm3, %v29517_v36  ;;  %v14505_v58 = vand.u32 4294901760, %v14504_v46 }
 0x396   : > { %26446 = vmatprep.subr.mxu0 %v29517_v36  ;;  %12992 = vmatmul.mubr.f32.vlgmr.msra.gmra.mxu1 %v28177_v32 }
 0x397   : > { %26432 = vmatpush3.msra.mxu1 %v13109_v21  ;;  %26439 = vmatmul.mubr.f32.vlgmr.msra.gmra.mxu0 %v28190_v24  ;;  %v25698_v21 = vld [vmem:[%s29496_s4 + $0x40] sm:$0xff] }
 0x398   : > { %26447 = vmatpush3.msra.mxu0 %v13107_v22  ;;  %26433 = vmatprep.mubr.msk.f32.mxu1 %vm26900_vm3, %v29517_v36  ;;  %v14969_v22 = vand.u32 4294901760, %v14968_v51  ;;  %v16251_v17 = vsel %vm8828_vm0, %v25698_v21, 0 }
 0x399   : > { %13494 = vmatprep.subr.mxu0 %v28256_v30  ;;  %26441 = vmatprep.subr.mxu1 %v29517_v36  ;;  %v28469_v43 = vand.u32 4294901760, %v16251_v17 }
 0x39a   : > { %26448 = vmatprep.mubr.msk.f32.mxu0 %vm26900_vm3, %v29517_v36  ;;  %26434 = vmatmul.mubr.f32.vlgmr.msra.gmra.mxu1 %v28177_v32 }
 0x39b   : > { %26442 = vmatpush3.msra.mxu1 %v28229_v57  ;;  %26449 = vmatmul.mubr.f32.vlgmr.msra.gmra.mxu0 %v28177_v32 }
 0x39c   : > { %13496 = vmatpush1.msra.mxu0 %v28267_v8  ;;  %26443 = vmatprep.mubr.msk.f32.mxu1 %vm26900_vm3, %v29517_v36 }
 0x39d   : > { %13655 = vmatprep.subr.mxu0 %v13572_v0  ;;  %26451 = vmatprep.subr.mxu1 %v29517_v36 }
 0x39e   : > { %13529 = vmatprep.mubr.f32.mxu0 %v29517_v36  ;;  %26444 = vmatmul.mubr.f32.vlgmr.msra.gmra.mxu1 %v28204_v10  ;;  %v15312_v10 = vpop.permute.xlu1 %15311 }
 0x39f   : > { %26452 = vmatpush3.msra.mxu1 %v28229_v57  ;;  %13535 = vmatmul.mubr.f32.vlgmr.msra.gmra.mxu0 %v13534_v63  ;;  %v15316_v47 = vsel %vm6910_vm9, %v15312_v10, %v28384_v42 }
 0x3a0   : > { %13658 = vmatpush1.msra.mxu0 %v13578_v41  ;;  %13576 = vmatprep.subr.mxu1 %v13575_v52  ;;  %v28402_v26 = vand.u32 4294901760, %v15316_v47  ;;  %v16242_v41 = vpop.permute.xlu0 %16241 }
 0x3a1   : > { %13809 = vmatprep.subr.mxu0 %v13573_v25  ;;  %26453 = vmatprep.mubr.msk.f32.mxu1 %vm26900_vm3, %v29517_v36 }
 0x3a2   : > { %13691 = vmatprep.mubr.f32.mxu0 %v29517_v36  ;;  %26454 = vmatmul.mubr.f32.vlgmr.msra.gmra.mxu1 %v28177_v32  ;;  %v14508_v32 = vsub.f32 %v14385_v38, %v28340_v18  ;;  %v15310_v57 = vpop.permute.xlu1 %15309  ;;  %v15432_v5 = vsub.f32 %v15316_v47, %v28402_v26 }
 0x3a3   : > { %13582 = vmatpush1.msra.mxu1 %v13581_v39  ;;  %13694 = vmatmul.mubr.f32.vlgmr.msra.gmra.mxu0 %v28263_v40  ;;  %v15315_v61 = vsel %vm6910_vm9, %v15310_v57, %v15312_v10 }
 0x3a4   : > { %13813 = vmatpush1.msra.mxu0 %v13579_v13  ;;  %13731 = vmatprep.subr.mxu1 %v28256_v30  ;;  %v14509_v24 = vand.u32 4294901760, %v14508_v32  ;;  %v28413_v53 = vand.u32 4294901760, %v15315_v61  ;;  %v15433_v55 = vand.u32 4294901760, %v15432_v5 }
 0x3a5   : > { %13615 = vmatprep.mubr.f32.mxu1 %v29517_v36  ;;  %13846 = vmatprep.mubr.f32.mxu0 %v29517_v36 }
 0x3a6   : > { %26456 = vmatprep.subr.mxu0 %v29517_v36  ;;  %13617 = vmatmul.mubr.f32.vlgmr.msra.gmra.mxu1 %v28250_v49  ;;  %v14510_v56 = vsub.f32 %v14508_v32, %v14509_v24 }
 0x3a7   : > { %13733 = vmatpush1.msra.mxu1 %v28267_v8  ;;  %13848 = vmatmul.mubr.f32.vlgmr.msra.gmra.mxu0 %v28250_v49 }
 0x3a8   : > { %26457 = vmatpush3.msra.mxu0 %v28302_v27  ;;  %13885 = vmatprep.subr.mxu1 %v28256_v30  ;;  %v14511_v35 = vand.u32 4294901760, %v14510_v56  ;;  %v15393_v30 = vsub.f32 %v28409_v45, %v28423_v15 }
 0x3a9   : > { %13766 = vmatprep.mubr.f32.mxu1 %v29517_v36  ;;  %26458 = vmatprep.mubr.msk.f32.mxu0 %vm26900_vm3, %v29517_v36 }
 0x3aa   : > { %26466 = vmatprep.subr.mxu0 %v29517_v36  ;;  %13770 = vmatmul.mubr.f32.vlgmr.msra.gmra.mxu1 %v28277_v3  ;;  %v15394_v16 = vand.u32 4294901760, %v15393_v30 }
 0x3ab   : > { %13887 = vmatpush1.msra.mxu1 %v28267_v8  ;;  %26459 = vmatmul.mubr.f32.vlgmr.msra.gmra.mxu0 %v13534_v63  ;;  %v15434_v8 = vsub.f32 %v15432_v5, %v15433_v55  ;;  %v28462_v63 = vpop.permute.xlu1 %16243 }
 0x3ac   : > { %26467 = vmatpush3.msra.mxu0 %v14036_v14  ;;  %13920 = vmatprep.mubr.f32.mxu1 %v29517_v36  ;;  %v16246_v23 = vsel %vm7844_vm10, %v16242_v41, %v28462_v63  ;;  %v28482_v14 = vsub.f32 %v16251_v17, %v28469_v43 }
 0x3ad   : > { %26461 = vmatprep.subr.mxu1 %v29517_v36  ;;  %26468 = vmatprep.mubr.msk.f32.mxu0 %vm26900_vm3, %v29517_v36  ;;  %v15435_v25 = vand.u32 4294901760, %v15434_v8  ;;  %v28474_v52 = vand.u32 4294901760, %v16246_v23 }
 0x3ae   : > { %26476 = vmatprep.subr.mxu0 %v29517_v36  ;;  %13922 = vmatmul.mubr.f32.vlgmr.msra.gmra.mxu1 %v28250_v49  ;;  %v28496_v44 = vand.u32 4294901760, %v28482_v14 }
 0x3af   : > { %26462 = vmatpush3.msra.mxu1 %v14039_v19  ;;  %26469 = vmatmul.mubr.f32.vlgmr.msra.gmra.mxu0 %v28263_v40  ;;  %v16362_v62 = vsub.f32 %v16246_v23, %v28474_v52 }
 0x3b0   : > { %26477 = vmatpush3.msra.mxu0 %v14037_v7  ;;  %26463 = vmatprep.mubr.msk.f32.mxu1 %vm26900_vm3, %v29517_v36  ;;  %v16323_v38 = vsub.f32 %v28482_v14, %v28496_v44 }
 0x3b1   : > { %14424 = vmatprep.subr.mxu0 %v28328_v11  ;;  %26471 = vmatprep.subr.mxu1 %v29517_v36 }
 0x3b2   : > { %26478 = vmatprep.mubr.msk.f32.mxu0 %vm26900_vm3, %v29517_v36  ;;  %26464 = vmatmul.mubr.f32.vlgmr.msra.gmra.mxu1 %v28250_v49  ;;  %v16324_v34 = vand.u32 4294901760, %v16323_v38 }
 0x3b3   : > { %26472 = vmatpush3.msra.mxu1 %v28302_v27  ;;  %26479 = vmatmul.mubr.f32.vlgmr.msra.gmra.mxu0 %v28250_v49 }
 0x3b4   : > { %14426 = vmatpush1.msra.mxu0 %v28340_v18  ;;  %26473 = vmatprep.mubr.msk.f32.mxu1 %vm26900_vm3, %v29517_v36 }
 0x3b5   : > { %14585 = vmatprep.subr.mxu0 %v14502_v4  ;;  %26481 = vmatprep.subr.mxu1 %v29517_v36  ;;  %v28521_v4 = vand.u32 4294901760, %v28462_v63 }
 0x3b6   : > { %14459 = vmatprep.mubr.f32.mxu0 %v29517_v36  ;;  %26474 = vmatmul.mubr.f32.vlgmr.msra.gmra.mxu1 %v28277_v3  ;;  %v28448_v3 = vand.u32 4294901760, %v28384_v42 }
 0x3b7   : > { %26482 = vmatpush3.msra.mxu1 %v28302_v27  ;;  %14465 = vmatmul.mubr.f32.vlgmr.msra.gmra.mxu0 %v14464_v60  ;;  %v16240_v27 = vpop.permute.xlu0 %16239  ;;  %v16826_v33 = vsub.f32 %v28462_v63, %v28521_v4 }
 0x3b8   : > { %14588 = vmatpush1.msra.mxu0 %v14508_v32  ;;  %14506 = vmatprep.subr.mxu1 %v14505_v58  ;;  %v15896_v13 = vsub.f32 %v28384_v42, %v28448_v3  ;;  %v16245_v28 = vsel %vm7844_vm10, %v16240_v27, %v16242_v41 }
 0x3b9   : > { %14739 = vmatprep.subr.mxu0 %v14503_v2  ;;  %26483 = vmatprep.mubr.msk.f32.mxu1 %vm26900_vm3, %v29517_v36  ;;  %v28486_v39 = vand.u32 4294901760, %v16245_v28 }
 0x3ba   : > { %14621 = vmatprep.mubr.f32.mxu0 %v29517_v36  ;;  %26484 = vmatmul.mubr.f32.vlgmr.msra.gmra.mxu1 %v28250_v49  ;;  %v15438_v49 = vsub.f32 %v15315_v61, %v28413_v53  ;;  %v15897_v31 = vand.u32 4294901760, %v15896_v13 }
 0x3bb   : > { %14512 = vmatpush1.msra.mxu1 %v14511_v35  ;;  %14624 = vmatmul.mubr.f32.vlgmr.msra.gmra.mxu0 %v28336_v20 }
 0x3bc   : > { %14743 = vmatpush1.msra.mxu0 %v14509_v24  ;;  %14661 = vmatprep.subr.mxu1 %v28328_v11  ;;  %v15439_v40 = vand.u32 4294901760, %v15438_v49  ;;  %v15898_v50 = vsub.f32 %v15896_v13, %v15897_v31 }
 0x3bd   : > { %14545 = vmatprep.mubr.f32.mxu1 %v29517_v36  ;;  %14776 = vmatprep.mubr.f32.mxu0 %v29517_v36 }
 0x3be   : > { %26486 = vmatprep.subr.mxu0 %v29517_v36  ;;  %14547 = vmatmul.mubr.f32.vlgmr.msra.gmra.mxu1 %v28323_v59  ;;  %v15440_v0 = vsub.f32 %v15438_v49, %v15439_v40  ;;  %v15899_v7 = vand.u32 4294901760, %v15898_v50 }
 0x3bf   : > { %14663 = vmatpush1.msra.mxu1 %v28340_v18  ;;  %14778 = vmatmul.mubr.f32.vlgmr.msra.gmra.mxu0 %v28323_v59 }
 0x3c0   : > { %26487 = vmatpush3.msra.mxu0 %v28375_v37  ;;  %14815 = vmatprep.subr.mxu1 %v28328_v11  ;;  %v15441_v6 = vand.u32 4294901760, %v15440_v0  ;;  %v16363_v11 = vand.u32 4294901760, %v16362_v62 }
 0x3c1   : > { %14696 = vmatprep.mubr.f32.mxu1 %v29517_v36  ;;  %26488 = vmatprep.mubr.msk.f32.mxu0 %vm26900_vm3, %v29517_v36 }
 0x3c2   : > { %26496 = vmatprep.subr.mxu0 %v29517_v36  ;;  %14700 = vmatmul.mubr.f32.vlgmr.msra.gmra.mxu1 %v28350_v54 }
 0x3c3   : > { %14817 = vmatpush1.msra.mxu1 %v28340_v18  ;;  %26489 = vmatmul.mubr.f32.vlgmr.msra.gmra.mxu0 %v14464_v60  ;;  %v16364_v18 = vsub.f32 %v16362_v62, %v16363_v11 }
 0x3c4   : > { %26497 = vmatpush3.msra.mxu0 %v14966_v48  ;;  %14850 = vmatprep.mubr.f32.mxu1 %v29517_v36 }
 0x3c5   : > { %26491 = vmatprep.subr.mxu1 %v29517_v36  ;;  %26498 = vmatprep.mubr.msk.f32.mxu0 %vm26900_vm3, %v29517_v36  ;;  %v16365_v19 = vand.u32 4294901760, %v16364_v18 }
 0x3c6   : > { %26506 = vmatprep.subr.mxu0 %v29517_v36  ;;  %14852 = vmatmul.mubr.f32.vlgmr.msra.gmra.mxu1 %v28323_v59 }
 0x3c7   : > { %26492 = vmatpush3.msra.mxu1 %v14969_v22  ;;  %26499 = vmatmul.mubr.f32.vlgmr.msra.gmra.mxu0 %v28336_v20 }
 0x3c8   : > { %26507 = vmatpush3.msra.mxu0 %v14967_v1  ;;  %26493 = vmatprep.mubr.msk.f32.mxu1 %vm26900_vm3, %v29517_v36 }
 0x3c9   : > { %15354 = vmatprep.subr.mxu0 %v28402_v26  ;;  %26501 = vmatprep.subr.mxu1 %v29517_v36 }
 0x3ca   : > { %26508 = vmatprep.mubr.msk.f32.mxu0 %vm26900_vm3, %v29517_v36  ;;  %26494 = vmatmul.mubr.f32.vlgmr.msra.gmra.mxu1 %v28323_v59 }
 0x3cb   : > { %26502 = vmatpush3.msra.mxu1 %v28375_v37  ;;  %26509 = vmatmul.mubr.f32.vlgmr.msra.gmra.mxu0 %v28323_v59 }
 0x3cc   : > { %15356 = vmatpush1.msra.mxu0 %v28413_v53  ;;  %26503 = vmatprep.mubr.msk.f32.mxu1 %vm26900_vm3, %v29517_v36 }
 0x3cd   : > { %15515 = vmatprep.subr.mxu0 %v15432_v5  ;;  %26511 = vmatprep.subr.mxu1 %v29517_v36  ;;  %v17167_v5 = vld [vmem:[%s29497_s5] sm:$0xff] }
 0x3ce   : > { %15389 = vmatprep.mubr.f32.mxu0 %v29517_v36  ;;  %26504 = vmatmul.mubr.f32.vlgmr.msra.gmra.mxu1 %v28350_v54 }
 0x3cf   : > { %26512 = vmatpush3.msra.mxu1 %v28375_v37  ;;  %15395 = vmatmul.mubr.f32.vlgmr.msra.gmra.mxu0 %v15394_v16  ;;  %v16827_v37 = vand.u32 4294901760, %v16826_v33 }
 0x3d0   : > { %15518 = vmatpush1.msra.mxu0 %v15438_v49  ;;  %15436 = vmatprep.subr.mxu1 %v15435_v25 }
 0x3d1   : > { %15669 = vmatprep.subr.mxu0 %v15433_v55  ;;  %26513 = vmatprep.mubr.msk.f32.mxu1 %vm26900_vm3, %v29517_v36  ;;  %v16828_v48 = vsub.f32 %v16826_v33, %v16827_v37 }
 0x3d2   : > { %15551 = vmatprep.mubr.f32.mxu0 %v29517_v36  ;;  %26514 = vmatmul.mubr.f32.vlgmr.msra.gmra.mxu1 %v28323_v59  ;;  %v16368_v59 = vsub.f32 %v16245_v28, %v28486_v39 }
 0x3d3   : > { %15442 = vmatpush1.msra.mxu1 %v15441_v6  ;;  %15554 = vmatmul.mubr.f32.vlgmr.msra.gmra.mxu0 %v28409_v45 }
 0x3d4   : > { %15673 = vmatpush1.msra.mxu0 %v15439_v40  ;;  %15591 = vmatprep.subr.mxu1 %v28402_v26  ;;  %v16369_v20 = vand.u32 4294901760, %v16368_v59 }
 0x3d5   : > { %15475 = vmatprep.mubr.f32.mxu1 %v29517_v36  ;;  %15706 = vmatprep.mubr.f32.mxu0 %v29517_v36 }
 0x3d6   : > { %26516 = vmatprep.subr.mxu0 %v29517_v36  ;;  %15477 = vmatmul.mubr.f32.vlgmr.msra.gmra.mxu1 %v28396_v12  ;;  %v16370_v54 = vsub.f32 %v16368_v59, %v16369_v20 }
 0x3d7   : > { %15593 = vmatpush1.msra.mxu1 %v28413_v53  ;;  %15708 = vmatmul.mubr.f32.vlgmr.msra.gmra.mxu0 %v28396_v12 }
 0x3d8   : > { %26517 = vmatpush3.msra.mxu0 %v28448_v3  ;;  %15745 = vmatprep.subr.mxu1 %v28402_v26  ;;  %v16371_v24 = vand.u32 4294901760, %v16370_v54  ;;  %v16829_v26 = vand.u32 4294901760, %v16828_v48 }
 0x3d9   : > { %15626 = vmatprep.mubr.f32.mxu1 %v29517_v36  ;;  %26518 = vmatprep.mubr.msk.f32.mxu0 %vm26900_vm3, %v29517_v36 }
 0x3da   : > { %26526 = vmatprep.subr.mxu0 %v29517_v36  ;;  %15630 = vmatmul.mubr.f32.vlgmr.msra.gmra.mxu1 %v28423_v15 }
 0x3db   : > { %15747 = vmatpush1.msra.mxu1 %v28413_v53  ;;  %26519 = vmatmul.mubr.f32.vlgmr.msra.gmra.mxu0 %v15394_v16 }
 0x3dc   : > { %26527 = vmatpush3.msra.mxu0 %v15896_v13  ;;  %15780 = vmatprep.mubr.f32.mxu1 %v29517_v36 }
 0x3dd   : > { %26521 = vmatprep.subr.mxu1 %v29517_v36  ;;  %26528 = vmatprep.mubr.msk.f32.mxu0 %vm26900_vm3, %v29517_v36 }
 0x3de   : > { %26536 = vmatprep.subr.mxu0 %v29517_v36  ;;  %15782 = vmatmul.mubr.f32.vlgmr.msra.gmra.mxu1 %v28396_v12 }
 0x3df   : > { %26522 = vmatpush3.msra.mxu1 %v15899_v7  ;;  %26529 = vmatmul.mubr.f32.vlgmr.msra.gmra.mxu0 %v28409_v45 }
 0x3e0   : > { %26537 = vmatpush3.msra.mxu0 %v15897_v31  ;;  %26523 = vmatprep.mubr.msk.f32.mxu1 %vm26900_vm3, %v29517_v36 }
 0x3e1   : > { %16284 = vmatprep.subr.mxu0 %v28474_v52  ;;  %26531 = vmatprep.subr.mxu1 %v29517_v36 }
 0x3e2   : > { %26538 = vmatprep.mubr.msk.f32.mxu0 %vm26900_vm3, %v29517_v36  ;;  %26524 = vmatmul.mubr.f32.vlgmr.msra.gmra.mxu1 %v28396_v12 }
 0x3e3   : > { %26532 = vmatpush3.msra.mxu1 %v28448_v3  ;;  %26539 = vmatmul.mubr.f32.vlgmr.msra.gmra.mxu0 %v28396_v12 }
 0x3e4   : > { %16286 = vmatpush1.msra.mxu0 %v28486_v39  ;;  %26533 = vmatprep.mubr.msk.f32.mxu1 %vm26900_vm3, %v29517_v36 }
 0x3e5   : > { %16445 = vmatprep.subr.mxu0 %v16362_v62  ;;  %26541 = vmatprep.subr.mxu1 %v29517_v36 }
 0x3e6   : > { %16319 = vmatprep.mubr.f32.mxu0 %v29517_v36  ;;  %v8905_v32 = vpop.f32.mrf.mxu0  ;;  %26534 = vmatmul.mubr.f32.vlgmr.msra.gmra.mxu1 %v28423_v15 }
 0x3e7   : > { %26542 = vmatpush3.msra.mxu1 %v28448_v3  ;;  %16325 = vmatmul.mubr.f32.vlgmr.msra.gmra.mxu0 %v16324_v34 }
 0x3e8   : > { %16448 = vmatpush1.msra.mxu0 %v16368_v59  ;;  %16366 = vmatprep.subr.mxu1 %v16365_v19  ;;  %v28527_v2 = vpop.f32.mrf.mxu0 }
 0x3e9   : > { %16599 = vmatprep.subr.mxu0 %v16363_v11  ;;  %26543 = vmatprep.mubr.msk.f32.mxu1 %vm26900_vm3, %v29517_v36 }
 0x3ea   : > { %16481 = vmatprep.mubr.f32.mxu0 %v29517_v36  ;;  %v9064_v46 = vpop.f32.mrf.mxu0  ;;  %26544 = vmatmul.mubr.f32.vlgmr.msra.gmra.mxu1 %v28396_v12 }
 0x3eb   : > { %16372 = vmatpush1.msra.mxu1 %v16371_v24  ;;  %16484 = vmatmul.mubr.f32.vlgmr.msra.gmra.mxu0 %v28482_v14 }
 0x3ec   : > { %16603 = vmatpush1.msra.mxu0 %v16369_v20  ;;  %16521 = vmatprep.subr.mxu1 %v28474_v52  ;;  %v28537_v60 = vpop.f32.mrf.mxu0 }
 0x3ed   : > { %16405 = vmatprep.mubr.f32.mxu1 %v29517_v36  ;;  %16636 = vmatprep.mubr.f32.mxu0 %v29517_v36 }
 0x3ee   : > { %26546 = vmatprep.subr.mxu0 %v29517_v36  ;;  %v8987_v10 = vpop.f32.mrf.mxu1  ;;  %16407 = vmatmul.mubr.f32.vlgmr.msra.gmra.mxu1 %v28469_v43 }
 0x3ef   : > { %v8988_v56 = vadd.f32 %v8987_v10, %v8905_v32  ;;  %v9218_v29 = vpop.f32.mrf.mxu0  ;;  %16523 = vmatpush1.msra.mxu1 %v28486_v39  ;;  %16638 = vmatmul.mubr.f32.vlgmr.msra.gmra.mxu0 %v28469_v43 }
 0x3f0   : > { %26547 = vmatpush3.msra.mxu0 %v28521_v4  ;;  %16675 = vmatprep.subr.mxu1 %v28474_v52  ;;  %v28547_v58 = vpop.f32.mrf.mxu1 }
 0x3f1   : > { %v28549_v42 = vpop.f32.mrf.mxu0  ;;  %16556 = vmatprep.mubr.f32.mxu1 %v29517_v36  ;;  %26548 = vmatprep.mubr.msk.f32.mxu0 %vm26900_vm3, %v29517_v36  ;;  %v9065_v9 = vadd.f32 %v9064_v46, %v8988_v56 }
 0x3f2   : > { %26556 = vmatprep.subr.mxu0 %v29517_v36  ;;  %v9140_v35 = vpop.f32.mrf.mxu1  ;;  %16560 = vmatmul.mubr.f32.vlgmr.msra.gmra.mxu1 %v28496_v44 }
 0x3f3   : > { %v9141_v57 = vadd.f32 %v9140_v35, %v9065_v9  ;;  %v9369_v47 = vpop.f32.mrf.mxu0  ;;  %16677 = vmatpush1.msra.mxu1 %v28486_v39  ;;  %26549 = vmatmul.mubr.f32.vlgmr.msra.gmra.mxu0 %v16324_v34 }
 0x3f4   : > { %26557 = vmatpush3.msra.mxu0 %v16826_v33  ;;  %v28557_v12 = vpop.f32.mrf.mxu1  ;;  %16710 = vmatprep.mubr.f32.mxu1 %v29517_v36 }
 0x3f5   : > { %v26310_v1 = vpop.f32.mrf.mxu0  ;;  %26551 = vmatprep.subr.mxu1 %v29517_v36  ;;  %26558 = vmatprep.mubr.msk.f32.mxu0 %vm26900_vm3, %v29517_v36  ;;  %v9219_v61 = vadd.f32 %v9218_v29, %v9141_v57 }
 0x3f6   : > { %26566 = vmatprep.subr.mxu0 %v29517_v36  ;;  %v9292_v45 = vpop.f32.mrf.mxu1  ;;  %16712 = vmatmul.mubr.f32.vlgmr.msra.gmra.mxu1 %v28469_v43 }
 0x3f7   : > { %v9293_v53 = vadd.f32 %v9292_v45, %v9219_v61  ;;  %v9519_v51 = vpop.f32.mrf.mxu0  ;;  %26552 = vmatpush3.msra.mxu1 %v16829_v26  ;;  %26559 = vmatmul.mubr.f32.vlgmr.msra.gmra.mxu0 %v28482_v14 }
 0x3f8   : > { %26567 = vmatpush3.msra.mxu0 %v16827_v37  ;;  %v28569_v15 = vpop.f32.mrf.mxu1  ;;  %26553 = vmatprep.mubr.msk.f32.mxu1 %vm26900_vm3, %v29517_v36 }
 0x3f9   : > { %v26320_v49 = vpop.f32.mrf.mxu0  ;;  %26561 = vmatprep.subr.mxu1 %v29517_v36  ;;  %26568 = vmatprep.mubr.msk.f32.mxu0 %vm26900_vm3, %v29517_v36 }
 0x3fa   : > { %v9445_v22 = vpop.f32.mrf.mxu1  ;;  %26554 = vmatmul.mubr.f32.vlgmr.msra.gmra.mxu1 %v28469_v43  ;;  %17170 = vperm.xlu1 %26869, %v17167_v5  }
 0x3fb   : > { %v9446_v55 = vadd.f32 %v9445_v22, %v9369_v47  ;;  %v9667_v30 = vpop.f32.mrf.mxu0  ;;  %26562 = vmatpush3.msra.mxu1 %v28521_v4  ;;  %26563 = vmatprep.mubr.msk.f32.mxu1 %vm26900_vm3, %v29517_v36 }
 0x3fc   : > { %v26315_v40 = vpop.f32.mrf.mxu1  ;;  %26571 = vmatprep.subr.mxu1 %v29517_v36  ;;  %26569 = vmatmul.mubr.f32.vlgmr.msra.gmra.mxu0 %v28469_v43 }
 0x3fd   : > { %v26330_v8 = vpop.f32.mrf.mxu0  ;;  %v9520_v16 = vadd.f32 %v9519_v51, %v9446_v55  ;;  %17292 = vmatprep.mubr.f32.mxu0 %v29517_v36 }
 0x3fe   : > { %v9593_v0 = vpop.f32.mrf.mxu1  ;;  %26564 = vmatmul.mubr.f32.vlgmr.msra.gmra.mxu1 %v28496_v44 }
 0x3ff   : > { %v9594_v3 = vadd.f32 %v9593_v0, %v9520_v16  ;;  %v9819_v41 = vpop.f32.mrf.mxu0  ;;  %26572 = vmatpush3.msra.mxu1 %v28521_v4  ;;  %26573 = vmatprep.mubr.msk.f32.mxu1 %vm26900_vm3, %v29517_v36 }
 0x400   : > { %v9820_v21 = vadd.f32 %v9819_v41, %v9293_v53  ;;  %v26325_v25 = vpop.f32.mrf.mxu1 }
 0x401   : > { %v28587_v17 = vpop.f32.mrf.mxu0  ;;  %v9668_v13 = vadd.f32 %v9667_v30, %v9594_v3 }
 0x402   : > { %v9739_v6 = vpop.f32.mrf.mxu1  ;;  %26574 = vmatmul.mubr.f32.vlgmr.msra.gmra.mxu1 %v28469_v43 }
 0x403   : > { %v9740_v63 = vadd.f32 %v9739_v6, %v9668_v13  ;;  %v9978_v23 = vpop.f32.mrf.mxu0  ;;  %17378 = vmatprep.mubr.f32.mxu1 %v29517_v36 }
 0x404   : > { %v26335_v27 = vpop.f32.mrf.mxu1 }
 0x405   : > { %v28591_v31 = vpop.f32.mrf.mxu0 }
 0x406   : > { %v9901_v52 = vpop.f32.mrf.mxu1 }
 0x407   : > { %v9902_v28 = vadd.f32 %v9901_v52, %v9820_v21  ;;  %v10132_v14 = vpop.f32.mrf.mxu0 }
 0x408   : > { %v28593_v39 = vpop.f32.mrf.mxu1 }
 0x409   : > { %v28595_v50 = vpop.f32.mrf.mxu0  ;;  %v9979_v62 = vadd.f32 %v9978_v23, %v9902_v28 }
 0x40a   : > { %v10054_v44 = vpop.f32.mrf.mxu1 }
 0x40b   : > { %v10055_v59 = vadd.f32 %v10054_v44, %v9979_v62  ;;  %v10283_v7 = vpop.f32.mrf.mxu0 }
 0x40c   : > { %v10284_v11 = vadd.f32 %v10283_v7, %v9740_v63  ;;  %v28597_v43 = vpop.f32.mrf.mxu1 }
 0x40d   : > { %v10133_v38 = vadd.f32 %v10132_v14, %v10055_v59  ;;  %v26340_v20 = vpop.f32.mrf.mxu0 }
 0x40e   : > { %v10206_v18 = vpop.f32.mrf.mxu1 }
 0x40f   : > { %v10207_v34 = vadd.f32 %v10206_v18, %v10133_v38  ;;  %v10433_v4 = vpop.f32.mrf.mxu0 }
 0x410   : > { %v28599_v54 = vpop.f32.mrf.mxu1 }
 0x411   : > { %v26350_v32 = vpop.f32.mrf.mxu0 }
 0x412   : > { %v10359_v19 = vpop.f32.mrf.mxu1 }
 0x413   : > { %v10360_v33 = vadd.f32 %v10359_v19, %v10284_v11  ;;  %v10581_v24 = vpop.f32.mrf.mxu0 }
 0x414   : > { %v26345_v46 = vpop.f32.mrf.mxu1 }
 0x415   : > { %v10434_v37 = vadd.f32 %v10433_v4, %v10360_v33  ;;  %v26360_v10 = vpop.f32.mrf.mxu0 }
 0x416   : > { %v10507_v56 = vpop.f32.mrf.mxu1 }
 0x417   : > { %v10508_v29 = vadd.f32 %v10507_v56, %v10434_v37  ;;  %v10746_v9 = vpop.f32.mrf.mxu0 }
 0x418   : > { %v26355_v48 = vpop.f32.mrf.mxu1 }
 0x419   : > { %v10582_v35 = vadd.f32 %v10581_v24, %v10508_v29  ;;  %v28601_v57 = vpop.f32.mrf.mxu0 }
 0x41a   : > { %v10653_v47 = vpop.f32.mrf.mxu1 }
 0x41b   : > { %v10654_v1 = vadd.f32 %v10653_v47, %v10582_v35  ;;  %v10905_v61 = vpop.f32.mrf.mxu0 }
 0x41c   : > { %v26365_v26 = vpop.f32.mrf.mxu1 }
 0x41d   : > { %v28603_v45 = vpop.f32.mrf.mxu0 }
 0x41e   : > { %v10828_v53 = vpop.f32.mrf.mxu1 }
 0x41f   : > { %v10829_v51 = vadd.f32 %v10828_v53, %v10746_v9  ;;  %v11059_v5 = vpop.f32.mrf.mxu0 }
 0x420   : > { %v28605_v49 = vpop.f32.mrf.mxu1 }
 0x421   : > { %v10906_v22 = vadd.f32 %v10905_v61, %v10829_v51  ;;  %v28607_v55 = vpop.f32.mrf.mxu0 }
 0x422   : > { %v10981_v30 = vpop.f32.mrf.mxu1 }
 0x423   : > { %v10982_v40 = vadd.f32 %v10981_v30, %v10906_v22  ;;  %v11210_v8 = vpop.f32.mrf.mxu0 }
 0x424   : > { %v28609_v16 = vpop.f32.mrf.mxu1 }
 0x425   : > { %v11060_v0 = vadd.f32 %v11059_v5, %v10982_v40  ;;  %v26370_v3 = vpop.f32.mrf.mxu0 }
 0x426   : > { %v11133_v41 = vpop.f32.mrf.mxu1 }
 0x427   : > { %v11134_v21 = vadd.f32 %v11133_v41, %v11060_v0  ;;  %v11360_v25 = vpop.f32.mrf.mxu0 }
 0x428   : > { %v28611_v13 = vpop.f32.mrf.mxu1 }
 0x429   : > { %v11584_v6 = vadd.f32 %v11134_v21, %v10207_v34  ;;  %v26380_v63 = vpop.f32.mrf.mxu0 }
 0x42a   : > { %v11286_v23 = vpop.f32.mrf.mxu1 }
 0x42b   : > { %v11287_v27 = vadd.f32 %v11286_v23, %v11210_v8  ;;  %v11508_v52 = vpop.f32.mrf.mxu0 }
 0x42c   : > { %v26375_v28 = vpop.f32.mrf.mxu1 }
 0x42d   : > { %v11361_v14 = vadd.f32 %v11360_v25, %v11287_v27  ;;  %v26390_v62 = vpop.f32.mrf.mxu0 }
 0x42e   : > { %v11434_v44 = vpop.f32.mrf.mxu1 }
 0x42f   : > { %v11435_v59 = vadd.f32 %v11434_v44, %v11361_v14  ;;  %v11676_v7 = vpop.f32.mrf.mxu0 }
 0x430   : > { %v26385_v11 = vpop.f32.mrf.mxu1 }
 0x431   : > { %v11509_v38 = vadd.f32 %v11508_v52, %v11435_v59  ;;  %v28613_v20 = vpop.f32.mrf.mxu0 }
 0x432   : > { %v11580_v18 = vpop.f32.mrf.mxu1 }
 0x433   : > { %v11581_v4 = vadd.f32 %v11580_v18, %v11509_v38  ;;  %v11835_v32 = vpop.f32.mrf.mxu0 }
 0x434   : > { %v26395_v19 = vpop.f32.mrf.mxu1 }
 0x435   : > { %v11586_v33 = vadd.f32 %v11581_v4, %v10654_v1  ;;  %v28615_v34 = vpop.f32.mrf.mxu0 }
 0x436   : > { %v11758_v24 = vpop.f32.mrf.mxu1 }
 0x437   : > { %v11759_v46 = vadd.f32 %v11758_v24, %v11676_v7  ;;  %v11989_v37 = vpop.f32.mrf.mxu0 }
 0x438   : > { %v28617_v10 = vpop.f32.mrf.mxu1 }
 0x439   : > { %v11836_v56 = vadd.f32 %v11835_v32, %v11759_v46  ;;  %v28619_v29 = vpop.f32.mrf.mxu0 }
 0x43a   : > { %v11911_v9 = vpop.f32.mrf.mxu1 }
 0x43b   : > { %v11912_v48 = vadd.f32 %v11911_v9, %v11836_v56  ;;  %v12140_v35 = vpop.f32.mrf.mxu0 }
 0x43c   : > { %v28621_v47 = vpop.f32.mrf.mxu1 }
 0x43d   : > { %v11990_v61 = vadd.f32 %v11989_v37, %v11912_v48  ;;  %v26400_v26 = vpop.f32.mrf.mxu0 }
 0x43e   : > { %v12063_v53 = vpop.f32.mrf.mxu1 }
 0x43f   : > { %v12064_v51 = vadd.f32 %v12063_v53, %v11990_v61  ;;  %v12290_v1 = vpop.f32.mrf.mxu0 }
 0x440   : > { %v28623_v5 = vpop.f32.mrf.mxu1 }
 0x441   : > { %v12514_v22 = vadd.f32 %v12064_v51, %v11584_v6  ;;  %v26410_v30 = vpop.f32.mrf.mxu0 }
 0x442   : > { %v12216_v40 = vpop.f32.mrf.mxu1 }
 0x443   : > { %v12217_v8 = vadd.f32 %v12216_v40, %v12140_v35  ;;  %v12438_v0 = vpop.f32.mrf.mxu0 }
 0x444   : > { %v26405_v3 = vpop.f32.mrf.mxu1 }
 0x445   : > { %v12291_v41 = vadd.f32 %v12290_v1, %v12217_v8  ;;  %v26420_v21 = vpop.f32.mrf.mxu0 }
 0x446   : > { %v12364_v25 = vpop.f32.mrf.mxu1 }
 0x447   : > { %v12365_v63 = vadd.f32 %v12364_v25, %v12291_v41  ;;  %v12606_v23 = vpop.f32.mrf.mxu0 }
 0x448   : > { %v26415_v27 = vpop.f32.mrf.mxu1 }
 0x449   : > { %v12439_v52 = vadd.f32 %v12438_v0, %v12365_v63  ;;  %v28625_v28 = vpop.f32.mrf.mxu0 }
 0x44a   : > { %v12510_v14 = vpop.f32.mrf.mxu1 }
 0x44b   : > { %v12511_v62 = vadd.f32 %v12510_v14, %v12439_v52  ;;  %v12765_v44 = vpop.f32.mrf.mxu0 }
 0x44c   : > { %v26425_v59 = vpop.f32.mrf.mxu1 }
 0x44d   : > { %v12516_v7 = vadd.f32 %v12511_v62, %v11586_v33  ;;  %v28627_v6 = vpop.f32.mrf.mxu0 }
 0x44e   : > { %v12688_v11 = vpop.f32.mrf.mxu1 }
 0x44f   : > { %v12689_v38 = vadd.f32 %v12688_v11, %v12606_v23  ;;  %v12919_v18 = vpop.f32.mrf.mxu0 }
 0x450   : > { %v28629_v4 = vpop.f32.mrf.mxu1 }
 0x451   : > { %v12766_v32 = vadd.f32 %v12765_v44, %v12689_v38  ;;  %v28631_v19 = vpop.f32.mrf.mxu0 }
 0x452   : > { %v12841_v24 = vpop.f32.mrf.mxu1 }
 0x453   : > { %v12842_v46 = vadd.f32 %v12841_v24, %v12766_v32  ;;  %v13070_v37 = vpop.f32.mrf.mxu0 }
 0x454   : > { %v28633_v56 = vpop.f32.mrf.mxu1 }
 0x455   : > { %v12920_v9 = vadd.f32 %v12919_v18, %v12842_v46  ;;  %v26430_v48 = vpop.f32.mrf.mxu0 }
 0x456   : > { %v12993_v35 = vpop.f32.mrf.mxu1 }
 0x457   : > { %v12994_v61 = vadd.f32 %v12993_v35, %v12920_v9  ;;  %v13220_v33 = vpop.f32.mrf.mxu0 }
 0x458   : > { %v28635_v26 = vpop.f32.mrf.mxu1 }
 0x459   : > { %v13444_v53 = vadd.f32 %v12994_v61, %v12514_v22  ;;  %v26440_v51 = vpop.f32.mrf.mxu0 }
 0x45a   : > { %v13146_v1 = vpop.f32.mrf.mxu1 }
 0x45b   : > { %v13147_v30 = vadd.f32 %v13146_v1, %v13070_v37  ;;  %v13368_v40 = vpop.f32.mrf.mxu0 }
 0x45c   : > { %v26435_v8 = vpop.f32.mrf.mxu1 }
 0x45d   : > { %v13221_v0 = vadd.f32 %v13220_v33, %v13147_v30  ;;  %v26450_v3 = vpop.f32.mrf.mxu0 }
 0x45e   : > { %v13294_v41 = vpop.f32.mrf.mxu1 }
 0x45f   : > { %v13295_v21 = vadd.f32 %v13294_v41, %v13221_v0  ;;  %v13536_v25 = vpop.f32.mrf.mxu0 }
 0x460   : > { %v26445_v63 = vpop.f32.mrf.mxu1 }
 0x461   : > { %v13369_v23 = vadd.f32 %v13368_v40, %v13295_v21  ;;  %v28637_v27 = vpop.f32.mrf.mxu0 }
 0x462   : > { %v13440_v52 = vpop.f32.mrf.mxu1 }
 0x463   : > { %v13441_v14 = vadd.f32 %v13440_v52, %v13369_v23  ;;  %v13695_v62 = vpop.f32.mrf.mxu0 }
 0x464   : > { %v26455_v44 = vpop.f32.mrf.mxu1 }
 0x465   : > { %v13446_v59 = vadd.f32 %v13441_v14, %v12516_v7  ;;  %v28639_v22 = vpop.f32.mrf.mxu0 }
 0x466   : > { %v13618_v11 = vpop.f32.mrf.mxu1 }
 0x467   : > { %v13619_v38 = vadd.f32 %v13618_v11, %v13536_v25  ;;  %v13849_v18 = vpop.f32.mrf.mxu0 }
 0x468   : > { %v28641_v32 = vpop.f32.mrf.mxu1 }
 0x469   : > { %v13696_v24 = vadd.f32 %v13695_v62, %v13619_v38  ;;  %v28643_v46 = vpop.f32.mrf.mxu0 }
 0x46a   : > { %v13771_v37 = vpop.f32.mrf.mxu1 }
 0x46b   : > { %v13772_v9 = vadd.f32 %v13771_v37, %v13696_v24  ;;  %v14000_v48 = vpop.f32.mrf.mxu0 }
 0x46c   : > { %v28645_v35 = vpop.f32.mrf.mxu1 }
 0x46d   : > { %v13850_v61 = vadd.f32 %v13849_v18, %v13772_v9  ;;  %v26460_v33 = vpop.f32.mrf.mxu0 }
 0x46e   : > { %v13923_v51 = vpop.f32.mrf.mxu1 }
 0x46f   : > { %v13924_v1 = vadd.f32 %v13923_v51, %v13850_v61  ;;  %v14150_v7 = vpop.f32.mrf.mxu0 }
 0x470   : > { %v28647_v30 = vpop.f32.mrf.mxu1 }
 0x471   : > { %v28649_v40 = vadd.f32 %v13924_v1, %v13444_v53  ;;  %v26470_v8 = vpop.f32.mrf.mxu0 }
 0x472   : > { %v14076_v0 = vpop.f32.mrf.mxu1 }
 0x473   : > { %29518 = vst [vmem:[#allocation4_spill] sm:$0xff] %v28649_v40  ;;  %v14077_v3 = vadd.f32 %v14076_v0, %v14000_v48  ;;  %v14298_v41 = vpop.f32.mrf.mxu0 }
 0x474   : > { %v26465_v21 = vpop.f32.mrf.mxu1 }
 0x475   : > { %v14151_v25 = vadd.f32 %v14150_v7, %v14077_v3  ;;  %v26480_v63 = vpop.f32.mrf.mxu0 }
 0x476   : > { %v14224_v23 = vpop.f32.mrf.mxu1 }
 0x477   : > { %v14225_v52 = vadd.f32 %v14224_v23, %v14151_v25  ;;  %v14466_v14 = vpop.f32.mrf.mxu0 }
 0x478   : > { %v26475_v62 = vpop.f32.mrf.mxu1 }
 0x479   : > { %v14299_v44 = vadd.f32 %v14298_v41, %v14225_v52  ;;  %v14468_v11 = vpop.f32.mrf.mxu0 }
 0x47a   : > { %v14370_v38 = vpop.f32.mrf.mxu1 }
 0x47b   : > { %v14371_v18 = vadd.f32 %v14370_v38, %v14299_v44  ;;  %v28651_v24 = vpop.f32.mrf.mxu0 }
 0x47c   : > { %v26485_v37 = vpop.f32.mrf.mxu1 }
 0x47d   : > { %v28653_v53 = vadd.f32 %v14371_v18, %v13446_v59  ;;  %v28655_v9 = vpop.f32.mrf.mxu0  ;;  %v8990_v59 = vadd.f32 %v28547_v58, %v28527_v2 }
 0x47e   : > { %v14548_v48 = vpop.f32.mrf.mxu1 }
 0x47f   : > { %29519 = vst [vmem:[#allocation6_spill] sm:$0xff] %v28653_v53  ;;  %v28657_v61 = vpop.f32.mrf.mxu0  ;;  %v9067_v52 = vadd.f32 %v28537_v60, %v8990_v59 }
 0x480   : > { %v14550_v33 = vpop.f32.mrf.mxu1 }
 0x481   : > { %v28659_v51 = vpop.f32.mrf.mxu0  ;;  %v9143_v37 = vadd.f32 %v28557_v12, %v9067_v52  ;;  %v10831_v12 = vadd.f32 %v28605_v49, %v28601_v57 }
 0x482   : > { %v28661_v1 = vpop.f32.mrf.mxu1 }
 0x483   : > { %v28663_v7 = vpop.f32.mrf.mxu0  ;;  %v9221_v58 = vadd.f32 %v28549_v42, %v9143_v37  ;;  %v11761_v42 = vadd.f32 %v28617_v10, %v28613_v20 }
 0x484   : > { %v28665_v8 = vpop.f32.mrf.mxu1 }
 0x485   : > { %v26490_v0 = vpop.f32.mrf.mxu0  ;;  %v9295_v60 = vadd.f32 %v28569_v15, %v9221_v58  ;;  %v12691_v15 = vadd.f32 %v28629_v4, %v28625_v28  ;;  %v11838_v49 = vadd.f32 %v28615_v34, %v11761_v42  ;;  %v14551_v4 = vadd.f32 %v14550_v33, %v14468_v11 }
 0x486   : > { %v28667_v3 = vpop.f32.mrf.mxu1 }
 0x487   : > { %v28669_v41 = vpop.f32.mrf.mxu0  ;;  %v11914_v34 = vadd.f32 %v28621_v47, %v11838_v49  ;;  %v14628_v11 = vadd.f32 %v28655_v9, %v14551_v4 }
 0x488   : > { %v28673_v21 = vpop.f32.mrf.mxu1 }
 0x489   : > { %29520 = vst [vmem:[#allocation2_spill] sm:$0xff] %v28673_v21  ;;  %v26500_v25 = vpop.f32.mrf.mxu0  ;;  %v11992_v47 = vadd.f32 %v28619_v29, %v11914_v34  ;;  %v14704_v9 = vadd.f32 %v28665_v8, %v14628_v11 }
 0x48a   : > { %v28675_v63 = vpop.f32.mrf.mxu1 }
 0x48b   : > { %v28677_v23 = vpop.f32.mrf.mxu0  ;;  %v12066_v29 = vadd.f32 %v28623_v5, %v11992_v47 }
 0x48c   : > { %29521 = vst [vmem:[#allocation5_spill] sm:$0xff] %v28677_v23  ;;  %v26495_v62 = vpop.f32.mrf.mxu1 }
 0x48d   : > { %v26510_v44 = vpop.f32.mrf.mxu0 }
 0x48e   : > { %v28680_v38 = vpop.f32.mrf.mxu1  ;;  %v9822_v44 = vadd.f32 %v28587_v17, %v9295_v60  ;;  %v14549_v60 = vadd.f32 %v14548_v48, %v14466_v14 }
 0x48f   : > { %29522 = vst [vmem:[#allocation7_spill] sm:$0xff] %v28680_v38  ;;  %v15396_v18 = vpop.f32.mrf.mxu0  ;;  %v10908_v38 = vadd.f32 %v28603_v45, %v10831_v12 }
 0x490   : > { %v26505_v0 = vpop.f32.mrf.mxu1 }
 0x491   : > { %v15398_v36 = vpop.f32.mrf.mxu0  ;;  %v10984_v45 = vadd.f32 %v28609_v16, %v10908_v38 }
 0x492   : > { %v28683_v53 = vpop.f32.mrf.mxu1 }
 0x493   : > { %29523 = vst [vmem:[#allocation3_spill] sm:$0xff] %v28683_v53  ;;  %v15555_v2 = vpop.f32.mrf.mxu0  ;;  %v9904_v53 = vadd.f32 %v28593_v39, %v9822_v44  ;;  %v13621_v39 = vadd.f32 %v28641_v32, %v28637_v27  ;;  %v12768_v44 = vadd.f32 %v28627_v6, %v12691_v15  ;;  %v14626_v27 = vadd.f32 %v28651_v24, %v14549_v60 }
 0x494   : > { %v26515_v25 = vpop.f32.mrf.mxu1  ;;  %v11062_v16 = vadd.f32 %v28607_v55, %v10984_v45  ;;  %v14782_v60 = vadd.f32 %v28659_v51, %v14704_v9 }
 0x495   : > { %v15557_v40 = vpop.f32.mrf.mxu0  ;;  %v9981_v57 = vadd.f32 %v28591_v31, %v9904_v53  ;;  %v13698_v53 = vadd.f32 %v28639_v22, %v13621_v39  ;;  %v12844_v6 = vadd.f32 %v28633_v56, %v12768_v44  ;;  %v14702_v24 = vadd.f32 %v28661_v1, %v14626_v27  ;;  %v29525_v27 = vld [vmem:[#allocation4_spill] sm:$0xff] }
 0x496   : > { %v15478_v21 = vpop.f32.mrf.mxu1  ;;  %v11136_v55 = vadd.f32 %v28611_v13, %v11062_v16  ;;  %v15007_v13 = vadd.f32 %v28675_v63, %v28663_v7 }
 0x497   : > { %v28686_v23 = vpop.f32.mrf.mxu0  ;;  %v15479_v12 = vadd.f32 %v15478_v21, %v15396_v18  ;;  %v10057_v31 = vadd.f32 %v28597_v43, %v9981_v57  ;;  %v13774_v22 = vadd.f32 %v28645_v35, %v13698_v53  ;;  %v12922_v56 = vadd.f32 %v28631_v19, %v12844_v6 }
 0x498   : > { %v15480_v59 = vpop.f32.mrf.mxu1  ;;  %v14780_v1 = vadd.f32 %v28657_v61, %v14702_v24  ;;  %v15081_v7 = vadd.f32 %v28669_v41, %v15007_v13 }
 0x499   : > { %v28689_v62 = vpop.f32.mrf.mxu0  ;;  %v15481_v14 = vadd.f32 %v15480_v59, %v15398_v36  ;;  %v15556_v33 = vadd.f32 %v15555_v2, %v15479_v12  ;;  %v10135_v43 = vadd.f32 %v28595_v50, %v10057_v31  ;;  %v13852_v35 = vadd.f32 %v28643_v46, %v13774_v22 }
 0x49a   : > { %v15631_v52 = vpop.f32.mrf.mxu1  ;;  %v12996_v39 = vadd.f32 %v28635_v26, %v12922_v56  ;;  %v14854_v45 = vadd.f32 %v28667_v3, %v14780_v1 }
 0x49b   : > { %v15860_v0 = vpop.f32.mrf.mxu0  ;;  %v15558_v36 = vadd.f32 %v15557_v40, %v15481_v14  ;;  %v15632_v2 = vadd.f32 %v15631_v52, %v15556_v33  ;;  %v10209_v50 = vadd.f32 %v28599_v54, %v10135_v43  ;;  %v13926_v61 = vadd.f32 %v28647_v30, %v13852_v35  ;;  %v29526_v14 = vld [vmem:[#allocation7_spill] sm:$0xff] }
 0x49c   : > { %v15633_v37 = vpop.f32.mrf.mxu1 }
 0x49d   : > { %v26520_v25 = vpop.f32.mrf.mxu0  ;;  %v15634_v57 = vadd.f32 %v15633_v37, %v15558_v36  ;;  %v11585_v49 = vadd.f32 %v11136_v55, %v10209_v50  ;;  %v15710_v54 = vadd.f32 %v28686_v23, %v15632_v2  ;;  %v29524_v23 = vld [vmem:[#allocation2_spill] sm:$0xff]  ;;  %v29527_v36 = vld [vmem:[#allocation5_spill] sm:$0xff] }
 0x49e   : > { %v28700_v58 = vpop.f32.mrf.mxu1  ;;  %v14856_v12 = vadd.f32 %v29524_v23, %v14782_v60 }
 0x49f   : > { %v28702_v17 = vpop.f32.mrf.mxu0  ;;  %v12515_v46 = vadd.f32 %v12066_v29, %v11585_v49  ;;  %v15712_v63 = vadd.f32 %v28689_v62, %v15634_v57  ;;  %v15784_v31 = vadd.f32 %v28700_v58, %v15710_v54  ;;  %v15155_v62 = vadd.f32 %v29526_v14, %v15081_v7  ;;  %v17186_v54 = vld [vmem:[%s367_s25 + $0x8] sm:$0xff] }
 0x4a0   : > { %v28708_v20 = vpop.f32.mrf.mxu1 }
 0x4a1   : > { %v26530_v10 = vpop.f32.mrf.mxu0 }
 0x4a2   : > { %v15936_v28 = vpop.f32.mrf.mxu1 }
 0x4a3   : > { %v28712_v25 = vpop.f32.mrf.mxu0  ;;  %v15937_v8 = vadd.f32 %v15936_v28, %v15860_v0  ;;  %v13445_v28 = vadd.f32 %v12996_v39, %v12515_v46 }
 0x4a4   : > { %v26525_v32 = vpop.f32.mrf.mxu1 }
 0x4a5   : > { %v26540_v48 = vpop.f32.mrf.mxu0  ;;  %v16011_v51 = vadd.f32 %v28702_v17, %v15937_v8  ;;  %v14375_v3 = vadd.f32 %v13926_v61, %v13445_v28  ;;  %v15304_v32 = vadd.f32 %v14854_v45, %v29525_v27 }
 0x4a6   : > { %v16084_v38 = vpop.f32.mrf.mxu1  ;;  %v15786_v48 = vadd.f32 %v28708_v20, %v15712_v63 }
 0x4a7   : > { %v16326_v21 = vpop.f32.mrf.mxu0  ;;  %v16085_v17 = vadd.f32 %v16084_v38, %v16011_v51  ;;  %v16234_v43 = vadd.f32 %v15784_v31, %v15304_v32 }
 0x4a8   : > { %v26535_v18 = vpop.f32.mrf.mxu1 }
 0x4a9   : > { %v16328_v59 = vpop.f32.mrf.mxu0  ;;  %v17171_v18 = vpop.permute.xlu1 %17170  ;;  %v16159_v20 = vadd.f32 %v28712_v25, %v16085_v17 }
 0x4aa   : > { %v28727_v42 = vpop.f32.mrf.mxu1 }
 0x4ab   : > { %v16485_v15 = vpop.f32.mrf.mxu0  ;;  %v16231_v49 = vadd.f32 %v28727_v42, %v16159_v20 }
 0x4ac   : > { %v26545_v40 = vpop.f32.mrf.mxu1 }
 0x4ad   : > { %v16487_v19 = vpop.f32.mrf.mxu0  ;;  %v29528_v40 = vld [vmem:[#allocation3_spill] sm:$0xff] }
 0x4ae   : > { %v16408_v52 = vpop.f32.mrf.mxu1 }
 0x4af   : > { %v16409_v5 = vadd.f32 %v16408_v52, %v16326_v21  ;;  %v16639_v10 = vpop.f32.mrf.mxu0  ;;  %v15305_v21 = vadd.f32 %v14856_v12, %v14375_v3  ;;  %v17187_v12 = vld [vmem:[%s367_s25 + $0x10] sm:$0xff] }
 0x4b0   : > { %v16410_v44 = vpop.f32.mrf.mxu1 }
 0x4b1   : > { %v16486_v37 = vadd.f32 %v16485_v15, %v16409_v5  ;;  %v16411_v26 = vadd.f32 %v16410_v44, %v16328_v59  ;;  %v16641_v0 = vpop.f32.mrf.mxu0  ;;  %v15229_v59 = vadd.f32 %v29527_v36, %v15155_v62  ;;  %v16235_v55 = vadd.f32 %v15786_v48, %v15305_v21  ;;  %v25561_v62 = vld [vmem:[%s29500_s8] sm:$0x7]  ;;  %v25699_v48 = vld [vmem:[%s29499_s7 + $0x4] sm:$0x7] }
 0x4b2   : > { %v16561_v4 = vpop.f32.mrf.mxu1 }
 0x4b3   : > { %v16488_v34 = vadd.f32 %v16487_v19, %v16411_v26  ;;  %v16562_v30 = vadd.f32 %v16561_v4, %v16486_v37  ;;  %v16790_v53 = vpop.f32.mrf.mxu0  ;;  %v15301_v13 = vadd.f32 %v29528_v40, %v15229_v59  ;;  %v17185_v26 = vld [vmem:[%s367_s25] sm:$0xff] }
 0x4b4   : > { %v16563_v41 = vpop.f32.mrf.mxu1 }
 0x4b5   : > { %v16640_v16 = vadd.f32 %v16639_v10, %v16562_v30  ;;  %v16564_v6 = vadd.f32 %v16563_v41, %v16488_v34  ;;  %v26550_v11 = vpop.f32.mrf.mxu0  ;;  %v29529_v10 = vld [vmem:[#allocation6_spill] sm:$0xff] }
 0x4b6   : > { %v16713_v33 = vpop.f32.mrf.mxu1  ;;  %v15306_v46 = vadd.f32 %v15301_v13, %v29529_v10 }
 0x4b7   : > { %v16642_v47 = vadd.f32 %v16641_v0, %v16564_v6  ;;  %v16714_v58 = vadd.f32 %v16713_v33, %v16640_v16  ;;  %v16940_v22 = vpop.f32.mrf.mxu0  ;;  %v17224_v16 = vsel %vm8828_vm0, %v25699_v48, 0 }
 0x4b8   : > { %v16715_v24 = vpop.f32.mrf.mxu1  ;;  %v16236_v7 = vadd.f32 %v16231_v49, %v15306_v46  ;;  %v28827_v6 = vand.u32 4294901760, %v17224_v16 }
 0x4b9   : > { %v17164_v56 = vadd.f32 %v16714_v58, %v16234_v43  ;;  %v16716_v9 = vadd.f32 %v16715_v24, %v16642_v47  ;;  %v26560_v2 = vpop.f32.mrf.mxu0 }
 0x4ba   : > { %v16866_v15 = vpop.f32.mrf.mxu1  ;;  %v28830_v11 = vsub.f32 %v17224_v16, %v28827_v6  ;;  %v17207_v2 = vld [vmem:[%s29499_s7] sm:$0x7] }
 0x4bb   : > { %v17165_v50 = vadd.f32 %v16716_v9, %v16235_v55  ;;  %v17173_v38 = vadd.f32 %v17171_v18, %v17164_v56  ;;  %v16867_v29 = vadd.f32 %v16866_v15, %v16790_v53 }
 0x4bc   : > { %v26555_v35 = vpop.f32.mrf.mxu1  ;;  %v17088_v1 = vpop.f32.mrf.mxu0  ;;  %v28833_v33 = vand.u32 4294901760, %v28830_v11 }
 0x4bd   : > { %v17174_v57 = vadd.f32 %v17171_v18, %v17165_v50  ;;  %v16941_v19 = vadd.f32 %v16940_v22, %v16867_v29  ;;  %v17179_v25 = vmul.f32 0.1, %v17173_v38  ;;  %vm17176_vm11 = vcmp.ge.f32.partialorder %v17173_v38, 0.0 }
 0x4be   : > { %v17014_v39 = vpop.f32.mrf.mxu1  ;;  %v26570_v8 = vpop.f32.mrf.mxu0  ;;  %v17296_v47 = vsub.f32 %v28830_v11, %v28833_v33  ;;  %v29530_v50 = vmov 0.0   ;;  %v18138_v29 = vsel %vm8828_vm0, %v17207_v2, 0 }
 0x4bf   : > { %v17180_v52 = vmul.f32 0.1, %v17174_v57  ;;  %v17015_v60 = vadd.f32 %v17014_v39, %v16941_v19  ;;  %vm17177_vm2 = vcmp.ge.f32.partialorder %v17174_v57, 0.0  ;;  %v17182_v37 = vsel %vm17176_vm11, %v17173_v38, %v17179_v25 }
 0x4c0   : > { %v26565_v5 = vpop.f32.mrf.mxu1  ;;  %v17188_v51 = vmul.f32 %v17185_v26, %v17182_v37  ;;  %v17297_v59 = vand.u32 4294901760, %v17296_v47  ;;  %v28849_v13 = vand.u32 4294901760, %v18138_v29  ;;  %v25701_v47 = vld [vmem:[%s29499_s7 + $0xc] sm:$0x7] }
 0x4c1   : > { %v17089_v61 = vadd.f32 %v17088_v1, %v17015_v60  ;;  %v17183_v45 = vsel %vm17177_vm2, %v17174_v57, %v17180_v52 }
 0x4c2   : > { %v17160_v44 = vpop.f32.mrf.mxu1  ;;  %v17189_v42 = vmul.f32 %v17186_v54, %v17183_v45  ;;  %v28858_v49 = vsub.f32 %v18138_v29, %v28849_v13 }
 0x4c3   : > { %v17161_v63 = vadd.f32 %v17160_v44, %v17089_v61 }
 0x4c4   : > { %v26575_v0 = vpop.f32.mrf.mxu1  ;;  %17196 = vrot.lane.b32.xlu0 %v17189_v42, %s26902_s27  ;;  %v28872_v52 = vand.u32 4294901760, %v28858_v49 }
 0x4c5   : > { %v17166_v28 = vadd.f32 %v17161_v63, %v16236_v7  ;;  %v25700_v63 = vld [vmem:[%s29499_s7 + $0x8] sm:$0x7] }
 0x4c6   : > { %v18210_v10 = vsub.f32 %v28858_v49, %v28872_v52  ;;  %v19065_v26 = vsel %vm8828_vm0, %v25700_v63, 0 }
 0x4c7   : > { %v17175_v4 = vadd.f32 %v17171_v18, %v17166_v28 }
 0x4c8   : > { %17194 = vrot.lane.b32.xlu0 %v17188_v51, %s26902_s27  ;;  %v18211_v45 = vand.u32 4294901760, %v18210_v10 }
 0x4c9   : > { %v17181_v23 = vmul.f32 0.1, %v17175_v4  ;;  %vm17178_vm12 = vcmp.ge.f32.partialorder %v17175_v4, 0.0 }
 0x4cb   : > { %v17184_v31 = vsel %vm17178_vm12, %v17175_v4, %v17181_v23 }
 0x4cc   : > { %v17190_v34 = vmul.f32 %v17187_v12, %v17184_v31  ;;  %v28919_v12 = vand.u32 4294901760, %v19065_v26 }
 0x4ce   : > { %17198 = vrot.lane.b32.xlu1 %v17190_v34, %s26902_s27 }
 0x536   : > { %v17197_v30 = vpop.permute.xlu0 %17196 }
 0x53a   : > { %v17195_v53 = vpop.permute.xlu0 %17194 }
 0x53b   : > { %v28763_v3 = vsel %vm8803_vm14, %v17195_v53, %v17197_v30  ;;  %v28768_v27 = vsel %vm8803_vm14, 0.0, %v17195_v53  ;;  %v28932_v53 = vsub.f32 %v19065_v26, %v28919_v12 }
 0x53c   : > { %17214 = vrot.lane.b32.xlu1 %v28763_v3, %s26892_s15  ;;  %v28854_v19 = vand.u32 4294901760, %v28763_v3  ;;  %v28865_v8 = vand.u32 4294901760, %v28768_v27 }
 0x53e   : > { %v18249_v25 = vsub.f32 %v28763_v3, %v28854_v19  ;;  %v18255_v54 = vsub.f32 %v28768_v27, %v28865_v8 }
 0x540   : > { %v17199_v32 = vpop.permute.xlu1 %17198  ;;  %17212 = vrot.lane.b32.xlu1 %v28768_v27, %s26892_s15  ;;  %v18250_v5 = vand.u32 4294901760, %v18249_v25  ;;  %v18256_v46 = vand.u32 4294901760, %v18255_v54 }
 0x541   : > { %v17201_v41 = vsel %vm8803_vm14, %v17197_v30, %v17199_v32 }
 0x542   : > { %v28774_v14 = vsel %vm8810_vm15, %v17201_v41, 0.0  ;;  %v18251_v61 = vsub.f32 %v18249_v25, %v18250_v5  ;;  %v18257_v42 = vsub.f32 %v18255_v54, %v18256_v46  ;;  %v28946_v41 = vand.u32 4294901760, %v28932_v53 }
 0x543   : > { %17216 = vrot.lane.b32.xlu0 %v28774_v14, %s26892_s15  ;;  %v28899_v7 = vand.u32 4294901760, %v28774_v14 }
 0x544   : > { %19057 = vrot.lane.b32.xlu1 %v28774_v14, %s26893_s16  ;;  %v18252_v37 = vand.u32 4294901760, %v18251_v61  ;;  %v18258_v0 = vand.u32 4294901760, %v18257_v42  ;;  %v19137_v16 = vsub.f32 %v28932_v53, %v28946_v41 }
 0x545   : > { %v18713_v28 = vsub.f32 %v28774_v14, %v28899_v7 }
 0x547   : > { %19055 = vrot.lane.b32.xlu0 %v28763_v3, %s26893_s16  ;;  %v18714_v31 = vand.u32 4294901760, %v18713_v28 }
 0x548   : > { %19985 = vrot.lane.b32.xlu1 %v28763_v3, %s26894_s17 }
 0x54b   : > { %19053 = vrot.lane.b32.xlu0 %v28768_v27, %s26893_s16 }
 0x54c   : > { %19983 = vrot.lane.b32.xlu1 %v28768_v27, %s26894_s17 }
 0x54f   : > { %19987 = vrot.lane.b32.xlu0 %v28774_v14, %s26894_s17 }
 0x550   : > { %20917 = vrot.lane.b32.xlu1 %v28774_v14, %s26895_s18 }
 0x553   : > { %20915 = vrot.lane.b32.xlu0 %v28763_v3, %s26895_s18 }
 0x554   : > { %21845 = vrot.lane.b32.xlu1 %v28763_v3, %s26896_s19 }
 0x557   : > { %20913 = vrot.lane.b32.xlu0 %v28768_v27, %s26895_s18 }
 0x558   : > { %21843 = vrot.lane.b32.xlu1 %v28768_v27, %s26896_s19 }
 0x55b   : > { %21847 = vrot.lane.b32.xlu0 %v28774_v14, %s26896_s19  ;;  %s372_s19 = scalar_lea.vmem %s29501_s9, %s26846_s11 }
 0x55c   : > { %22777 = vrot.lane.b32.xlu1 %v28774_v14, %s26897_s20 }
 0x55f   : > { %22775 = vrot.lane.b32.xlu0 %v28763_v3, %s26897_s20 }
 0x560   : > { %23705 = vrot.lane.b32.xlu1 %v28763_v3, %s26898_s21 }
 0x563   : > { %22773 = vrot.lane.b32.xlu0 %v28768_v27, %s26897_s20 }
 0x564   : > { %23703 = vrot.lane.b32.xlu1 %v28768_v27, %s26898_s21 }
 0x567   : > { %23707 = vrot.lane.b32.xlu0 %v28774_v14, %s26898_s21 }
 0x568   : > { %24637 = vrot.lane.b32.xlu1 %v28774_v14, %s26899_s22 }
 0x56b   : > { %24635 = vrot.lane.b32.xlu0 %v28763_v3, %s26899_s22 }
 0x56c   : > { %25564 = vperm.xlu1 %26869, %v25561_v62  }
 0x56f   : > { %24633 = vrot.lane.b32.xlu0 %v28768_v27, %s26899_s22  ;;  %v18715_v27 = vsub.f32 %v18713_v28, %v18714_v31 }
 0x571   : > { %v18716_v62 = vand.u32 4294901760, %v18715_v27 }
 0x5ae   : > { %v17215_v17 = vpop.permute.xlu1 %17214 }
 0x5b2   : > { %v17213_v21 = vpop.permute.xlu1 %17212 }
 0x5b3   : > { %v17218_v43 = vsel %vm387_vm1, %v17213_v21, %v17215_v17 }
 0x5b4   : > { %v17258_v58 = vand.u32 4294901760, %v17218_v43 }
 0x5b5   : > { %v17217_v22 = vpop.permute.xlu0 %17216 }
 0x5b6   : > { %v17341_v24 = vsub.f32 %v17218_v43, %v17258_v58  ;;  %v17219_v18 = vsel %vm387_vm1, %v17215_v17, %v17217_v22  ;;  %v28839_v9 = vand.u32 4294901760, %v17217_v22  ;;  %v28912_v51 = vpop.permute.xlu1 %19057  ;;  %v19138_v17 = vand.u32 4294901760, %v19137_v16 }
 0x5b7   : > { %v17256_v36 = vand.u32 4294901760, %v17219_v18  ;;  %vm25593_vm1 = vcmask 256000  }
 0x5b8   : > { %v17342_v55 = vand.u32 4294901760, %v17341_v24  ;;  %v17799_v35 = vsub.f32 %v17217_v22, %v28839_v9 }
 0x5b9   : > { %17257 = vmatprep.subr.mxu0 %v17256_v36  ;;  %v17335_v56 = vsub.f32 %v17219_v18, %v17256_v36  ;;  %v19056_v44 = vpop.permute.xlu0 %19055 }
 0x5ba   : > { %17259 = vmatpush1.msra.mxu0 %v17258_v58  ;;  %v17343_v15 = vsub.f32 %v17341_v24, %v17342_v55  ;;  %v17800_v57 = vand.u32 4294901760, %v17799_v35  ;;  %v19060_v4 = vsel %vm2240_vm4, %v19056_v44, %v28912_v51  ;;  %v19986_v21 = vpop.permute.xlu1 %19985 }
 0x5bb   : > { %17298 = vmatmul.mubr.f32.vlgmr.msra.gmra.mxu0 %v17297_v59  ;;  %17418 = vmatprep.subr.mxu0 %v17335_v56  ;;  %v17336_v20 = vand.u32 4294901760, %v17335_v56  ;;  %v28924_v34 = vand.u32 4294901760, %v19060_v4 }
 0x5bc   : > { %17421 = vmatpush1.msra.mxu0 %v17341_v24  ;;  %17454 = vmatprep.mubr.f32.mxu0 %v29530_v50  ;;  %v17344_v40 = vand.u32 4294901760, %v17343_v15  ;;  %v17801_v39 = vsub.f32 %v17799_v35, %v17800_v57  ;;  %v19995_v24 = vsel %vm8828_vm0, %v25701_v47, 0 }
 0x5bd   : > { %17572 = vmatprep.subr.mxu0 %v17336_v20  ;;  %v17337_v38 = vsub.f32 %v17335_v56, %v17336_v20  ;;  %v19054_v23 = vpop.permute.xlu0 %19053  ;;  %v19176_v32 = vsub.f32 %v19060_v4, %v28924_v34  ;;  %v28992_v56 = vand.u32 4294901760, %v19995_v24 }
 0x5be   : > { %v17802_v60 = vand.u32 4294901760, %v17801_v39  ;;  %v19059_v30 = vsel %vm2240_vm4, %v19054_v23, %v19056_v44 }
 0x5bf   : > { %17457 = vmatmul.mubr.f32.vlgmr.msra.gmra.mxu0 %v28830_v11  ;;  %v17338_v1 = vand.u32 4294901760, %v17337_v38  ;;  %v28936_v3 = vand.u32 4294901760, %v19059_v30  ;;  %v19177_v48 = vand.u32 4294901760, %v19176_v32  ;;  %v29005_v15 = vsub.f32 %v19995_v24, %v28992_v56 }
 0x5c0   : > { %17576 = vmatpush1.msra.mxu0 %v17342_v55  ;;  %17609 = vmatprep.mubr.f32.mxu0 %v29530_v50 }
 0x5c1   : > { %17339 = vmatprep.subr.mxu1 %v17338_v1  ;;  %26576 = vmatprep.subr.mxu0 %v29530_v50  ;;  %v19182_v14 = vsub.f32 %v19059_v30, %v28936_v3  ;;  %v28980_v22 = vpop.permute.xlu0 %19987  ;;  %v29019_v1 = vand.u32 4294901760, %v29005_v15 }
 0x5c2   : > { %17345 = vmatpush1.msra.mxu1 %v17344_v40  ;;  %v19990_v55 = vsel %vm3174_vm5, %v19986_v21, %v28980_v22 }
 0x5c3   : > { %17380 = vmatmul.mubr.f32.vlgmr.msra.gmra.mxu1 %v28827_v6  ;;  %17494 = vmatprep.subr.mxu1 %v17256_v36  ;;  %v28998_v20 = vand.u32 4294901760, %v19990_v55 }
 0x5c4   : > { %17611 = vmatmul.mubr.f32.vlgmr.msra.gmra.mxu0 %v28827_v6  ;;  %17496 = vmatpush1.msra.mxu1 %v17258_v58 }
 0x5c5   : > { %26577 = vmatpush3.msra.mxu0 %v28839_v9  ;;  %17648 = vmatprep.subr.mxu1 %v17256_v36 }
 0x5c6   : > { %17529 = vmatprep.mubr.f32.mxu1 %v29530_v50  ;;  %26578 = vmatprep.mubr.msk.f32.mxu0 %vm26900_vm3, %v29530_v50 }
 0x5c7   : > { %26586 = vmatprep.subr.mxu0 %v29530_v50  ;;  %17533 = vmatmul.mubr.f32.vlgmr.msra.gmra.mxu1 %v28833_v33 }
 0x5c8   : > { %17650 = vmatpush1.msra.mxu1 %v17258_v58  ;;  %26579 = vmatmul.mubr.f32.vlgmr.msra.gmra.mxu0 %v17297_v59  ;;  %v19984_v59 = vpop.permute.xlu1 %19983 }
 0x5c9   : > { %26587 = vmatpush3.msra.mxu0 %v17799_v35  ;;  %17683 = vmatprep.mubr.f32.mxu1 %v29530_v50  ;;  %v19989_v2 = vsel %vm3174_vm5, %v19984_v59, %v19986_v21  ;;  %v20106_v35 = vsub.f32 %v19990_v55, %v28998_v20 }
 0x5ca   : > { %26581 = vmatprep.subr.mxu1 %v29530_v50  ;;  %26588 = vmatprep.mubr.msk.f32.mxu0 %vm26900_vm3, %v29530_v50  ;;  %v29009_v38 = vand.u32 4294901760, %v19989_v2 }
 0x5cb   : > { %26596 = vmatprep.subr.mxu0 %v29530_v50  ;;  %17685 = vmatmul.mubr.f32.vlgmr.msra.gmra.mxu1 %v28827_v6 }
 0x5cc   : > { %26582 = vmatpush3.msra.mxu1 %v17802_v60  ;;  %26589 = vmatmul.mubr.f32.vlgmr.msra.gmra.mxu0 %v28830_v11  ;;  %v19178_v11 = vsub.f32 %v19176_v32, %v19177_v48  ;;  %v20112_v40 = vsub.f32 %v19989_v2, %v29009_v38  ;;  %v20916_v60 = vpop.permute.xlu0 %20915 }
 0x5cd   : > { %26597 = vmatpush3.msra.mxu0 %v17800_v57  ;;  %26583 = vmatprep.mubr.msk.f32.mxu1 %vm26900_vm3, %v29530_v50  ;;  %v20107_v57 = vand.u32 4294901760, %v20106_v35 }
 0x5ce   : > { %18171 = vmatprep.subr.mxu0 %v28854_v19  ;;  %26591 = vmatprep.subr.mxu1 %v29530_v50  ;;  %v19179_v58 = vand.u32 4294901760, %v19178_v11 }
 0x5cf   : > { %26598 = vmatprep.mubr.msk.f32.mxu0 %vm26900_vm3, %v29530_v50  ;;  %26584 = vmatmul.mubr.f32.vlgmr.msra.gmra.mxu1 %v28827_v6  ;;  %v20108_v39 = vsub.f32 %v20106_v35, %v20107_v57 }
 0x5d0   : > { %26592 = vmatpush3.msra.mxu1 %v28839_v9  ;;  %26599 = vmatmul.mubr.f32.vlgmr.msra.gmra.mxu0 %v28827_v6  ;;  %v20914_v42 = vpop.permute.xlu0 %20913 }
 0x5d1   : > { %18173 = vmatpush1.msra.mxu0 %v28865_v8  ;;  %26593 = vmatprep.mubr.msk.f32.mxu1 %vm26900_vm3, %v29530_v50  ;;  %v20919_v26 = vsel %vm4108_vm6, %v20914_v42, %v20916_v60 }
 0x5d2   : > { %18332 = vmatprep.subr.mxu0 %v18249_v25  ;;  %26601 = vmatprep.subr.mxu1 %v29530_v50 }
 0x5d3   : > { %18206 = vmatprep.mubr.f32.mxu0 %v29530_v50  ;;  %26594 = vmatmul.mubr.f32.vlgmr.msra.gmra.mxu1 %v28833_v33  ;;  %v28971_v33 = vand.u32 4294901760, %v28912_v51 }
 0x5d4   : > { %26602 = vmatpush3.msra.mxu1 %v28839_v9  ;;  %18212 = vmatmul.mubr.f32.vlgmr.msra.gmra.mxu0 %v18211_v45  ;;  %v29126_v16 = vpop.permute.xlu0 %21847 }
 0x5d5   : > { %18335 = vmatpush1.msra.mxu0 %v18255_v54  ;;  %18253 = vmatprep.subr.mxu1 %v18252_v37  ;;  %v19640_v18 = vsub.f32 %v28912_v51, %v28971_v33  ;;  %v25702_v54 = vld [vmem:[%s29499_s7 + $0x10] sm:$0x7] }
 0x5d6   : > { %18486 = vmatprep.subr.mxu0 %v18250_v5  ;;  %26603 = vmatprep.mubr.msk.f32.mxu1 %vm26900_vm3, %v29530_v50  ;;  %v20109_v5 = vand.u32 4294901760, %v20108_v39  ;;  %v20925_v10 = vsel %vm8828_vm0, %v25702_v54, 0 }
 0x5d7   : > { %18368 = vmatprep.mubr.f32.mxu0 %v29530_v50  ;;  %26604 = vmatmul.mubr.f32.vlgmr.msra.gmra.mxu1 %v28827_v6  ;;  %v19183_v6 = vand.u32 4294901760, %v19182_v14  ;;  %v19641_v9 = vand.u32 4294901760, %v19640_v18 }
 0x5d8   : > { %18259 = vmatpush1.msra.mxu1 %v18258_v0  ;;  %18371 = vmatmul.mubr.f32.vlgmr.msra.gmra.mxu0 %v28858_v49 }
 0x5d9   : > { %18490 = vmatpush1.msra.mxu0 %v18256_v46  ;;  %18408 = vmatprep.subr.mxu1 %v28854_v19  ;;  %v19184_v43 = vsub.f32 %v19182_v14, %v19183_v6  ;;  %v19642_v29 = vsub.f32 %v19640_v18, %v19641_v9 }
 0x5da   : > { %18292 = vmatprep.mubr.f32.mxu1 %v29530_v50  ;;  %18523 = vmatprep.mubr.f32.mxu0 %v29530_v50 }
 0x5db   : > { %26606 = vmatprep.subr.mxu0 %v29530_v50  ;;  %18294 = vmatmul.mubr.f32.vlgmr.msra.gmra.mxu1 %v28849_v13  ;;  %v19185_v36 = vand.u32 4294901760, %v19184_v43 }
 0x5dc   : > { %18410 = vmatpush1.msra.mxu1 %v28865_v8  ;;  %18525 = vmatmul.mubr.f32.vlgmr.msra.gmra.mxu0 %v28849_v13 }
 0x5dd   : > { %26607 = vmatpush3.msra.mxu0 %v28899_v7  ;;  %18562 = vmatprep.subr.mxu1 %v28854_v19  ;;  %v20067_v19 = vsub.f32 %v29005_v15, %v29019_v1 }
 0x5de   : > { %18443 = vmatprep.mubr.f32.mxu1 %v29530_v50  ;;  %26608 = vmatprep.mubr.msk.f32.mxu0 %vm26900_vm3, %v29530_v50 }
 0x5df   : > { %26616 = vmatprep.subr.mxu0 %v29530_v50  ;;  %18447 = vmatmul.mubr.f32.vlgmr.msra.gmra.mxu1 %v28872_v52 }
 0x5e0   : > { %18564 = vmatpush1.msra.mxu1 %v28865_v8  ;;  %26609 = vmatmul.mubr.f32.vlgmr.msra.gmra.mxu0 %v18211_v45  ;;  %v20068_v8 = vand.u32 4294901760, %v20067_v19  ;;  %v29058_v45 = vpop.permute.xlu1 %20917 }
 0x5e1   : > { %26617 = vmatpush3.msra.mxu0 %v18713_v28  ;;  %18597 = vmatprep.mubr.f32.mxu1 %v29530_v50  ;;  %v20920_v44 = vsel %vm4108_vm6, %v20916_v60, %v29058_v45  ;;  %v29082_v28 = vand.u32 4294901760, %v20919_v26 }
 0x5e2   : > { %26611 = vmatprep.subr.mxu1 %v29530_v50  ;;  %26618 = vmatprep.mubr.msk.f32.mxu0 %vm26900_vm3, %v29530_v50  ;;  %v29070_v37 = vand.u32 4294901760, %v20920_v44 }
 0x5e3   : > { %26626 = vmatprep.subr.mxu0 %v29530_v50  ;;  %18599 = vmatmul.mubr.f32.vlgmr.msra.gmra.mxu1 %v28849_v13 }
 0x5e4   : > { %26612 = vmatpush3.msra.mxu1 %v18716_v62  ;;  %26619 = vmatmul.mubr.f32.vlgmr.msra.gmra.mxu0 %v28858_v49  ;;  %v20113_v49 = vand.u32 4294901760, %v20112_v40  ;;  %v21036_v4 = vsub.f32 %v20920_v44, %v29070_v37  ;;  %v25703_v62 = vld [vmem:[%s29499_s7 + $0x14] sm:$0x7] }
 0x5e5   : > { %26627 = vmatpush3.msra.mxu0 %v18714_v31  ;;  %26613 = vmatprep.mubr.msk.f32.mxu1 %vm26900_vm3, %v29530_v50 }
 0x5e6   : > { %19098 = vmatprep.subr.mxu0 %v28924_v34  ;;  %26621 = vmatprep.subr.mxu1 %v29530_v50  ;;  %v20114_v25 = vsub.f32 %v20112_v40, %v20113_v49 }
 0x5e7   : > { %26628 = vmatprep.mubr.msk.f32.mxu0 %vm26900_vm3, %v29530_v50  ;;  %26614 = vmatmul.mubr.f32.vlgmr.msra.gmra.mxu1 %v28849_v13 }
 0x5e8   : > { %26622 = vmatpush3.msra.mxu1 %v28899_v7  ;;  %26629 = vmatmul.mubr.f32.vlgmr.msra.gmra.mxu0 %v28849_v13  ;;  %v20115_v61 = vand.u32 4294901760, %v20114_v25 }
 0x5e9   : > { %19100 = vmatpush1.msra.mxu0 %v28936_v3  ;;  %26623 = vmatprep.mubr.msk.f32.mxu1 %vm26900_vm3, %v29530_v50 }
 0x5ea   : > { %19259 = vmatprep.subr.mxu0 %v19176_v32  ;;  %26631 = vmatprep.subr.mxu1 %v29530_v50  ;;  %v29117_v32 = vand.u32 4294901760, %v29058_v45 }
 0x5eb   : > { %19133 = vmatprep.mubr.f32.mxu0 %v29530_v50  ;;  %26624 = vmatmul.mubr.f32.vlgmr.msra.gmra.mxu1 %v28872_v52  ;;  %v29044_v52 = vand.u32 4294901760, %v28980_v22 }
 0x5ec   : > { %26632 = vmatpush3.msra.mxu1 %v28899_v7  ;;  %19139 = vmatmul.mubr.f32.vlgmr.msra.gmra.mxu0 %v19138_v17  ;;  %v29065_v7 = vand.u32 4294901760, %v20925_v10  ;;  %v21500_v11 = vsub.f32 %v29058_v45, %v29117_v32 }
 0x5ed   : > { %19262 = vmatpush1.msra.mxu0 %v19182_v14  ;;  %19180 = vmatprep.subr.mxu1 %v19179_v58  ;;  %v20570_v46 = vsub.f32 %v28980_v22, %v29044_v52 }
 0x5ee   : > { %19413 = vmatprep.subr.mxu0 %v19177_v48  ;;  %26633 = vmatprep.mubr.msk.f32.mxu1 %vm26900_vm3, %v29530_v50  ;;  %v29078_v0 = vsub.f32 %v20925_v10, %v29065_v7  ;;  %v21501_v47 = vand.u32 4294901760, %v21500_v11 }
 0x5ef   : > { %19295 = vmatprep.mubr.f32.mxu0 %v29530_v50  ;;  %26634 = vmatmul.mubr.f32.vlgmr.msra.gmra.mxu1 %v28849_v13  ;;  %v19643_v13 = vand.u32 4294901760, %v19642_v29  ;;  %v20571_v63 = vand.u32 4294901760, %v20570_v46 }
 0x5f0   : > { %19186 = vmatpush1.msra.mxu1 %v19185_v36  ;;  %19298 = vmatmul.mubr.f32.vlgmr.msra.gmra.mxu0 %v28932_v53  ;;  %v29092_v23 = vand.u32 4294901760, %v29078_v0  ;;  %v21502_v36 = vsub.f32 %v21500_v11, %v21501_v47 }
 0x5f1   : > { %19417 = vmatpush1.msra.mxu0 %v19183_v6  ;;  %19335 = vmatprep.subr.mxu1 %v28924_v34  ;;  %v20572_v51 = vsub.f32 %v20570_v46, %v20571_v63  ;;  %v21855_v6 = vsel %vm8828_vm0, %v25703_v62, 0 }
 0x5f2   : > { %19219 = vmatprep.mubr.f32.mxu1 %v29530_v50  ;;  %19450 = vmatprep.mubr.f32.mxu0 %v29530_v50  ;;  %v20997_v30 = vsub.f32 %v29078_v0, %v29092_v23  ;;  %v29138_v43 = vand.u32 4294901760, %v21855_v6 }
 0x5f3   : > { %26636 = vmatprep.subr.mxu0 %v29530_v50  ;;  %19221 = vmatmul.mubr.f32.vlgmr.msra.gmra.mxu1 %v28919_v12  ;;  %v20573_v31 = vand.u32 4294901760, %v20572_v51 }
 0x5f4   : > { %19337 = vmatpush1.msra.mxu1 %v28936_v3  ;;  %19452 = vmatmul.mubr.f32.vlgmr.msra.gmra.mxu0 %v28919_v12  ;;  %v20998_v27 = vand.u32 4294901760, %v20997_v30  ;;  %v29151_v24 = vsub.f32 %v21855_v6, %v29138_v43 }
 0x5f5   : > { %26637 = vmatpush3.msra.mxu0 %v28971_v33  ;;  %19489 = vmatprep.subr.mxu1 %v28924_v34  ;;  %v21037_v34 = vand.u32 4294901760, %v21036_v4 }
 0x5f6   : > { %19370 = vmatprep.mubr.f32.mxu1 %v29530_v50  ;;  %26638 = vmatprep.mubr.msk.f32.mxu0 %vm26900_vm3, %v29530_v50  ;;  %v29165_v55 = vand.u32 4294901760, %v29151_v24 }
 0x5f7   : > { %26646 = vmatprep.subr.mxu0 %v29530_v50  ;;  %19374 = vmatmul.mubr.f32.vlgmr.msra.gmra.mxu1 %v28946_v41 }
 0x5f8   : > { %19491 = vmatpush1.msra.mxu1 %v28936_v3  ;;  %26639 = vmatmul.mubr.f32.vlgmr.msra.gmra.mxu0 %v19138_v17  ;;  %v21038_v3 = vsub.f32 %v21036_v4, %v21037_v34 }
 0x5f9   : > { %26647 = vmatpush3.msra.mxu0 %v19640_v18  ;;  %19524 = vmatprep.mubr.f32.mxu1 %v29530_v50 }
 0x5fa   : > { %26641 = vmatprep.subr.mxu1 %v29530_v50  ;;  %26648 = vmatprep.mubr.msk.f32.mxu0 %vm26900_vm3, %v29530_v50  ;;  %v21039_v48 = vand.u32 4294901760, %v21038_v3 }
 0x5fb   : > { %26656 = vmatprep.subr.mxu0 %v29530_v50  ;;  %19526 = vmatmul.mubr.f32.vlgmr.msra.gmra.mxu1 %v28919_v12 }
 0x5fc   : > { %26642 = vmatpush3.msra.mxu1 %v19643_v13  ;;  %26649 = vmatmul.mubr.f32.vlgmr.msra.gmra.mxu0 %v28932_v53  ;;  %v25704_v13 = vld [vmem:[%s29499_s7 + $0x18] sm:$0x7] }
 0x5fd   : > { %26657 = vmatpush3.msra.mxu0 %v19641_v9  ;;  %26643 = vmatprep.mubr.msk.f32.mxu1 %vm26900_vm3, %v29530_v50  ;;  %v21503_v9 = vand.u32 4294901760, %v21502_v36  ;;  %v22785_v19 = vsel %vm8828_vm0, %v25704_v13, 0 }
 0x5fe   : > { %20028 = vmatprep.subr.mxu0 %v28998_v20  ;;  %26651 = vmatprep.subr.mxu1 %v29530_v50  ;;  %v29211_v60 = vand.u32 4294901760, %v22785_v19 }
 0x5ff   : > { %26658 = vmatprep.mubr.msk.f32.mxu0 %vm26900_vm3, %v29530_v50  ;;  %26644 = vmatmul.mubr.f32.vlgmr.msra.gmra.mxu1 %v28919_v12 }
 0x600   : > { %26652 = vmatpush3.msra.mxu1 %v28971_v33  ;;  %26659 = vmatmul.mubr.f32.vlgmr.msra.gmra.mxu0 %v28919_v12 }
 0x601   : > { %20030 = vmatpush1.msra.mxu0 %v29009_v38  ;;  %26653 = vmatprep.mubr.msk.f32.mxu1 %vm26900_vm3, %v29530_v50 }
 0x602   : > { %20189 = vmatprep.subr.mxu0 %v20106_v35  ;;  %26661 = vmatprep.subr.mxu1 %v29530_v50 }
 0x603   : > { %20063 = vmatprep.mubr.f32.mxu0 %v29530_v50  ;;  %26654 = vmatmul.mubr.f32.vlgmr.msra.gmra.mxu1 %v28946_v41  ;;  %v21846_v41 = vpop.permute.xlu1 %21845 }
 0x604   : > { %26662 = vmatpush3.msra.mxu1 %v28971_v33  ;;  %20069 = vmatmul.mubr.f32.vlgmr.msra.gmra.mxu0 %v20068_v8  ;;  %v21850_v21 = vsel %vm5042_vm7, %v21846_v41, %v29126_v16 }
 0x605   : > { %20192 = vmatpush1.msra.mxu0 %v20112_v40  ;;  %20110 = vmatprep.subr.mxu1 %v20109_v5  ;;  %v29144_v22 = vand.u32 4294901760, %v21850_v21  ;;  %v22776_v40 = vpop.permute.xlu0 %22775 }
 0x606   : > { %20343 = vmatprep.subr.mxu0 %v20107_v57  ;;  %26663 = vmatprep.mubr.msk.f32.mxu1 %vm26900_vm3, %v29530_v50 }
 0x607   : > { %20225 = vmatprep.mubr.f32.mxu0 %v29530_v50  ;;  %26664 = vmatmul.mubr.f32.vlgmr.msra.gmra.mxu1 %v28919_v12  ;;  %v21042_v12 = vsub.f32 %v20919_v26, %v29082_v28  ;;  %v21844_v33 = vpop.permute.xlu1 %21843  ;;  %v21966_v59 = vsub.f32 %v21850_v21, %v29144_v22 }
 0x608   : > { %20116 = vmatpush1.msra.mxu1 %v20115_v61  ;;  %20228 = vmatmul.mubr.f32.vlgmr.msra.gmra.mxu0 %v29005_v15  ;;  %v21849_v58 = vsel %vm5042_vm7, %v21844_v33, %v21846_v41 }
 0x609   : > { %20347 = vmatpush1.msra.mxu0 %v20113_v49  ;;  %20265 = vmatprep.subr.mxu1 %v28998_v20  ;;  %v21043_v53 = vand.u32 4294901760, %v21042_v12  ;;  %v29155_v18 = vand.u32 4294901760, %v21849_v58  ;;  %v21967_v2 = vand.u32 4294901760, %v21966_v59 }
 0x60a   : > { %20149 = vmatprep.mubr.f32.mxu1 %v29530_v50  ;;  %20380 = vmatprep.mubr.f32.mxu0 %v29530_v50 }
 0x60b   : > { %26666 = vmatprep.subr.mxu0 %v29530_v50  ;;  %20151 = vmatmul.mubr.f32.vlgmr.msra.gmra.mxu1 %v28992_v56  ;;  %v21044_v14 = vsub.f32 %v21042_v12, %v21043_v53 }
 0x60c   : > { %20267 = vmatpush1.msra.mxu1 %v29009_v38  ;;  %20382 = vmatmul.mubr.f32.vlgmr.msra.gmra.mxu0 %v28992_v56 }
 0x60d   : > { %26667 = vmatpush3.msra.mxu0 %v29044_v52  ;;  %20419 = vmatprep.subr.mxu1 %v28998_v20  ;;  %v21045_v17 = vand.u32 4294901760, %v21044_v14  ;;  %v21927_v20 = vsub.f32 %v29151_v24, %v29165_v55 }
 0x60e   : > { %20300 = vmatprep.mubr.f32.mxu1 %v29530_v50  ;;  %26668 = vmatprep.mubr.msk.f32.mxu0 %vm26900_vm3, %v29530_v50 }
 0x60f   : > { %26676 = vmatprep.subr.mxu0 %v29530_v50  ;;  %20304 = vmatmul.mubr.f32.vlgmr.msra.gmra.mxu1 %v29019_v1  ;;  %v21928_v29 = vand.u32 4294901760, %v21927_v20 }
 0x610   : > { %20421 = vmatpush1.msra.mxu1 %v29009_v38  ;;  %26669 = vmatmul.mubr.f32.vlgmr.msra.gmra.mxu0 %v20068_v8  ;;  %v21968_v38 = vsub.f32 %v21966_v59, %v21967_v2  ;;  %v29204_v8 = vpop.permute.xlu1 %22777 }
 0x611   : > { %26677 = vmatpush3.msra.mxu0 %v20570_v46  ;;  %20454 = vmatprep.mubr.f32.mxu1 %v29530_v50  ;;  %v22780_v25 = vsel %vm5976_vm8, %v22776_v40, %v29204_v8  ;;  %v29224_v46 = vsub.f32 %v22785_v19, %v29211_v60 }
 0x612   : > { %26671 = vmatprep.subr.mxu1 %v29530_v50  ;;  %26678 = vmatprep.mubr.msk.f32.mxu0 %vm26900_vm3, %v29530_v50  ;;  %v21969_v57 = vand.u32 4294901760, %v21968_v38  ;;  %v29216_v5 = vand.u32 4294901760, %v22780_v25 }
 0x613   : > { %26686 = vmatprep.subr.mxu0 %v29530_v50  ;;  %20456 = vmatmul.mubr.f32.vlgmr.msra.gmra.mxu1 %v28992_v56  ;;  %v29238_v42 = vand.u32 4294901760, %v29224_v46 }
 0x614   : > { %26672 = vmatpush3.msra.mxu1 %v20573_v31  ;;  %26679 = vmatmul.mubr.f32.vlgmr.msra.gmra.mxu0 %v29005_v15  ;;  %v22896_v44 = vsub.f32 %v22780_v25, %v29216_v5  ;;  %v25705_v31 = vld [vmem:[%s29499_s7 + $0x1c] sm:$0x7] }
 0x615   : > { %26687 = vmatpush3.msra.mxu0 %v20571_v63  ;;  %26673 = vmatprep.mubr.msk.f32.mxu1 %vm26900_vm3, %v29530_v50  ;;  %v22857_v26 = vsub.f32 %v29224_v46, %v29238_v42 }
 0x616   : > { %20958 = vmatprep.subr.mxu0 %v29070_v37  ;;  %26681 = vmatprep.subr.mxu1 %v29530_v50 }
 0x617   : > { %26688 = vmatprep.mubr.msk.f32.mxu0 %vm26900_vm3, %v29530_v50  ;;  %26674 = vmatmul.mubr.f32.vlgmr.msra.gmra.mxu1 %v28992_v56  ;;  %v22858_v51 = vand.u32 4294901760, %v22857_v26 }
 0x618   : > { %26682 = vmatpush3.msra.mxu1 %v29044_v52  ;;  %26689 = vmatmul.mubr.f32.vlgmr.msra.gmra.mxu0 %v28992_v56 }
 0x619   : > { %20960 = vmatpush1.msra.mxu0 %v29082_v28  ;;  %26683 = vmatprep.mubr.msk.f32.mxu1 %vm26900_vm3, %v29530_v50 }
 0x61a   : > { %21119 = vmatprep.subr.mxu0 %v21036_v4  ;;  %26691 = vmatprep.subr.mxu1 %v29530_v50  ;;  %v29263_v4 = vand.u32 4294901760, %v29204_v8 }
 0x61b   : > { %20993 = vmatprep.mubr.f32.mxu0 %v29530_v50  ;;  %26684 = vmatmul.mubr.f32.vlgmr.msra.gmra.mxu1 %v29019_v1  ;;  %v29190_v1 = vand.u32 4294901760, %v29126_v16 }
 0x61c   : > { %26692 = vmatpush3.msra.mxu1 %v29044_v52  ;;  %20999 = vmatmul.mubr.f32.vlgmr.msra.gmra.mxu0 %v20998_v27  ;;  %v22774_v52 = vpop.permute.xlu0 %22773  ;;  %v23360_v3 = vsub.f32 %v29204_v8, %v29263_v4 }
 0x61d   : > { %21122 = vmatpush1.msra.mxu0 %v21042_v12  ;;  %21040 = vmatprep.subr.mxu1 %v21039_v48  ;;  %v22430_v49 = vsub.f32 %v29126_v16, %v29190_v1  ;;  %v22779_v10 = vsel %vm5976_vm8, %v22774_v52, %v22776_v40 }
 0x61e   : > { %21273 = vmatprep.subr.mxu0 %v21037_v34  ;;  %26693 = vmatprep.mubr.msk.f32.mxu1 %vm26900_vm3, %v29530_v50  ;;  %v29228_v61 = vand.u32 4294901760, %v22779_v10  ;;  %v23361_v62 = vand.u32 4294901760, %v23360_v3 }
 0x61f   : > { %21155 = vmatprep.mubr.f32.mxu0 %v29530_v50  ;;  %26694 = vmatmul.mubr.f32.vlgmr.msra.gmra.mxu1 %v28992_v56  ;;  %v21972_v56 = vsub.f32 %v21849_v58, %v29155_v18  ;;  %v22431_v54 = vand.u32 4294901760, %v22430_v49 }
 0x620   : > { %21046 = vmatpush1.msra.mxu1 %v21045_v17  ;;  %21158 = vmatmul.mubr.f32.vlgmr.msra.gmra.mxu0 %v29078_v0  ;;  %v29272_v30 = vpop.permute.xlu0 %23707  ;;  %v23362_v17 = vsub.f32 %v23360_v3, %v23361_v62 }
 0x621   : > { %21277 = vmatpush1.msra.mxu0 %v21043_v53  ;;  %21195 = vmatprep.subr.mxu1 %v29070_v37  ;;  %v21973_v15 = vand.u32 4294901760, %v21972_v56  ;;  %v22432_v45 = vsub.f32 %v22430_v49, %v22431_v54  ;;  %v23715_v53 = vsel %vm8828_vm0, %v25705_v31, 0 }
 0x622   : > { %21079 = vmatprep.mubr.f32.mxu1 %v29530_v50  ;;  %21310 = vmatprep.mubr.f32.mxu0 %v29530_v50  ;;  %v29284_v14 = vand.u32 4294901760, %v23715_v53 }
 0x623   : > { %26696 = vmatprep.subr.mxu0 %v29530_v50  ;;  %21081 = vmatmul.mubr.f32.vlgmr.msra.gmra.mxu1 %v29065_v7  ;;  %v21974_v35 = vsub.f32 %v21972_v56, %v21973_v15  ;;  %v22433_v63 = vand.u32 4294901760, %v22432_v45 }
 0x624   : > { %21197 = vmatpush1.msra.mxu1 %v29082_v28  ;;  %21312 = vmatmul.mubr.f32.vlgmr.msra.gmra.mxu0 %v29065_v7  ;;  %v29297_v6 = vsub.f32 %v23715_v53, %v29284_v14 }
 0x625   : > { %26697 = vmatpush3.msra.mxu0 %v29117_v32  ;;  %21349 = vmatprep.subr.mxu1 %v29070_v37  ;;  %v21975_v39 = vand.u32 4294901760, %v21974_v35  ;;  %v22897_v37 = vand.u32 4294901760, %v22896_v44 }
 0x626   : > { %21230 = vmatprep.mubr.f32.mxu1 %v29530_v50  ;;  %26698 = vmatprep.mubr.msk.f32.mxu0 %vm26900_vm3, %v29530_v50  ;;  %v29311_v21 = vand.u32 4294901760, %v29297_v6 }
 0x627   : > { %26706 = vmatprep.subr.mxu0 %v29530_v50  ;;  %21234 = vmatmul.mubr.f32.vlgmr.msra.gmra.mxu1 %v29092_v23 }
 0x628   : > { %21351 = vmatpush1.msra.mxu1 %v29082_v28  ;;  %26699 = vmatmul.mubr.f32.vlgmr.msra.gmra.mxu0 %v20998_v27  ;;  %v22898_v28 = vsub.f32 %v22896_v44, %v22897_v37 }
 0x629   : > { %26707 = vmatpush3.msra.mxu0 %v21500_v11  ;;  %21384 = vmatprep.mubr.f32.mxu1 %v29530_v50 }
 0x62a   : > { %26701 = vmatprep.subr.mxu1 %v29530_v50  ;;  %26708 = vmatprep.mubr.msk.f32.mxu0 %vm26900_vm3, %v29530_v50  ;;  %v22899_v34 = vand.u32 4294901760, %v22898_v28 }
 0x62b   : > { %26716 = vmatprep.subr.mxu0 %v29530_v50  ;;  %21386 = vmatmul.mubr.f32.vlgmr.msra.gmra.mxu1 %v29065_v7 }
 0x62c   : > { %26702 = vmatpush3.msra.mxu1 %v21503_v9  ;;  %26709 = vmatmul.mubr.f32.vlgmr.msra.gmra.mxu0 %v29078_v0  ;;  %v25706_v9 = vld [vmem:[%s29499_s7 + $0x20] sm:$0x7] }
 0x62d   : > { %26717 = vmatpush3.msra.mxu0 %v21501_v47  ;;  %26703 = vmatprep.mubr.msk.f32.mxu1 %vm26900_vm3, %v29530_v50  ;;  %v23363_v47 = vand.u32 4294901760, %v23362_v17  ;;  %v24645_v20 = vsel %vm8828_vm0, %v25706_v9, 0 }
 0x62e   : > { %21888 = vmatprep.subr.mxu0 %v29144_v22  ;;  %26711 = vmatprep.subr.mxu1 %v29530_v50  ;;  %v29357_v40 = vand.u32 4294901760, %v24645_v20 }
 0x62f   : > { %26718 = vmatprep.mubr.msk.f32.mxu0 %vm26900_vm3, %v29530_v50  ;;  %26704 = vmatmul.mubr.f32.vlgmr.msra.gmra.mxu1 %v29065_v7 }
 0x630   : > { %26712 = vmatpush3.msra.mxu1 %v29117_v32  ;;  %26719 = vmatmul.mubr.f32.vlgmr.msra.gmra.mxu0 %v29065_v7 }
 0x631   : > { %21890 = vmatpush1.msra.mxu0 %v29155_v18  ;;  %26713 = vmatprep.mubr.msk.f32.mxu1 %vm26900_vm3, %v29530_v50 }
 0x632   : > { %22049 = vmatprep.subr.mxu0 %v21966_v59  ;;  %26721 = vmatprep.subr.mxu1 %v29530_v50 }
 0x633   : > { %21923 = vmatprep.mubr.f32.mxu0 %v29530_v50  ;;  %26714 = vmatmul.mubr.f32.vlgmr.msra.gmra.mxu1 %v29092_v23  ;;  %v23706_v23 = vpop.permute.xlu1 %23705 }
 0x634   : > { %26722 = vmatpush3.msra.mxu1 %v29117_v32  ;;  %21929 = vmatmul.mubr.f32.vlgmr.msra.gmra.mxu0 %v21928_v29  ;;  %v23710_v41 = vsel %vm6910_vm9, %v23706_v23, %v29272_v30 }
 0x635   : > { %22052 = vmatpush1.msra.mxu0 %v21972_v56  ;;  %21970 = vmatprep.subr.mxu1 %v21969_v57  ;;  %v29290_v16 = vand.u32 4294901760, %v23710_v41  ;;  %v24636_v56 = vpop.permute.xlu0 %24635 }
 0x636   : > { %22203 = vmatprep.subr.mxu0 %v21967_v2  ;;  %26723 = vmatprep.mubr.msk.f32.mxu1 %vm26900_vm3, %v29530_v50 }
 0x637   : > { %22085 = vmatprep.mubr.f32.mxu0 %v29530_v50  ;;  %26724 = vmatmul.mubr.f32.vlgmr.msra.gmra.mxu1 %v29065_v7  ;;  %v22902_v7 = vsub.f32 %v22779_v10, %v29228_v61  ;;  %v23704_v32 = vpop.permute.xlu1 %23703  ;;  %v23826_v33 = vsub.f32 %v23710_v41, %v29290_v16 }
 0x638   : > { %21976 = vmatpush1.msra.mxu1 %v21975_v39  ;;  %22088 = vmatmul.mubr.f32.vlgmr.msra.gmra.mxu0 %v29151_v24  ;;  %v23709_v48 = vsel %vm6910_vm9, %v23704_v32, %v23706_v23 }
 0x639   : > { %22207 = vmatpush1.msra.mxu0 %v21973_v15  ;;  %22125 = vmatprep.subr.mxu1 %v29144_v22  ;;  %v22903_v0 = vand.u32 4294901760, %v22902_v7  ;;  %v29301_v11 = vand.u32 4294901760, %v23709_v48  ;;  %v23827_v58 = vand.u32 4294901760, %v23826_v33 }
 0x63a   : > { %22009 = vmatprep.mubr.f32.mxu1 %v29530_v50  ;;  %22240 = vmatprep.mubr.f32.mxu0 %v29530_v50 }
 0x63b   : > { %26726 = vmatprep.subr.mxu0 %v29530_v50  ;;  %22011 = vmatmul.mubr.f32.vlgmr.msra.gmra.mxu1 %v29138_v43  ;;  %v22904_v12 = vsub.f32 %v22902_v7, %v22903_v0 }
 0x63c   : > { %22127 = vmatpush1.msra.mxu1 %v29155_v18  ;;  %22242 = vmatmul.mubr.f32.vlgmr.msra.gmra.mxu0 %v29138_v43 }
 0x63d   : > { %26727 = vmatpush3.msra.mxu0 %v29190_v1  ;;  %22279 = vmatprep.subr.mxu1 %v29144_v22  ;;  %v22905_v27 = vand.u32 4294901760, %v22904_v12  ;;  %v23787_v22 = vsub.f32 %v29297_v6, %v29311_v21 }
 0x63e   : > { %22160 = vmatprep.mubr.f32.mxu1 %v29530_v50  ;;  %26728 = vmatprep.mubr.msk.f32.mxu0 %vm26900_vm3, %v29530_v50 }
 0x63f   : > { %26736 = vmatprep.subr.mxu0 %v29530_v50  ;;  %22164 = vmatmul.mubr.f32.vlgmr.msra.gmra.mxu1 %v29165_v55  ;;  %v23788_v36 = vand.u32 4294901760, %v23787_v22 }
 0x640   : > { %22281 = vmatpush1.msra.mxu1 %v29155_v18  ;;  %26729 = vmatmul.mubr.f32.vlgmr.msra.gmra.mxu0 %v21928_v29  ;;  %v23828_v18 = vsub.f32 %v23826_v33, %v23827_v58  ;;  %v29350_v29 = vpop.permute.xlu1 %24637 }
 0x641   : > { %26737 = vmatpush3.msra.mxu0 %v22430_v49  ;;  %22314 = vmatprep.mubr.f32.mxu1 %v29530_v50  ;;  %v24640_v35 = vsel %vm7844_vm10, %v24636_v56, %v29350_v29  ;;  %v29370_v49 = vsub.f32 %v24645_v20, %v29357_v40 }
 0x642   : > { %26731 = vmatprep.subr.mxu1 %v29530_v50  ;;  %26738 = vmatprep.mubr.msk.f32.mxu0 %vm26900_vm3, %v29530_v50  ;;  %v23829_v2 = vand.u32 4294901760, %v23828_v18  ;;  %v29362_v57 = vand.u32 4294901760, %v24640_v35 }
 0x643   : > { %26746 = vmatprep.subr.mxu0 %v29530_v50  ;;  %22316 = vmatmul.mubr.f32.vlgmr.msra.gmra.mxu1 %v29138_v43  ;;  %v29384_v52 = vand.u32 4294901760, %v29370_v49 }
 0x644   : > { %26732 = vmatpush3.msra.mxu1 %v22433_v63  ;;  %26739 = vmatmul.mubr.f32.vlgmr.msra.gmra.mxu0 %v29151_v24  ;;  %v24756_v25 = vsub.f32 %v24640_v35, %v29362_v57 }
 0x645   : > { %26747 = vmatpush3.msra.mxu0 %v22431_v54  ;;  %26733 = vmatprep.mubr.msk.f32.mxu1 %vm26900_vm3, %v29530_v50  ;;  %v24717_v10 = vsub.f32 %v29370_v49, %v29384_v52 }
 0x646   : > { %22818 = vmatprep.subr.mxu0 %v29216_v5  ;;  %26741 = vmatprep.subr.mxu1 %v29530_v50 }
 0x647   : > { %26748 = vmatprep.mubr.msk.f32.mxu0 %vm26900_vm3, %v29530_v50  ;;  %26734 = vmatmul.mubr.f32.vlgmr.msra.gmra.mxu1 %v29138_v43  ;;  %v24718_v45 = vand.u32 4294901760, %v24717_v10 }
 0x648   : > { %26742 = vmatpush3.msra.mxu1 %v29190_v1  ;;  %26749 = vmatmul.mubr.f32.vlgmr.msra.gmra.mxu0 %v29138_v43 }
 0x649   : > { %22820 = vmatpush1.msra.mxu0 %v29228_v61  ;;  %26743 = vmatprep.mubr.msk.f32.mxu1 %vm26900_vm3, %v29530_v50 }
 0x64a   : > { %22979 = vmatprep.subr.mxu0 %v22896_v44  ;;  %26751 = vmatprep.subr.mxu1 %v29530_v50  ;;  %v29409_v44 = vand.u32 4294901760, %v29350_v29 }
 0x64b   : > { %22853 = vmatprep.mubr.f32.mxu0 %v29530_v50  ;;  %26744 = vmatmul.mubr.f32.vlgmr.msra.gmra.mxu1 %v29165_v55  ;;  %v29336_v55 = vand.u32 4294901760, %v29272_v30 }
 0x64c   : > { %26752 = vmatpush3.msra.mxu1 %v29190_v1  ;;  %22859 = vmatmul.mubr.f32.vlgmr.msra.gmra.mxu0 %v22858_v51  ;;  %v24634_v1 = vpop.permute.xlu0 %24633  ;;  %v25220_v26 = vsub.f32 %v29350_v29, %v29409_v44 }
 0x64d   : > { %22982 = vmatpush1.msra.mxu0 %v22902_v7  ;;  %22900 = vmatprep.subr.mxu1 %v22899_v34  ;;  %v24290_v15 = vsub.f32 %v29272_v30, %v29336_v55  ;;  %v24639_v19 = vsel %vm7844_vm10, %v24634_v1, %v24636_v56 }
 0x64e   : > { %23133 = vmatprep.subr.mxu0 %v22897_v37  ;;  %26753 = vmatprep.mubr.msk.f32.mxu1 %vm26900_vm3, %v29530_v50  ;;  %v29374_v39 = vand.u32 4294901760, %v24639_v19 }
 0x64f   : > { %23015 = vmatprep.mubr.f32.mxu0 %v29530_v50  ;;  %26754 = vmatmul.mubr.f32.vlgmr.msra.gmra.mxu1 %v29138_v43  ;;  %v23832_v43 = vsub.f32 %v23709_v48, %v29301_v11  ;;  %v24291_v13 = vand.u32 4294901760, %v24290_v15 }
 0x650   : > { %22906 = vmatpush1.msra.mxu1 %v22905_v27  ;;  %23018 = vmatmul.mubr.f32.vlgmr.msra.gmra.mxu0 %v29224_v46 }
 0x651   : > { %23137 = vmatpush1.msra.mxu0 %v22903_v0  ;;  %23055 = vmatprep.subr.mxu1 %v29216_v5  ;;  %v23833_v24 = vand.u32 4294901760, %v23832_v43  ;;  %v24292_v8 = vsub.f32 %v24290_v15, %v24291_v13 }
 0x652   : > { %22939 = vmatprep.mubr.f32.mxu1 %v29530_v50  ;;  %23170 = vmatprep.mubr.f32.mxu0 %v29530_v50 }
 0x653   : > { %26756 = vmatprep.subr.mxu0 %v29530_v50  ;;  %22941 = vmatmul.mubr.f32.vlgmr.msra.gmra.mxu1 %v29211_v60  ;;  %v23834_v59 = vsub.f32 %v23832_v43, %v23833_v24  ;;  %v24293_v54 = vand.u32 4294901760, %v24292_v8 }
 0x654   : > { %23057 = vmatpush1.msra.mxu1 %v29228_v61  ;;  %23172 = vmatmul.mubr.f32.vlgmr.msra.gmra.mxu0 %v29211_v60 }
 0x655   : > { %26757 = vmatpush3.msra.mxu0 %v29263_v4  ;;  %23209 = vmatprep.subr.mxu1 %v29216_v5  ;;  %v23835_v38 = vand.u32 4294901760, %v23834_v59  ;;  %v24757_v5 = vand.u32 4294901760, %v24756_v25 }
 0x656   : > { %23090 = vmatprep.mubr.f32.mxu1 %v29530_v50  ;;  %26758 = vmatprep.mubr.msk.f32.mxu0 %vm26900_vm3, %v29530_v50 }
 0x657   : > { %26766 = vmatprep.subr.mxu0 %v29530_v50  ;;  %23094 = vmatmul.mubr.f32.vlgmr.msra.gmra.mxu1 %v29238_v42 }
 0x658   : > { %23211 = vmatpush1.msra.mxu1 %v29228_v61  ;;  %26759 = vmatmul.mubr.f32.vlgmr.msra.gmra.mxu0 %v22858_v51  ;;  %v24758_v61 = vsub.f32 %v24756_v25, %v24757_v5 }
 0x659   : > { %26767 = vmatpush3.msra.mxu0 %v23360_v3  ;;  %23244 = vmatprep.mubr.f32.mxu1 %v29530_v50 }
 0x65a   : > { %26761 = vmatprep.subr.mxu1 %v29530_v50  ;;  %26768 = vmatprep.mubr.msk.f32.mxu0 %vm26900_vm3, %v29530_v50  ;;  %v24759_v63 = vand.u32 4294901760, %v24758_v61 }
 0x65b   : > { %26776 = vmatprep.subr.mxu0 %v29530_v50  ;;  %23246 = vmatmul.mubr.f32.vlgmr.msra.gmra.mxu1 %v29211_v60 }
 0x65c   : > { %26762 = vmatpush3.msra.mxu1 %v23363_v47  ;;  %26769 = vmatmul.mubr.f32.vlgmr.msra.gmra.mxu0 %v29224_v46 }
 0x65d   : > { %26777 = vmatpush3.msra.mxu0 %v23361_v62  ;;  %26763 = vmatprep.mubr.msk.f32.mxu1 %vm26900_vm3, %v29530_v50 }
 0x65e   : > { %23748 = vmatprep.subr.mxu0 %v29290_v16  ;;  %26771 = vmatprep.subr.mxu1 %v29530_v50 }
 0x65f   : > { %26778 = vmatprep.mubr.msk.f32.mxu0 %vm26900_vm3, %v29530_v50  ;;  %26764 = vmatmul.mubr.f32.vlgmr.msra.gmra.mxu1 %v29211_v60 }
 0x660   : > { %26772 = vmatpush3.msra.mxu1 %v29263_v4  ;;  %26779 = vmatmul.mubr.f32.vlgmr.msra.gmra.mxu0 %v29211_v60 }
 0x661   : > { %23750 = vmatpush1.msra.mxu0 %v29301_v11  ;;  %26773 = vmatprep.mubr.msk.f32.mxu1 %vm26900_vm3, %v29530_v50 }
 0x662   : > { %23909 = vmatprep.subr.mxu0 %v23826_v33  ;;  %26781 = vmatprep.subr.mxu1 %v29530_v50 }
 0x663   : > { %23783 = vmatprep.mubr.f32.mxu0 %v29530_v50  ;;  %26774 = vmatmul.mubr.f32.vlgmr.msra.gmra.mxu1 %v29238_v42 }
 0x664   : > { %26782 = vmatpush3.msra.mxu1 %v29263_v4  ;;  %23789 = vmatmul.mubr.f32.vlgmr.msra.gmra.mxu0 %v23788_v36  ;;  %v25221_v4 = vand.u32 4294901760, %v25220_v26 }
 0x665   : > { %23912 = vmatpush1.msra.mxu0 %v23832_v43  ;;  %23830 = vmatprep.subr.mxu1 %v23829_v2 }
 0x666   : > { %24063 = vmatprep.subr.mxu0 %v23827_v58  ;;  %26783 = vmatprep.mubr.msk.f32.mxu1 %vm26900_vm3, %v29530_v50  ;;  %v25222_v27 = vsub.f32 %v25220_v26, %v25221_v4 }
 0x667   : > { %23945 = vmatprep.mubr.f32.mxu0 %v29530_v50  ;;  %26784 = vmatmul.mubr.f32.vlgmr.msra.gmra.mxu1 %v29211_v60  ;;  %v24762_v60 = vsub.f32 %v24639_v19, %v29374_v39 }
 0x668   : > { %23836 = vmatpush1.msra.mxu1 %v23835_v38  ;;  %23948 = vmatmul.mubr.f32.vlgmr.msra.gmra.mxu0 %v29297_v6  ;;  %v25223_v17 = vand.u32 4294901760, %v25222_v27 }
 0x669   : > { %24067 = vmatpush1.msra.mxu0 %v23833_v24  ;;  %23985 = vmatprep.subr.mxu1 %v29290_v16  ;;  %v24763_v46 = vand.u32 4294901760, %v24762_v60 }
 0x66a   : > { %23869 = vmatprep.mubr.f32.mxu1 %v29530_v50  ;;  %24100 = vmatprep.mubr.f32.mxu0 %v29530_v50 }
 0x66b   : > { %26786 = vmatprep.subr.mxu0 %v29530_v50  ;;  %23871 = vmatmul.mubr.f32.vlgmr.msra.gmra.mxu1 %v29284_v14  ;;  %v24764_v42 = vsub.f32 %v24762_v60, %v24763_v46 }
 0x66c   : > { %23987 = vmatpush1.msra.mxu1 %v29301_v11  ;;  %24102 = vmatmul.mubr.f32.vlgmr.msra.gmra.mxu0 %v29284_v14 }
 0x66d   : > { %26787 = vmatpush3.msra.mxu0 %v29336_v55  ;;  %24139 = vmatprep.subr.mxu1 %v29290_v16  ;;  %v24765_v0 = vand.u32 4294901760, %v24764_v42 }
 0x66e   : > { %24020 = vmatprep.mubr.f32.mxu1 %v29530_v50  ;;  %26788 = vmatprep.mubr.msk.f32.mxu0 %vm26900_vm3, %v29530_v50 }
 0x66f   : > { %26796 = vmatprep.subr.mxu0 %v29530_v50  ;;  %24024 = vmatmul.mubr.f32.vlgmr.msra.gmra.mxu1 %v29311_v21 }
 0x670   : > { %24141 = vmatpush1.msra.mxu1 %v29301_v11  ;;  %26789 = vmatmul.mubr.f32.vlgmr.msra.gmra.mxu0 %v23788_v36 }
 0x671   : > { %26797 = vmatpush3.msra.mxu0 %v24290_v15  ;;  %24174 = vmatprep.mubr.f32.mxu1 %v29530_v50 }
 0x672   : > { %26791 = vmatprep.subr.mxu1 %v29530_v50  ;;  %26798 = vmatprep.mubr.msk.f32.mxu0 %vm26900_vm3, %v29530_v50 }
 0x673   : > { %26806 = vmatprep.subr.mxu0 %v29530_v50  ;;  %24176 = vmatmul.mubr.f32.vlgmr.msra.gmra.mxu1 %v29284_v14 }
 0x674   : > { %26792 = vmatpush3.msra.mxu1 %v24293_v54  ;;  %26799 = vmatmul.mubr.f32.vlgmr.msra.gmra.mxu0 %v29297_v6 }
 0x675   : > { %26807 = vmatpush3.msra.mxu0 %v24291_v13  ;;  %26793 = vmatprep.mubr.msk.f32.mxu1 %vm26900_vm3, %v29530_v50 }
 0x676   : > { %24678 = vmatprep.subr.mxu0 %v29362_v57  ;;  %26801 = vmatprep.subr.mxu1 %v29530_v50 }
 0x677   : > { %26808 = vmatprep.mubr.msk.f32.mxu0 %vm26900_vm3, %v29530_v50  ;;  %26794 = vmatmul.mubr.f32.vlgmr.msra.gmra.mxu1 %v29284_v14 }
 0x678   : > { %26802 = vmatpush3.msra.mxu1 %v29336_v55  ;;  %26809 = vmatmul.mubr.f32.vlgmr.msra.gmra.mxu0 %v29284_v14 }
 0x679   : > { %24680 = vmatpush1.msra.mxu0 %v29374_v39  ;;  %26803 = vmatprep.mubr.msk.f32.mxu1 %vm26900_vm3, %v29530_v50 }
 0x67a   : > { %24839 = vmatprep.subr.mxu0 %v24756_v25  ;;  %26811 = vmatprep.subr.mxu1 %v29530_v50 }
 0x67b   : > { %24713 = vmatprep.mubr.f32.mxu0 %v29530_v50  ;;  %v17299_v7 = vpop.f32.mrf.mxu0  ;;  %26804 = vmatmul.mubr.f32.vlgmr.msra.gmra.mxu1 %v29311_v21 }
 0x67c   : > { %26812 = vmatpush3.msra.mxu1 %v29336_v55  ;;  %24719 = vmatmul.mubr.f32.vlgmr.msra.gmra.mxu0 %v24718_v45 }
 0x67d   : > { %24842 = vmatpush1.msra.mxu0 %v24762_v60  ;;  %24760 = vmatprep.subr.mxu1 %v24759_v63  ;;  %v17301_v37 = vpop.f32.mrf.mxu0 }
 0x67e   : > { %24993 = vmatprep.subr.mxu0 %v24757_v5  ;;  %26813 = vmatprep.mubr.msk.f32.mxu1 %vm26900_vm3, %v29530_v50 }
 0x67f   : > { %24875 = vmatprep.mubr.f32.mxu0 %v29530_v50  ;;  %v17458_v28 = vpop.f32.mrf.mxu0  ;;  %26814 = vmatmul.mubr.f32.vlgmr.msra.gmra.mxu1 %v29284_v14 }
 0x680   : > { %24766 = vmatpush1.msra.mxu1 %v24765_v0  ;;  %24878 = vmatmul.mubr.f32.vlgmr.msra.gmra.mxu0 %v29370_v49 }
 0x681   : > { %24997 = vmatpush1.msra.mxu0 %v24763_v46  ;;  %24915 = vmatprep.subr.mxu1 %v29362_v57  ;;  %v17460_v51 = vpop.f32.mrf.mxu0 }
 0x682   : > { %24799 = vmatprep.mubr.f32.mxu1 %v29530_v50  ;;  %25030 = vmatprep.mubr.f32.mxu0 %v29530_v50 }
 0x683   : > { %26816 = vmatprep.subr.mxu0 %v29530_v50  ;;  %v17381_v23 = vpop.f32.mrf.mxu1  ;;  %24801 = vmatmul.mubr.f32.vlgmr.msra.gmra.mxu1 %v29357_v40 }
 0x684   : > { %v17382_v12 = vadd.f32 %v17381_v23, %v17299_v7  ;;  %v17612_v31 = vpop.f32.mrf.mxu0  ;;  %24917 = vmatpush1.msra.mxu1 %v29374_v39  ;;  %25032 = vmatmul.mubr.f32.vlgmr.msra.gmra.mxu0 %v29357_v40 }
 0x685   : > { %26817 = vmatpush3.msra.mxu0 %v29409_v44  ;;  %25069 = vmatprep.subr.mxu1 %v29362_v57  ;;  %v17383_v34 = vpop.f32.mrf.mxu1 }
 0x686   : > { %v17384_v30 = vadd.f32 %v17383_v34, %v17301_v37  ;;  %v17614_v53 = vpop.f32.mrf.mxu0  ;;  %24950 = vmatprep.mubr.f32.mxu1 %v29530_v50  ;;  %26818 = vmatprep.mubr.msk.f32.mxu0 %vm26900_vm3, %v29530_v50  ;;  %v17459_v3 = vadd.f32 %v17458_v28, %v17382_v12 }
 0x687   : > { %26826 = vmatprep.subr.mxu0 %v29530_v50  ;;  %v17534_v32 = vpop.f32.mrf.mxu1  ;;  %24954 = vmatmul.mubr.f32.vlgmr.msra.gmra.mxu1 %v29384_v52 }
 0x688   : > { %v17535_v41 = vadd.f32 %v17534_v32, %v17459_v3  ;;  %v17763_v14 = vpop.f32.mrf.mxu0  ;;  %25071 = vmatpush1.msra.mxu1 %v29374_v39  ;;  %26819 = vmatmul.mubr.f32.vlgmr.msra.gmra.mxu0 %v24718_v45  ;;  %v17461_v62 = vadd.f32 %v17460_v51, %v17384_v30 }
 0x689   : > { %26827 = vmatpush3.msra.mxu0 %v25220_v26  ;;  %v17536_v48 = vpop.f32.mrf.mxu1  ;;  %25104 = vmatprep.mubr.f32.mxu1 %v29530_v50 }
 0x68a   : > { %v17537_v16 = vadd.f32 %v17536_v48, %v17461_v62  ;;  %v26580_v6 = vpop.f32.mrf.mxu0  ;;  %26821 = vmatprep.subr.mxu1 %v29530_v50  ;;  %26828 = vmatprep.mubr.msk.f32.mxu0 %vm26900_vm3, %v29530_v50  ;;  %v17613_v11 = vadd.f32 %v17612_v31, %v17535_v41 }
 0x68b   : > { %26836 = vmatprep.subr.mxu0 %v29530_v50  ;;  %v17686_v33 = vpop.f32.mrf.mxu1  ;;  %25106 = vmatmul.mubr.f32.vlgmr.msra.gmra.mxu1 %v29357_v40 }
 0x68c   : > { %v17687_v21 = vadd.f32 %v17686_v33, %v17613_v11  ;;  %v17913_v43 = vpop.f32.mrf.mxu0  ;;  %26822 = vmatpush3.msra.mxu1 %v25223_v17  ;;  %26829 = vmatmul.mubr.f32.vlgmr.msra.gmra.mxu0 %v29370_v49  ;;  %v17615_v47 = vadd.f32 %v17614_v53, %v17537_v16 }
 0x68d   : > { %26837 = vmatpush3.msra.mxu0 %v25221_v4  ;;  %v17688_v58 = vpop.f32.mrf.mxu1  ;;  %26823 = vmatprep.mubr.msk.f32.mxu1 %vm26900_vm3, %v29530_v50 }
 0x68e   : > { %v17689_v22 = vadd.f32 %v17688_v58, %v17615_v47  ;;  %v26590_v24 = vpop.f32.mrf.mxu0  ;;  %26831 = vmatprep.subr.mxu1 %v29530_v50  ;;  %26838 = vmatprep.mubr.msk.f32.mxu0 %vm26900_vm3, %v29530_v50 }
 0x68f   : > { %v17839_v18 = vpop.f32.mrf.mxu1  ;;  %26824 = vmatmul.mubr.f32.vlgmr.msra.gmra.mxu1 %v29357_v40 }
 0x690   : > { %v17840_v36 = vadd.f32 %v17839_v18, %v17763_v14  ;;  %v18061_v59 = vpop.f32.mrf.mxu0  ;;  %26832 = vmatpush3.msra.mxu1 %v29409_v44  ;;  %26833 = vmatprep.mubr.msk.f32.mxu1 %vm26900_vm3, %v29530_v50 }
 0x691   : > { %v26585_v55 = vpop.f32.mrf.mxu1  ;;  %26841 = vmatprep.subr.mxu1 %v29530_v50  ;;  %26839 = vmatmul.mubr.f32.vlgmr.msra.gmra.mxu0 %v29357_v40 }
 0x692   : > { %v26600_v56 = vpop.f32.mrf.mxu0  ;;  %v17914_v9 = vadd.f32 %v17913_v43, %v17840_v36 }
 0x693   : > { %v17987_v2 = vpop.f32.mrf.mxu1  ;;  %26834 = vmatmul.mubr.f32.vlgmr.msra.gmra.mxu1 %v29384_v52 }
 0x694   : > { %v17988_v20 = vadd.f32 %v17987_v2, %v17914_v9  ;;  %v18213_v15 = vpop.f32.mrf.mxu0  ;;  %26842 = vmatpush3.msra.mxu1 %v29409_v44  ;;  %26843 = vmatprep.mubr.msk.f32.mxu1 %vm26900_vm3, %v29530_v50 }
 0x695   : > { %v18214_v38 = vadd.f32 %v18213_v15, %v17687_v21  ;;  %v26595_v29 = vpop.f32.mrf.mxu1 }
 0x696   : > { %v18215_v35 = vpop.f32.mrf.mxu0  ;;  %v18062_v1 = vadd.f32 %v18061_v59, %v17988_v20 }
 0x697   : > { %v18216_v13 = vadd.f32 %v18215_v35, %v17689_v22  ;;  %v18133_v57 = vpop.f32.mrf.mxu1  ;;  %26844 = vmatmul.mubr.f32.vlgmr.msra.gmra.mxu1 %v29357_v40 }
 0x698   : > { %v18134_v19 = vadd.f32 %v18133_v57, %v18062_v1  ;;  %v18372_v49 = vpop.f32.mrf.mxu0 }
 0x699   : > { %v26605_v39 = vpop.f32.mrf.mxu1 }
 0x69a   : > { %v18374_v8 = vpop.f32.mrf.mxu0 }
 0x69b   : > { %v18295_v25 = vpop.f32.mrf.mxu1 }
 0x69c   : > { %v18296_v52 = vadd.f32 %v18295_v25, %v18214_v38  ;;  %v18526_v60 = vpop.f32.mrf.mxu0 }
 0x69d   : > { %v18297_v54 = vpop.f32.mrf.mxu1 }
 0x69e   : > { %v18298_v5 = vadd.f32 %v18297_v54, %v18216_v13  ;;  %v18528_v10 = vpop.f32.mrf.mxu0  ;;  %v18373_v46 = vadd.f32 %v18372_v49, %v18296_v52 }
 0x69f   : > { %v18448_v50 = vpop.f32.mrf.mxu1 }
 0x6a0   : > { %v18449_v61 = vadd.f32 %v18448_v50, %v18373_v46  ;;  %v18677_v45 = vpop.f32.mrf.mxu0  ;;  %v18375_v44 = vadd.f32 %v18374_v8, %v18298_v5 }
 0x6a1   : > { %v18678_v42 = vadd.f32 %v18677_v45, %v18134_v19  ;;  %v18450_v7 = vpop.f32.mrf.mxu1 }
 0x6a2   : > { %v18451_v63 = vadd.f32 %v18450_v7, %v18375_v44  ;;  %v18527_v37 = vadd.f32 %v18526_v60, %v18449_v61  ;;  %v26610_v40 = vpop.f32.mrf.mxu0 }
 0x6a3   : > { %v18600_v26 = vpop.f32.mrf.mxu1 }
 0x6a4   : > { %v18601_v0 = vadd.f32 %v18600_v26, %v18527_v37  ;;  %v18529_v28 = vadd.f32 %v18528_v10, %v18451_v63  ;;  %v18827_v51 = vpop.f32.mrf.mxu0 }
 0x6a5   : > { %v18602_v4 = vpop.f32.mrf.mxu1 }
 0x6a6   : > { %v18603_v23 = vadd.f32 %v18602_v4, %v18529_v28  ;;  %v26620_v12 = vpop.f32.mrf.mxu0 }
 0x6a7   : > { %v18753_v31 = vpop.f32.mrf.mxu1 }
 0x6a8   : > { %v18754_v34 = vadd.f32 %v18753_v31, %v18678_v42  ;;  %v18975_v30 = vpop.f32.mrf.mxu0 }
 0x6a9   : > { %v26615_v53 = vpop.f32.mrf.mxu1 }
 0x6aa   : > { %v18828_v3 = vadd.f32 %v18827_v51, %v18754_v34  ;;  %v26630_v27 = vpop.f32.mrf.mxu0 }
 0x6ab   : > { %v18901_v32 = vpop.f32.mrf.mxu1 }
 0x6ac   : > { %v18902_v41 = vadd.f32 %v18901_v32, %v18828_v3  ;;  %v19140_v14 = vpop.f32.mrf.mxu0 }
 0x6ad   : > { %v26625_v62 = vpop.f32.mrf.mxu1 }
 0x6ae   : > { %v18976_v48 = vadd.f32 %v18975_v30, %v18902_v41  ;;  %v19142_v16 = vpop.f32.mrf.mxu0 }
 0x6af   : > { %v19047_v6 = vpop.f32.mrf.mxu1 }
 0x6b0   : > { %v19048_v11 = vadd.f32 %v19047_v6, %v18976_v48  ;;  %v19299_v17 = vpop.f32.mrf.mxu0 }
 0x6b1   : > { %v26635_v33 = vpop.f32.mrf.mxu1 }
 0x6b2   : > { %v19301_v21 = vpop.f32.mrf.mxu0 }
 0x6b3   : > { %v19222_v43 = vpop.f32.mrf.mxu1 }
 0x6b4   : > { %v19223_v47 = vadd.f32 %v19222_v43, %v19140_v14  ;;  %v19453_v58 = vpop.f32.mrf.mxu0 }
 0x6b5   : > { %v19224_v22 = vpop.f32.mrf.mxu1 }
 0x6b6   : > { %v19225_v24 = vadd.f32 %v19224_v22, %v19142_v16  ;;  %v19300_v18 = vadd.f32 %v19299_v17, %v19223_v47  ;;  %v19455_v36 = vpop.f32.mrf.mxu0 }
 0x6b7   : > { %v19375_v59 = vpop.f32.mrf.mxu1 }
 0x6b8   : > { %v19302_v55 = vadd.f32 %v19301_v21, %v19225_v24  ;;  %v19376_v56 = vadd.f32 %v19375_v59, %v19300_v18  ;;  %v19604_v9 = vpop.f32.mrf.mxu0 }
 0x6b9   : > { %v19377_v2 = vpop.f32.mrf.mxu1 }
 0x6ba   : > { %v19378_v20 = vadd.f32 %v19377_v2, %v19302_v55  ;;  %v19454_v15 = vadd.f32 %v19453_v58, %v19376_v56  ;;  %v26640_v38 = vpop.f32.mrf.mxu0 }
 0x6bb   : > { %v19527_v29 = vpop.f32.mrf.mxu1 }
 0x6bc   : > { %v19456_v35 = vadd.f32 %v19455_v36, %v19378_v20  ;;  %v19528_v1 = vadd.f32 %v19527_v29, %v19454_v15  ;;  %v19754_v13 = vpop.f32.mrf.mxu0 }
 0x6bd   : > { %v19529_v57 = vpop.f32.mrf.mxu1 }
 0x6be   : > { %v19978_v19 = vadd.f32 %v19528_v1, %v18601_v0  ;;  %v19530_v49 = vadd.f32 %v19529_v57, %v19456_v35  ;;  %v26650_v39 = vpop.f32.mrf.mxu0 }
 0x6bf   : > { %v19680_v8 = vpop.f32.mrf.mxu1 }
 0x6c0   : > { %v19979_v25 = vadd.f32 %v19530_v49, %v18603_v23  ;;  %v19681_v52 = vadd.f32 %v19680_v8, %v19604_v9  ;;  %v19902_v60 = vpop.f32.mrf.mxu0 }
 0x6c1   : > { %v26645_v54 = vpop.f32.mrf.mxu1 }
 0x6c2   : > { %v19755_v5 = vadd.f32 %v19754_v13, %v19681_v52  ;;  %v26660_v10 = vpop.f32.mrf.mxu0 }
 0x6c3   : > { %v19828_v46 = vpop.f32.mrf.mxu1 }
 0x6c4   : > { %v19829_v50 = vadd.f32 %v19828_v46, %v19755_v5  ;;  %v20070_v61 = vpop.f32.mrf.mxu0 }
 0x6c5   : > { %v26655_v45 = vpop.f32.mrf.mxu1 }
 0x6c6   : > { %v19903_v44 = vadd.f32 %v19902_v60, %v19829_v50  ;;  %v20072_v42 = vpop.f32.mrf.mxu0 }
 0x6c7   : > { %v19974_v7 = vpop.f32.mrf.mxu1 }
 0x6c8   : > { %v19975_v63 = vadd.f32 %v19974_v7, %v19903_v44  ;;  %v20229_v37 = vpop.f32.mrf.mxu0 }
 0x6c9   : > { %v26665_v40 = vpop.f32.mrf.mxu1 }
 0x6ca   : > { %v19980_v26 = vadd.f32 %v19975_v63, %v19048_v11  ;;  %v20231_v0 = vpop.f32.mrf.mxu0 }
 0x6cb   : > { %v20152_v28 = vpop.f32.mrf.mxu1 }
 0x6cc   : > { %v20153_v51 = vadd.f32 %v20152_v28, %v20070_v61  ;;  %v20383_v4 = vpop.f32.mrf.mxu0 }
 0x6cd   : > { %v20154_v23 = vpop.f32.mrf.mxu1 }
 0x6ce   : > { %v20155_v12 = vadd.f32 %v20154_v23, %v20072_v42  ;;  %v20230_v31 = vadd.f32 %v20229_v37, %v20153_v51  ;;  %v20385_v34 = vpop.f32.mrf.mxu0 }
 0x6cf   : > { %v20305_v30 = vpop.f32.mrf.mxu1 }
 0x6d0   : > { %v20232_v53 = vadd.f32 %v20231_v0, %v20155_v12  ;;  %v20306_v3 = vadd.f32 %v20305_v30, %v20230_v31  ;;  %v20534_v27 = vpop.f32.mrf.mxu0 }
 0x6d1   : > { %v20307_v32 = vpop.f32.mrf.mxu1 }
 0x6d2   : > { %v20308_v41 = vadd.f32 %v20307_v32, %v20232_v53  ;;  %v20384_v14 = vadd.f32 %v20383_v4, %v20306_v3  ;;  %v26670_v62 = vpop.f32.mrf.mxu0 }
 0x6d3   : > { %v20457_v48 = vpop.f32.mrf.mxu1 }
 0x6d4   : > { %v20386_v16 = vadd.f32 %v20385_v34, %v20308_v41  ;;  %v20458_v6 = vadd.f32 %v20457_v48, %v20384_v14  ;;  %v20684_v11 = vpop.f32.mrf.mxu0 }
 0x6d5   : > { %v20459_v17 = vpop.f32.mrf.mxu1 }
 0x6d6   : > { %v20908_v33 = vadd.f32 %v20458_v6, %v19978_v19  ;;  %v20460_v21 = vadd.f32 %v20459_v17, %v20386_v16  ;;  %v26680_v43 = vpop.f32.mrf.mxu0 }
 0x6d7   : > { %v20610_v47 = vpop.f32.mrf.mxu1 }
 0x6d8   : > { %v20909_v58 = vadd.f32 %v20460_v21, %v19979_v25  ;;  %v20611_v22 = vadd.f32 %v20610_v47, %v20534_v27  ;;  %v20832_v24 = vpop.f32.mrf.mxu0 }
 0x6d9   : > { %v26675_v18 = vpop.f32.mrf.mxu1 }
 0x6da   : > { %v20685_v36 = vadd.f32 %v20684_v11, %v20611_v22  ;;  %v26690_v59 = vpop.f32.mrf.mxu0 }
 0x6db   : > { %v20758_v55 = vpop.f32.mrf.mxu1 }
 0x6dc   : > { %v20759_v56 = vadd.f32 %v20758_v55, %v20685_v36  ;;  %v21000_v9 = vpop.f32.mrf.mxu0 }
 0x6dd   : > { %v26685_v2 = vpop.f32.mrf.mxu1 }
 0x6de   : > { %v20833_v20 = vadd.f32 %v20832_v24, %v20759_v56  ;;  %v21002_v15 = vpop.f32.mrf.mxu0 }
 0x6df   : > { %v20904_v38 = vpop.f32.mrf.mxu1 }
 0x6e0   : > { %v20905_v29 = vadd.f32 %v20904_v38, %v20833_v20  ;;  %v21159_v35 = vpop.f32.mrf.mxu0 }
 0x6e1   : > { %v26695_v1 = vpop.f32.mrf.mxu1 }
 0x6e2   : > { %v20910_v13 = vadd.f32 %v20905_v29, %v19980_v26  ;;  %v21161_v57 = vpop.f32.mrf.mxu0 }
 0x6e3   : > { %v21082_v19 = vpop.f32.mrf.mxu1 }
 0x6e4   : > { %v21083_v49 = vadd.f32 %v21082_v19, %v21000_v9  ;;  %v21313_v39 = vpop.f32.mrf.mxu0 }
 0x6e5   : > { %v21084_v8 = vpop.f32.mrf.mxu1 }
 0x6e6   : > { %v21085_v25 = vadd.f32 %v21084_v8, %v21002_v15  ;;  %v21160_v52 = vadd.f32 %v21159_v35, %v21083_v49  ;;  %v21315_v60 = vpop.f32.mrf.mxu0 }
 0x6e7   : > { %v21235_v54 = vpop.f32.mrf.mxu1 }
 0x6e8   : > { %v21162_v5 = vadd.f32 %v21161_v57, %v21085_v25  ;;  %v21236_v10 = vadd.f32 %v21235_v54, %v21160_v52  ;;  %v21464_v46 = vpop.f32.mrf.mxu0 }
 0x6e9   : > { %v21237_v50 = vpop.f32.mrf.mxu1 }
 0x6ea   : > { %v21238_v61 = vadd.f32 %v21237_v50, %v21162_v5  ;;  %v21314_v45 = vadd.f32 %v21313_v39, %v21236_v10  ;;  %v26700_v44 = vpop.f32.mrf.mxu0 }
 0x6eb   : > { %v21387_v42 = vpop.f32.mrf.mxu1 }
 0x6ec   : > { %v21316_v7 = vadd.f32 %v21315_v60, %v21238_v61  ;;  %v21388_v63 = vadd.f32 %v21387_v42, %v21314_v45  ;;  %v21614_v37 = vpop.f32.mrf.mxu0 }
 0x6ed   : > { %v21389_v40 = vpop.f32.mrf.mxu1 }
 0x6ee   : > { %v21838_v26 = vadd.f32 %v21388_v63, %v20908_v33  ;;  %v21390_v0 = vadd.f32 %v21389_v40, %v21316_v7  ;;  %v26710_v28 = vpop.f32.mrf.mxu0 }
 0x6ef   : > { %v21540_v51 = vpop.f32.mrf.mxu1 }
 0x6f0   : > { %v21839_v4 = vadd.f32 %v21390_v0, %v20909_v58  ;;  %v21541_v23 = vadd.f32 %v21540_v51, %v21464_v46  ;;  %v21762_v12 = vpop.f32.mrf.mxu0 }
 0x6f1   : > { %v26705_v31 = vpop.f32.mrf.mxu1 }
 0x6f2   : > { %v21615_v34 = vadd.f32 %v21614_v37, %v21541_v23  ;;  %v26720_v30 = vpop.f32.mrf.mxu0 }
 0x6f3   : > { %v21688_v53 = vpop.f32.mrf.mxu1 }
 0x6f4   : > { %v21689_v3 = vadd.f32 %v21688_v53, %v21615_v34  ;;  %v21930_v27 = vpop.f32.mrf.mxu0 }
 0x6f5   : > { %v26715_v32 = vpop.f32.mrf.mxu1 }
 0x6f6   : > { %v21763_v41 = vadd.f32 %v21762_v12, %v21689_v3  ;;  %v21932_v14 = vpop.f32.mrf.mxu0 }
 0x6f7   : > { %v21834_v62 = vpop.f32.mrf.mxu1 }
 0x6f8   : > { %v21835_v48 = vadd.f32 %v21834_v62, %v21763_v41  ;;  %v22089_v16 = vpop.f32.mrf.mxu0 }
 0x6f9   : > { %v26725_v6 = vpop.f32.mrf.mxu1 }
 0x6fa   : > { %v21840_v11 = vadd.f32 %v21835_v48, %v20910_v13  ;;  %v22091_v17 = vpop.f32.mrf.mxu0 }
 0x6fb   : > { %v22012_v33 = vpop.f32.mrf.mxu1 }
 0x6fc   : > { %v22013_v21 = vadd.f32 %v22012_v33, %v21930_v27  ;;  %v22243_v43 = vpop.f32.mrf.mxu0 }
 0x6fd   : > { %v22014_v47 = vpop.f32.mrf.mxu1 }
 0x6fe   : > { %v22015_v58 = vadd.f32 %v22014_v47, %v21932_v14  ;;  %v22090_v22 = vadd.f32 %v22089_v16, %v22013_v21  ;;  %v22245_v24 = vpop.f32.mrf.mxu0 }
 0x6ff   : > { %v22165_v18 = vpop.f32.mrf.mxu1 }
 0x700   : > { %v22092_v36 = vadd.f32 %v22091_v17, %v22015_v58  ;;  %v22166_v59 = vadd.f32 %v22165_v18, %v22090_v22  ;;  %v22394_v55 = vpop.f32.mrf.mxu0 }
 0x701   : > { %v22167_v56 = vpop.f32.mrf.mxu1 }
 0x702   : > { %v22168_v9 = vadd.f32 %v22167_v56, %v22092_v36  ;;  %v22244_v2 = vadd.f32 %v22243_v43, %v22166_v59  ;;  %v26730_v20 = vpop.f32.mrf.mxu0 }
 0x703   : > { %v22317_v15 = vpop.f32.mrf.mxu1 }
 0x704   : > { %v22246_v38 = vadd.f32 %v22245_v24, %v22168_v9  ;;  %v22318_v29 = vadd.f32 %v22317_v15, %v22244_v2  ;;  %v22544_v35 = vpop.f32.mrf.mxu0 }
 0x705   : > { %v22319_v1 = vpop.f32.mrf.mxu1 }
 0x706   : > { %v29460_v13 = vadd.f32 %v22318_v29, %v21838_v26  ;;  %v22320_v57 = vadd.f32 %v22319_v1, %v22246_v38  ;;  %v26740_v19 = vpop.f32.mrf.mxu0 }
 0x707   : > { %v22470_v49 = vpop.f32.mrf.mxu1 }
 0x708   : > { %v29462_v39 = vadd.f32 %v22320_v57, %v21839_v4  ;;  %v22471_v8 = vadd.f32 %v22470_v49, %v22394_v55  ;;  %v22692_v25 = vpop.f32.mrf.mxu0 }
 0x709   : > { %v26735_v52 = vpop.f32.mrf.mxu1 }
 0x70a   : > { %v22545_v60 = vadd.f32 %v22544_v35, %v22471_v8  ;;  %v26750_v54 = vpop.f32.mrf.mxu0 }
 0x70b   : > { %v22618_v5 = vpop.f32.mrf.mxu1 }
 0x70c   : > { %v22619_v10 = vadd.f32 %v22618_v5, %v22545_v60  ;;  %v22860_v46 = vpop.f32.mrf.mxu0 }
 0x70d   : > { %v26745_v50 = vpop.f32.mrf.mxu1 }
 0x70e   : > { %v22693_v61 = vadd.f32 %v22692_v25, %v22619_v10  ;;  %v22862_v45 = vpop.f32.mrf.mxu0 }
 0x70f   : > { %v22764_v44 = vpop.f32.mrf.mxu1 }
 0x710   : > { %v22765_v42 = vadd.f32 %v22764_v44, %v22693_v61  ;;  %v23019_v7 = vpop.f32.mrf.mxu0 }
 0x711   : > { %v26755_v63 = vpop.f32.mrf.mxu1 }
 0x712   : > { %v29464_v37 = vadd.f32 %v22765_v42, %v21840_v11  ;;  %v23021_v40 = vpop.f32.mrf.mxu0 }
 0x713   : > { %v22942_v26 = vpop.f32.mrf.mxu1 }
 0x714   : > { %v23173_v0 = vpop.f32.mrf.mxu0  ;;  %v22943_v9 = vadd.f32 %v22942_v26, %v22860_v46 }
 0x715   : > { %v22944_v28 = vpop.f32.mrf.mxu1 }
 0x716   : > { %v23175_v51 = vpop.f32.mrf.mxu0  ;;  %v22945_v15 = vadd.f32 %v22944_v28, %v22862_v45  ;;  %v23020_v1 = vadd.f32 %v23019_v7, %v22943_v9 }
 0x717   : > { %v23095_v4 = vpop.f32.mrf.mxu1 }
 0x718   : > { %v23324_v23 = vpop.f32.mrf.mxu0  ;;  %v23022_v8 = vadd.f32 %v23021_v40, %v22945_v15  ;;  %v23096_v54 = vadd.f32 %v23095_v4, %v23020_v1 }
 0x719   : > { %v23097_v12 = vpop.f32.mrf.mxu1 }
 0x71a   : > { %v26760_v31 = vpop.f32.mrf.mxu0  ;;  %v23098_v46 = vadd.f32 %v23097_v12, %v23022_v8  ;;  %v23174_v42 = vadd.f32 %v23173_v0, %v23096_v54 }
 0x71b   : > { %v23247_v34 = vpop.f32.mrf.mxu1 }
 0x71c   : > { %v23474_v30 = vpop.f32.mrf.mxu0  ;;  %v23176_v31 = vadd.f32 %v23175_v51, %v23098_v46 }
 0x71d   : > { %v29466_v53 = vpop.f32.mrf.mxu1 }
 0x71e   : > { %v26770_v3 = vpop.f32.mrf.mxu0 }
 0x71f   : > { %v23400_v27 = vpop.f32.mrf.mxu1 }
 0x720   : > { %v29468_v32 = vpop.f32.mrf.mxu0  ;;  %v23401_v26 = vadd.f32 %v23400_v27, %v23324_v23 }
 0x721   : > { %v26765_v41 = vpop.f32.mrf.mxu1 }
 0x722   : > { %v26780_v14 = vpop.f32.mrf.mxu0 }
 0x723   : > { %v29470_v62 = vpop.f32.mrf.mxu1 }
 0x724   : > { %v23790_v48 = vpop.f32.mrf.mxu0 }
 0x725   : > { %v26775_v16 = vpop.f32.mrf.mxu1 }
 0x726   : > { %v23792_v6 = vpop.f32.mrf.mxu0  ;;  %v23248_v16 = vadd.f32 %v23247_v34, %v23174_v42 }
 0x727   : > { %v29472_v11 = vpop.f32.mrf.mxu1 }
 0x728   : > { %v23949_v17 = vpop.f32.mrf.mxu0 }
 0x729   : > { %v26785_v33 = vpop.f32.mrf.mxu1 }
 0x72a   : > { %v23951_v21 = vpop.f32.mrf.mxu0 }
 0x72b   : > { %v23872_v43 = vpop.f32.mrf.mxu1 }
 0x72c   : > { %v24103_v47 = vpop.f32.mrf.mxu0  ;;  %v23873_v29 = vadd.f32 %v23872_v43, %v23790_v48  ;;  %v23250_v43 = vadd.f32 %v29466_v53, %v23176_v31 }
 0x72d   : > { %v23874_v58 = vpop.f32.mrf.mxu1 }
 0x72e   : > { %v24105_v22 = vpop.f32.mrf.mxu0  ;;  %v23875_v19 = vadd.f32 %v23874_v58, %v23792_v6  ;;  %v23950_v52 = vadd.f32 %v23949_v17, %v23873_v29  ;;  %v23475_v6 = vadd.f32 %v23474_v30, %v23401_v26  ;;  %v23699_v9 = vadd.f32 %v23250_v43, %v29462_v39 }
 0x72f   : > { %v24025_v24 = vpop.f32.mrf.mxu1 }
 0x730   : > { %v24254_v18 = vpop.f32.mrf.mxu0  ;;  %v23952_v10 = vadd.f32 %v23951_v21, %v23875_v19  ;;  %v24026_v44 = vadd.f32 %v24025_v24, %v23950_v52 }
 0x731   : > { %v24027_v36 = vpop.f32.mrf.mxu1 }
 0x732   : > { %v26790_v59 = vpop.f32.mrf.mxu0  ;;  %v24028_v28 = vadd.f32 %v24027_v36, %v23952_v10  ;;  %v24104_v41 = vadd.f32 %v24103_v47, %v24026_v44  ;;  %v23698_v47 = vadd.f32 %v23248_v16, %v29460_v13  ;;  %v23549_v36 = vadd.f32 %v29470_v62, %v23475_v6  ;;  %v25565_v62 = vpop.permute.xlu1 %25564 }
 0x733   : > { %v24177_v55 = vpop.f32.mrf.mxu1 }
 0x734   : > { %v24404_v56 = vpop.f32.mrf.mxu0  ;;  %v24106_v17 = vadd.f32 %v24105_v22, %v24028_v28  ;;  %v24178_v58 = vadd.f32 %v24177_v55, %v24104_v41  ;;  %v23623_v1 = vadd.f32 %v29468_v32, %v23549_v36 }
 0x735   : > { %v24179_v2 = vpop.f32.mrf.mxu1 }
 0x736   : > { %v26800_v20 = vpop.f32.mrf.mxu0  ;;  %v24180_v34 = vadd.f32 %v24179_v2, %v24106_v17  ;;  %v24628_v15 = vadd.f32 %v24178_v58, %v23698_v47 }
 0x737   : > { %v24330_v38 = vpop.f32.mrf.mxu1 }
 0x738   : > { %v29474_v35 = vpop.f32.mrf.mxu0  ;;  %v24331_v40 = vadd.f32 %v24330_v38, %v24254_v18 }
 0x739   : > { %v26795_v57 = vpop.f32.mrf.mxu1 }
 0x73a   : > { %v26810_v49 = vpop.f32.mrf.mxu0  ;;  %v24405_v23 = vadd.f32 %v24404_v56, %v24331_v40  ;;  %v24629_v57 = vadd.f32 %v24180_v34, %v23699_v9 }
 0x73b   : > { %v24478_v25 = vpop.f32.mrf.mxu1 }
 0x73c   : > { %v24720_v60 = vpop.f32.mrf.mxu0  ;;  %v24479_v53 = vadd.f32 %v24478_v25, %v24405_v23  ;;  %v23695_v25 = vadd.f32 %v29472_v11, %v23623_v1 }
 0x73d   : > { %v26805_v5 = vpop.f32.mrf.mxu1 }
 0x73e   : > { %v24722_v50 = vpop.f32.mrf.mxu0  ;;  %v24553_v8 = vadd.f32 %v29474_v35, %v24479_v53  ;;  %v23700_v28 = vadd.f32 %v23695_v25, %v29464_v37 }
 0x73f   : > { %v24624_v61 = vpop.f32.mrf.mxu1 }
 0x740   : > { %v24879_v45 = vpop.f32.mrf.mxu0 }
 0x741   : > { %v26815_v63 = vpop.f32.mrf.mxu1 }
 0x742   : > { %v24881_v7 = vpop.f32.mrf.mxu0 }
 0x743   : > { %v24802_v3 = vpop.f32.mrf.mxu1 }
 0x744   : > { %v24803_v14 = vadd.f32 %v24802_v3, %v24720_v60  ;;  %v25033_v48 = vpop.f32.mrf.mxu0 }
 0x745   : > { %v24804_v4 = vpop.f32.mrf.mxu1 }
 0x746   : > { %v24805_v33 = vadd.f32 %v24804_v4, %v24722_v50  ;;  %v24880_v12 = vadd.f32 %v24879_v45, %v24803_v14  ;;  %v25035_v21 = vpop.f32.mrf.mxu0  ;;  %v24625_v45 = vadd.f32 %v24624_v61, %v24553_v8 }
 0x747   : > { %v24955_v0 = vpop.f32.mrf.mxu1 }
 0x748   : > { %v24882_v27 = vadd.f32 %v24881_v7, %v24805_v33  ;;  %v24956_v24 = vadd.f32 %v24955_v0, %v24880_v12  ;;  %v25184_v51 = vpop.f32.mrf.mxu0  ;;  %v24630_v31 = vadd.f32 %v24625_v45, %v23700_v28 }
 0x749   : > { %v24957_v18 = vpop.f32.mrf.mxu1 }
 0x74a   : > { %v24958_v59 = vadd.f32 %v24957_v18, %v24882_v27  ;;  %v25034_v30 = vadd.f32 %v25033_v48, %v24956_v24  ;;  %v26820_v22 = vpop.f32.mrf.mxu0 }
 0x74b   : > { %v25107_v20 = vpop.f32.mrf.mxu1 }
 0x74c   : > { %v25036_v38 = vadd.f32 %v25035_v21, %v24958_v59  ;;  %v25108_v55 = vadd.f32 %v25107_v20, %v25034_v30  ;;  %v25334_v56 = vpop.f32.mrf.mxu0 }
 0x74d   : > { %v25109_v29 = vpop.f32.mrf.mxu1 }
 0x74e   : > { %v25558_v13 = vadd.f32 %v25108_v55, %v24628_v15  ;;  %v25110_v19 = vadd.f32 %v25109_v29, %v25036_v38  ;;  %v26830_v49 = vpop.f32.mrf.mxu0 }
 0x74f   : > { %v25260_v2 = vpop.f32.mrf.mxu1 }
 0x750   : > { %v25567_v52 = vadd.f32 %v25565_v62, %v25558_v13  ;;  %v25559_v60 = vadd.f32 %v25110_v19, %v24629_v57  ;;  %v25261_v39 = vadd.f32 %v25260_v2, %v25184_v51 }
 0x751   : > { %v26825_v54 = vpop.f32.mrf.mxu1  ;;  %v25482_v5 = vpop.f32.mrf.mxu0 }
 0x752   : > { %v25707_v10 = vmul.f32 -1.442695, %v25567_v52  ;;  %v25568_v50 = vadd.f32 %v25565_v62, %v25559_v60  ;;  %v25335_v46 = vadd.f32 %v25334_v56, %v25261_v39 }
 0x753   : > { %v25408_v44 = vpop.f32.mrf.mxu1  ;;  %v26840_v32 = vpop.f32.mrf.mxu0 }
 0x754   : > { %26871 = vpow2.f32 %v25707_v10  ;;  %v25708_v42 = vmul.f32 -1.442695, %v25568_v50  ;;  %v25409_v63 = vadd.f32 %v25408_v44, %v25335_v46 }
 0x755   : > { %v26835_v26 = vpop.f32.mrf.mxu1 }
 0x756   : > { %26873 = vpow2.f32 %v25708_v42  ;;  %v25483_v35 = vadd.f32 %v25482_v5, %v25409_v63 }
 0x757   : > { %v25554_v7 = vpop.f32.mrf.mxu1 }
 0x758   : > { %v25555_v3 = vadd.f32 %v25554_v7, %v25483_v35 }
 0x759   : > { %v26845_v41 = vpop.f32.mrf.mxu1 }
 0x75a   : > { %v25560_v11 = vadd.f32 %v25555_v3, %v24630_v31 }
 0x75c   : > { %v25569_v40 = vadd.f32 %v25565_v62, %v25560_v11 }
 0x75e   : > { %v25709_v14 = vmul.f32 -1.442695, %v25569_v40 }
 0x760   : > { %26875 = vpow2.f32 %v25709_v14 }
 0x761   : > { %v26872_v48 = vpop.eup %26871 }
 0x762   : > { %v25579_v16 = vadd.f32 1.0, %v26872_v48 }
 0x763   : > { %v26874_v61 = vpop.eup %26873 }
 0x764   : > { %v25580_v4 = vadd.f32 1.0, %v26874_v61  ;;  %26877 = vrcp.f32 %v25579_v16 }
 0x766   : > { %26879 = vrcp.f32 %v25580_v4 }
 0x76d   : > { %v26876_v6 = vpop.eup %26875 }
 0x76e   : > { %v25581_v17 = vadd.f32 1.0, %v26876_v6 }
 0x770   : > { %26881 = vrcp.f32 %v25581_v17 }
 0x771   : > { %v26878_v37 = vpop.eup %26877 }
 0x773   : > { %v26880_v33 = vpop.eup %26879 }
 0x774   : > { %v25590_v12 = vcombine.low %v26878_v37, %v26880_v33 }
 0x776   : > { %25592 = vst [vmem:[%s372_s19] sm:$0x77] %v25590_v12 }
 0x77d   : > { %v26882_v21 = vpop.eup %26881 }
 0x77e   : > { %25594 = vst.msk [vmem:[%s372_s19 + $0x8] sm:$0x7] %vm25593_vm1, %v26882_v21 }
 0x77f PF: > { %s19_s30 = sadd.s32 1, %s26889_s30  }
 0x780   : > { %p16_p4 = scmp.ge.s32.totalorder %s19_s30, 4  }
 0x782   :  { %18 = sbr.rel (!%p16_p4) target bundleno = 1 (0x1), region = 116 }

</bundles_post_ra>
